<compile_context>
chip_gen: v5e
topology: v5e:2x2
jax: 0.10.0
libtpu: 0.0.40
codegen_flags: <defaults>
</compile_context>

<pallas_src>
import numpy as np
import jax
import jax.numpy as jnp
from jax import lax
from jax.experimental import pallas as pl
from jax.experimental.pallas import tpu as pltpu


# ----------------------------------------------------------------------------
# Feature probes (tiny pallas_calls): pick the fast path only if it both
# compiles and produces correct values on this backend, else fall back.
# ----------------------------------------------------------------------------

def _try_pallas(kernel, out_shape, args, expected):
    try:
        out = pl.pallas_call(kernel, out_shape=out_shape)(*args)
        out = np.asarray(jax.block_until_ready(out))
        return bool(np.allclose(out, expected, atol=1e-4))
    except Exception:
        return False


def _probe_lane_concat():
    # unaligned (12-lane pieces) concat along the minor dim feeding one matmul
    def k(a_ref, b_ref, o_ref):
        pieces = [a_ref[...] if i % 2 == 0 else b_ref[...] for i in range(9)]
        x = jnp.concatenate(pieces, axis=-1)                       # (16, 108)
        o_ref[...] = jnp.dot(x, jnp.full((108, 8), 0.5, jnp.float32),
                             preferred_element_type=jnp.float32)
    a = jnp.ones((16, 12), jnp.float32)
    b = 2.0 * jnp.ones((16, 12), jnp.float32)
    exp = np.full((16, 8), (5 * 12 * 1.0 + 4 * 12 * 2.0) * 0.5, np.float32)
    return _try_pallas(k, jax.ShapeDtypeStruct((16, 8), jnp.float32), (a, b), exp)


def _probe_strided_read():
    # stride-2 read on the sublane dimension of a VMEM ref
    def k(x_ref, o_ref):
        c0 = x_ref[:, pl.ds(0, 8, stride=2), :]
        c1 = x_ref[:, pl.ds(1, 8, stride=2), :]
        o_ref[...] = jnp.maximum(c0, c1)
    x_np = np.arange(4 * 16 * 12, dtype=np.float32).reshape(4, 16, 12)
    exp = np.maximum(x_np[:, 0::2, :], x_np[:, 1::2, :])
    return _try_pallas(k, jax.ShapeDtypeStruct((4, 8, 12), jnp.float32),
                       (jnp.asarray(x_np),), exp)


FOLD_OK = _probe_lane_concat()
STRIDED_OK = _probe_strided_read()


# ----------------------------------------------------------------------------
# REBNCONV kernel: 3x3 dilated conv (+ folded BN) + ReLU, optional fused
# residual add and fused 2x2 max pool.  One grid step per batch element.
# ----------------------------------------------------------------------------

def _make_rebnconv_kernel(H, W, Wp, dil, n_in, has_res, fold, pool_fused):
    L = H * Wp                                   # matmul rows (incl. junk cols)
    Ho, Wo = H // 2, W // 2                      # only used when pool_fused
    offs = [ky * dil * Wp + kx * dil for ky in range(3) for kx in range(3)]

    def kernel(*refs):
        xs = refs[:n_in]                         # each (Lp, Ci) flattened, padded
        ws = refs[n_in:2 * n_in]                 # (9*Ci, Cout) or (9, Ci, Cout)
        b_ref = refs[2 * n_in]                   # (1, Cout)
        idx = 2 * n_in + 1
        r_ref = None
        if has_res:
            r_ref = refs[idx]                    # (H, W, Cout)
            idx += 1
        o_ref = refs[idx]                        # (H, W, Cout)
        idx += 1
        p_ref = None
        if pool_fused:
            p_ref = refs[idx]                    # (Ho, Wo, Cout)
            idx += 1
        y_sc = refs[idx]                         # VMEM scratch (L, Cout)
        idx += 1
        rm_sc = refs[idx] if pool_fused else None  # VMEM scratch (Ho, W, Cout)

        cout = o_ref.shape[-1]
        acc = jnp.zeros((L, cout), jnp.float32)
        for j in range(n_in):
            if fold:
                # fold all 9 taps into one K = 9*Ci contraction
                xmat = jnp.concatenate([xs[j][off:off + L, :] for off in offs],
                                       axis=-1)
                acc = acc + jnp.dot(xmat, ws[j][...],
                                    preferred_element_type=jnp.float32)
            else:
                for t, off in enumerate(offs):
                    acc = acc + jnp.dot(xs[j][off:off + L, :], ws[j][t],
                                        preferred_element_type=jnp.float32)

        y_sc[...] = jnp.maximum(acc + b_ref[...], 0.0)

        # strip the Wp-W junk columns row by row, fuse residual / row-pair max
        even_row = None
        for h in range(H):
            row = y_sc[h * Wp:h * Wp + W, :]
            if has_res:
                row = row + r_ref[h]
            o_ref[h] = row
            if pool_fused:
                if h % 2 == 0:
                    even_row = row
                else:
                    rm_sc[h // 2] = jnp.maximum(even_row, row)

        if pool_fused:
            c0 = rm_sc[:, pl.ds(0, Wo, stride=2), :]
            c1 = rm_sc[:, pl.ds(1, Wo, stride=2), :]
            p_ref[...] = jnp.maximum(c0, c1)

    return kernel


def rebnconv_pallas(xs, w, b, dil, residual=None, pool=False):
    """REBNCONV on a list of NHWC inputs (implicit channel concat).

    xs: list of (N, H, W, Ci); w: (3, 3, sum(Ci), Cout) BN-folded; b: (Cout,).
    residual: optional (N, H, W, Cout) added after the ReLU.
    pool: also return the 2x2/stride-2 (ceil) max-pooled output.
    """
    N, H, W, _ = xs[0].shape
    Cout = w.shape[-1]
    d = dil
    Wp = W + 2 * d
    Lp = (H + 2 * d + 1) * Wp        # +1 extra zero row so tap slabs never overrun
    L = H * Wp
    Ho, Wo = -(-H // 2), -(-W // 2)

    cs = [int(xx.shape[-1]) for xx in xs]
    if len(xs) > 1:
        wsplit = jnp.split(w, np.cumsum(cs)[:-1].tolist(), axis=2)
    else:
        wsplit = [w]

    pool_fused = pool and STRIDED_OK and (H % 2 == 0) and (W % 2 == 0)

    args, in_specs = [], []
    for xx, ci in zip(xs, cs):
        xp = jnp.pad(xx, ((0, 0), (d, d + 1), (d, d), (0, 0)))
        args.append(xp.reshape(N, Lp, ci))
        in_specs.append(pl.BlockSpec((None, Lp, ci), lambda n: (n, 0, 0)))
    for ww, ci in zip(wsplit, cs):
        if FOLD_OK:
            args.append(ww.reshape(9 * ci, Cout))
            in_specs.append(pl.BlockSpec((9 * ci, Cout), lambda n: (0, 0)))
        else:
            args.append(ww.reshape(9, ci, Cout))
            in_specs.append(pl.BlockSpec((9, ci, Cout), lambda n: (0, 0, 0)))
    args.append(b.reshape(1, Cout))
    in_specs.append(pl.BlockSpec((1, Cout), lambda n: (0, 0)))
    if residual is not None:
        args.append(residual)
        in_specs.append(pl.BlockSpec((None, H, W, Cout), lambda n: (n, 0, 0, 0)))

    out_shape = [jax.ShapeDtypeStruct((N, H, W, Cout), jnp.float32)]
    out_specs = [pl.BlockSpec((None, H, W, Cout), lambda n: (n, 0, 0, 0))]
    scratch = [pltpu.VMEM((L, Cout), jnp.float32)]
    if pool_fused:
        out_shape.append(jax.ShapeDtypeStruct((N, Ho, Wo, Cout), jnp.float32))
        out_specs.append(pl.BlockSpec((None, Ho, Wo, Cout), lambda n: (n, 0, 0, 0)))
        scratch.append(pltpu.VMEM((Ho, W, Cout), jnp.float32))

    kernel = _make_rebnconv_kernel(H, W, Wp, d, len(xs), residual is not None,
                                   FOLD_OK, pool_fused)
    outs = pl.pallas_call(
        kernel,
        out_shape=tuple(out_shape),
        grid=(N,),
        in_specs=in_specs,
        out_specs=tuple(out_specs),
        scratch_shapes=scratch,
        compiler_params=pltpu.CompilerParams(
            dimension_semantics=("parallel",)),
    )(*args)

    y = outs[0]
    if not pool:
        return y
    pooled = outs[1] if pool_fused else maxpool2x2_ceil_pallas(y)
    return y, pooled


# ----------------------------------------------------------------------------
# Fallback standalone MaxPool2d(2, stride=2, ceil_mode=True) kernel
# ----------------------------------------------------------------------------

def _max4_kernel(a_ref, b_ref, c_ref, d_ref, o_ref):
    o_ref[...] = jnp.maximum(jnp.maximum(a_ref[...], b_ref[...]),
                             jnp.maximum(c_ref[...], d_ref[...]))


def maxpool2x2_ceil_pallas(x):
    N, H, W, C = x.shape
    Ho, Wo = -(-H // 2), -(-W // 2)
    xp = jnp.pad(x, ((0, 0), (0, 2 * Ho - H), (0, 2 * Wo - W), (0, 0)),
                 constant_values=-jnp.inf)
    views = [xp[:, dy::2, dx::2, :] for dy in (0, 1) for dx in (0, 1)]
    spec = pl.BlockSpec((None, Ho, Wo, C), lambda n: (n, 0, 0, 0))
    return pl.pallas_call(
        _max4_kernel,
        out_shape=jax.ShapeDtypeStruct((N, Ho, Wo, C), jnp.float32),
        grid=(N,),
        in_specs=[spec] * 4,
        out_specs=spec,
        compiler_params=pltpu.CompilerParams(
            dimension_semantics=("parallel",)),
    )(*views)


# ----------------------------------------------------------------------------
# Separable bilinear upsample (align_corners=True): two per-axis matmuls
# ----------------------------------------------------------------------------

def _matmul_right_kernel(x_ref, m_ref, o_ref):
    o_ref[...] = jnp.dot(x_ref[...], m_ref[...],
                         preferred_element_type=jnp.float32)


def _matmul_left_kernel(m_ref, x_ref, o_ref):
    o_ref[...] = jnp.dot(m_ref[...], x_ref[...],
                         preferred_element_type=jnp.float32)


def _interp_matrix_np(out_size, in_size):
    """1-D bilinear interpolation matrix, align_corners=True semantics."""
    A = np.zeros((out_size, in_size), np.float32)
    if in_size == 1 or out_size == 1:
        A[:, 0] = 1.0
        return A
    coords = np.arange(out_size, dtype=np.float64) * (in_size - 1) / (out_size - 1)
    i0 = np.clip(np.floor(coords).astype(np.int64), 0, in_size - 1)
    i1 = np.minimum(i0 + 1, in_size - 1)
    w1 = (coords - i0).astype(np.float32)
    w0 = 1.0 - w1
    rows = np.arange(out_size)
    np.add.at(A, (rows, i0), w0)
    np.add.at(A, (rows, i1), w1)
    return A


def upsample_like_pallas(src, tar):
    """F.interpolate(src, size=tar.shape[1:3], mode='bilinear', align_corners=True)."""
    N, h, w, C = src.shape
    Ho, Wo = int(tar.shape[1]), int(tar.shape[2])
    Aw_t = jnp.asarray(_interp_matrix_np(Wo, w).T)            # (w, Wo)
    Ah = jnp.asarray(_interp_matrix_np(Ho, h))                # (Ho, h)

    # Work in (H, C, W) layout so both passes are plain 2-D matmuls.
    xs = jnp.transpose(src, (0, 1, 3, 2)).reshape(N, h * C, w)
    y1 = pl.pallas_call(
        _matmul_right_kernel,
        out_shape=jax.ShapeDtypeStruct((N, h * C, Wo), jnp.float32),
        grid=(N,),
        in_specs=[pl.BlockSpec((None, h * C, w), lambda n: (n, 0, 0)),
                  pl.BlockSpec((w, Wo), lambda n: (0, 0))],
        out_specs=pl.BlockSpec((None, h * C, Wo), lambda n: (n, 0, 0)),
        compiler_params=pltpu.CompilerParams(
            dimension_semantics=("parallel",)),
    )(xs, Aw_t)

    y1 = y1.reshape(N, h, C * Wo)
    y2 = pl.pallas_call(
        _matmul_left_kernel,
        out_shape=jax.ShapeDtypeStruct((N, Ho, C * Wo), jnp.float32),
        grid=(N,),
        in_specs=[pl.BlockSpec((Ho, h), lambda n: (0, 0)),
                  pl.BlockSpec((None, h, C * Wo), lambda n: (n, 0, 0))],
        out_specs=pl.BlockSpec((None, Ho, C * Wo), lambda n: (n, 0, 0)),
        compiler_params=pltpu.CompilerParams(
            dimension_semantics=("parallel",)),
    )(Ah, y1)

    return jnp.transpose(y2.reshape(N, Ho, C, Wo), (0, 1, 3, 2))


# ----------------------------------------------------------------------------
# Pure-JAX reference (correctness check)
# ----------------------------------------------------------------------------

def rebnconv_ref(xs, w, b, dil, residual=None, pool=False):
    x = xs[0] if len(xs) == 1 else jnp.concatenate(xs, axis=-1)
    y = lax.conv_general_dilated(
        x, w, window_strides=(1, 1),
        padding=[(dil, dil), (dil, dil)],
        rhs_dilation=(dil, dil),
        dimension_numbers=("NHWC", "HWIO", "NHWC"),
        precision=lax.Precision.HIGHEST)
    y = jnp.maximum(y + b, 0.0)
    if residual is not None:
        y = y + residual
    if not pool:
        return y
    N, H, W, C = y.shape
    Ho, Wo = -(-H // 2), -(-W // 2)
    pooled = lax.reduce_window(
        y, -jnp.inf, lax.max,
        window_dimensions=(1, 2, 2, 1), window_strides=(1, 2, 2, 1),
        padding=[(0, 0), (0, 2 * Ho - H), (0, 2 * Wo - W), (0, 0)])
    return y, pooled


def upsample_like_ref(src, tar):
    Ah = jnp.asarray(_interp_matrix_np(tar.shape[1], src.shape[1]))
    Aw = jnp.asarray(_interp_matrix_np(tar.shape[2], src.shape[2]))
    return jnp.einsum("oh,pw,nhwc->nopc", Ah, Aw, src,
                      precision=lax.Precision.HIGHEST)


# ----------------------------------------------------------------------------
# RSU5 forward (mirrors the PyTorch module, NHWC internally)
# ----------------------------------------------------------------------------

def rsu5_forward(x, params, conv_fn, up_fn):
    hxin = conv_fn([x], *params["in"], 1)
    hx1, hx = conv_fn([hxin], *params["1"], 1, pool=True)
    hx2, hx = conv_fn([hx], *params["2"], 1, pool=True)
    hx3, hx = conv_fn([hx], *params["3"], 1, pool=True)
    hx4 = conv_fn([hx], *params["4"], 1)
    hx5 = conv_fn([hx4], *params["5"], 2)

    hx4d = conv_fn([hx5, hx4], *params["4d"], 1)
    hx4dup = up_fn(hx4d, hx3)
    hx3d = conv_fn([hx4dup, hx3], *params["3d"], 1)
    hx3dup = up_fn(hx3d, hx2)
    hx2d = conv_fn([hx3dup, hx2], *params["2d"], 1)
    hx2dup = up_fn(hx2d, hx1)
    # last REBNCONV with fused residual (hx1d + hxin)
    hx1d = conv_fn([hx2dup, hx1], *params["1d"], 1, residual=hxin)
    return hx1d


# ----------------------------------------------------------------------------
# Deterministic synthetic parameters (conv + eval-mode BN folded together)
# ----------------------------------------------------------------------------

def make_rebnconv_params(key, in_ch, out_ch):
    k1, k2, k3, k4, k5, k6 = jax.random.split(key, 6)
    w = 0.1 * jax.random.normal(k1, (3, 3, in_ch, out_ch), jnp.float32)
    conv_b = 0.1 * jax.random.normal(k2, (out_ch,), jnp.float32)
    gamma = 1.0 + 0.1 * jax.random.normal(k3, (out_ch,), jnp.float32)
    beta = 0.1 * jax.random.normal(k4, (out_ch,), jnp.float32)
    run_mean = 0.1 * jax.random.normal(k5, (out_ch,), jnp.float32)
    run_var = 0.5 + jnp.abs(jax.random.normal(k6, (out_ch,), jnp.float32))
    eps = 1e-5
    scale = gamma / jnp.sqrt(run_var + eps)
    w_folded = w * scale                        # broadcast over Cout (last dim)
    b_folded = (conv_b - run_mean) * scale + beta
    return w_folded, b_folded


if __name__ == "__main__":
    in_ch, mid_ch, out_ch = 3, 12, 3
    N, H, W = 2, 16, 16

    key = jax.random.PRNGKey(0)
    kx, kp = jax.random.split(key)
    x_nchw = jax.random.normal(kx, (N, in_ch, H, W), jnp.float32)
    x = jnp.transpose(x_nchw, (0, 2, 3, 1))     # NCHW -> NHWC

    names = ["in", "1", "2", "3", "4", "5", "4d", "3d", "2d", "1d"]
    chans = [(in_ch, out_ch), (out_ch, mid_ch), (mid_ch, mid_ch),
             (mid_ch, mid_ch), (mid_ch, mid_ch), (mid_ch, mid_ch),
             (2 * mid_ch, mid_ch), (2 * mid_ch, mid_ch),
             (2 * mid_ch, mid_ch), (2 * mid_ch, out_ch)]
    pkeys = jax.random.split(kp, len(names))
    params = {nm: make_rebnconv_params(k, ci, co)
              for nm, k, (ci, co) in zip(names, pkeys, chans)}

    # Pallas forward
    out_nhwc = rsu5_forward(x, params, rebnconv_pallas, upsample_like_pallas)
    out_nhwc = jax.block_until_ready(out_nhwc)
    out = jnp.transpose(out_nhwc, (0, 3, 1, 2))  # back to NCHW
    assert out.shape == (N, out_ch, H, W), out.shape

    # Pure-JAX reference for verification
    ref_nhwc = rsu5_forward(x, params, rebnconv_ref, upsample_like_ref)
    ref_nhwc = jax.block_until_ready(ref_nhwc)

    err = float(jnp.max(jnp.abs(out_nhwc - ref_nhwc)))
    assert np.isfinite(err) and err < 2e-3, f"max abs error too large: {err}"

    print("KERNEL_OK")
</pallas_src>

<mosaic_0001>
module attributes {stable_mosaic.version = 11 : i64} {
  func.func @k(%arg0: memref<16x12xf32, #tpu.memory_space<vmem>>, %arg1: memref<16x12xf32, #tpu.memory_space<vmem>>, %arg2: memref<16x8xf32, #tpu.memory_space<vmem>>) attributes {dimension_semantics = [], scalar_prefetch = 0 : i64, scratch_operands = 0 : i64, tpu.core_type = #tpu.core_type<tc>} {
    %c0 = arith.constant 0 : index
    %c0_0 = arith.constant 0 : index
    %0 = vector.load %arg0[%c0, %c0_0] : memref<16x12xf32, #tpu.memory_space<vmem>>, vector<16x12xf32>
    %c0_1 = arith.constant 0 : index
    %c0_2 = arith.constant 0 : index
    %1 = vector.load %arg1[%c0_1, %c0_2] : memref<16x12xf32, #tpu.memory_space<vmem>>, vector<16x12xf32>
    %c0_3 = arith.constant 0 : index
    %c0_4 = arith.constant 0 : index
    %2 = vector.load %arg0[%c0_3, %c0_4] : memref<16x12xf32, #tpu.memory_space<vmem>>, vector<16x12xf32>
    %c0_5 = arith.constant 0 : index
    %c0_6 = arith.constant 0 : index
    %3 = vector.load %arg1[%c0_5, %c0_6] : memref<16x12xf32, #tpu.memory_space<vmem>>, vector<16x12xf32>
    %c0_7 = arith.constant 0 : index
    %c0_8 = arith.constant 0 : index
    %4 = vector.load %arg0[%c0_7, %c0_8] : memref<16x12xf32, #tpu.memory_space<vmem>>, vector<16x12xf32>
    %c0_9 = arith.constant 0 : index
    %c0_10 = arith.constant 0 : index
    %5 = vector.load %arg1[%c0_9, %c0_10] : memref<16x12xf32, #tpu.memory_space<vmem>>, vector<16x12xf32>
    %c0_11 = arith.constant 0 : index
    %c0_12 = arith.constant 0 : index
    %6 = vector.load %arg0[%c0_11, %c0_12] : memref<16x12xf32, #tpu.memory_space<vmem>>, vector<16x12xf32>
    %c0_13 = arith.constant 0 : index
    %c0_14 = arith.constant 0 : index
    %7 = vector.load %arg1[%c0_13, %c0_14] : memref<16x12xf32, #tpu.memory_space<vmem>>, vector<16x12xf32>
    %c0_15 = arith.constant 0 : index
    %c0_16 = arith.constant 0 : index
    %8 = vector.load %arg0[%c0_15, %c0_16] : memref<16x12xf32, #tpu.memory_space<vmem>>, vector<16x12xf32>
    %9 = tpu.concatenate %0, %1, %2, %3, %4, %5, %6, %7, %8 in 1 : vector<16x12xf32>, vector<16x12xf32>, vector<16x12xf32>, vector<16x12xf32>, vector<16x12xf32>, vector<16x12xf32>, vector<16x12xf32>, vector<16x12xf32>, vector<16x12xf32> -> vector<16x108xf32>
    %cst = arith.constant 5.000000e-01 : f32
    %10 = vector.broadcast %cst : f32 to vector<108x8xf32>
    %cst_17 = arith.constant dense<0.000000e+00> : vector<16x8xf32>
    %11 = tpu.matmul %9, %10, %cst_17 {dimension_numbers = #tpu.dot_dimension_numbers<[1], [0], [0], [1], [0, 0, 1, 1], [], []>} : vector<16x108xf32>, vector<108x8xf32>, vector<16x8xf32> -> vector<16x8xf32>
    %c0_18 = arith.constant 0 : index
    %c0_19 = arith.constant 0 : index
    %12 = vector.load %arg2[%c0_18, %c0_19] : memref<16x8xf32, #tpu.memory_space<vmem>>, vector<16x8xf32>
    tpu.vector_store %arg2[%c0_18, %c0_19], %11 {strides = array<i32>} : memref<16x8xf32, #tpu.memory_space<vmem>>, vector<16x8xf32>,
    return
  }
}

module attributes {stable_mosaic.version = 11 : i64} {
  func.func @k(%arg0: memref<4x16x12xf32, #tpu.memory_space<vmem>>, %arg1: memref<4x8x12xf32, #tpu.memory_space<vmem>>) attributes {dimension_semantics = [], scalar_prefetch = 0 : i64, scratch_operands = 0 : i64, tpu.core_type = #tpu.core_type<tc>} {
    %c0 = arith.constant 0 : index
    %c0_0 = arith.constant 0 : index
    %c0_1 = arith.constant 0 : index
    %0 = tpu.strided_load %arg0[%c0, %c0_0, %c0_1] {strides = array<i32: 1, 2, 1>} : memref<4x16x12xf32, #tpu.memory_space<vmem>>, vector<4x8x12xf32>
    %c0_2 = arith.constant 0 : index
    %c1 = arith.constant 1 : index
    %c0_3 = arith.constant 0 : index
    %1 = tpu.strided_load %arg0[%c0_2, %c1, %c0_3] {strides = array<i32: 1, 2, 1>} : memref<4x16x12xf32, #tpu.memory_space<vmem>>, vector<4x8x12xf32>
    %2 = arith.maximumf %0, %1 : vector<4x8x12xf32>
    %c0_4 = arith.constant 0 : index
    %c0_5 = arith.constant 0 : index
    %c0_6 = arith.constant 0 : index
    %3 = vector.load %arg1[%c0_4, %c0_5, %c0_6] : memref<4x8x12xf32, #tpu.memory_space<vmem>>, vector<4x8x12xf32>
    tpu.vector_store %arg1[%c0_4, %c0_5, %c0_6], %2 {strides = array<i32>} : memref<4x8x12xf32, #tpu.memory_space<vmem>>, vector<4x8x12xf32>,
    return
  }
}

module attributes {stable_mosaic.version = 11 : i64} {
  func.func @kernel(%arg0: i32, %arg1: memref<1x342x3xf32, #tpu.memory_space<vmem>>, %arg2: memref<9x3x3xf32, #tpu.memory_space<vmem>>, %arg3: memref<1x3xf32, #tpu.memory_space<vmem>>, %arg4: memref<1x16x16x3xf32, #tpu.memory_space<vmem>>, %arg5: memref<288x3xf32, #tpu.memory_space<vmem>>) attributes {dimension_semantics = [#tpu.dimension_semantics<parallel>], iteration_bounds = array<i64: 2>, scalar_prefetch = 0 : i64, scratch_operands = 1 : i64, tpu.core_type = #tpu.core_type<tc>, window_params = [{transform_indices = @transform_0, window_bounds = array<i64: 1, 342, 3>}, {pipeline_mode = #tpu.pipeline_mode<synchronous>, transform_indices = @transform_1, window_bounds = array<i64: 9, 3, 3>}, {pipeline_mode = #tpu.pipeline_mode<synchronous>, transform_indices = @transform_2, window_bounds = array<i64: 1, 3>}, {transform_indices = @transform_3, window_bounds = array<i64: 1, 16, 16, 3>}]} {
    %cst = arith.constant 0.000000e+00 : f32
    %0 = vector.broadcast %cst : f32 to vector<288x3xf32>
    %c0 = arith.constant 0 : index
    %c0_0 = arith.constant 0 : index
    %c0_1 = arith.constant 0 : index
    %1 = vector.load %arg1[%c0, %c0_0, %c0_1] : memref<1x342x3xf32, #tpu.memory_space<vmem>>, vector<1x288x3xf32>
    %2 = vector.shape_cast %1 : vector<1x288x3xf32> to vector<288x3xf32>
    %c0_2 = arith.constant 0 : index
    %c0_3 = arith.constant 0 : index
    %c0_4 = arith.constant 0 : index
    %3 = vector.load %arg2[%c0_2, %c0_3, %c0_4] : memref<9x3x3xf32, #tpu.memory_space<vmem>>, vector<1x3x3xf32>
    %4 = vector.shape_cast %3 : vector<1x3x3xf32> to vector<3x3xf32>
    %cst_5 = arith.constant dense<0.000000e+00> : vector<288x3xf32>
    %5 = tpu.matmul %2, %4, %cst_5 {dimension_numbers = #tpu.dot_dimension_numbers<[1], [0], [0], [1], [0, 0, 1, 1], [], []>} : vector<288x3xf32>, vector<3x3xf32>, vector<288x3xf32> -> vector<288x3xf32>
    %6 = arith.addf %0, %5 : vector<288x3xf32>
    %c0_6 = arith.constant 0 : index
    %c1 = arith.constant 1 : index
    %c0_7 = arith.constant 0 : index
    %7 = vector.load %arg1[%c0_6, %c1, %c0_7] : memref<1x342x3xf32, #tpu.memory_space<vmem>>, vector<1x288x3xf32>
    %8 = vector.shape_cast %7 : vector<1x288x3xf32> to vector<288x3xf32>
    %c1_8 = arith.constant 1 : index
    %c0_9 = arith.constant 0 : index
    %c0_10 = arith.constant 0 : index
    %9 = vector.load %arg2[%c1_8, %c0_9, %c0_10] : memref<9x3x3xf32, #tpu.memory_space<vmem>>, vector<1x3x3xf32>
    %10 = vector.shape_cast %9 : vector<1x3x3xf32> to vector<3x3xf32>
    %cst_11 = arith.constant dense<0.000000e+00> : vector<288x3xf32>
    %11 = tpu.matmul %8, %10, %cst_11 {dimension_numbers = #tpu.dot_dimension_numbers<[1], [0], [0], [1], [0, 0, 1, 1], [], []>} : vector<288x3xf32>, vector<3x3xf32>, vector<288x3xf32> -> vector<288x3xf32>
    %12 = arith.addf %6, %11 : vector<288x3xf32>
    %c0_12 = arith.constant 0 : index
    %c2 = arith.constant 2 : index
    %c0_13 = arith.constant 0 : index
    %13 = vector.load %arg1[%c0_12, %c2, %c0_13] : memref<1x342x3xf32, #tpu.memory_space<vmem>>, vector<1x288x3xf32>
    %14 = vector.shape_cast %13 : vector<1x288x3xf32> to vector<288x3xf32>
    %c2_14 = arith.constant 2 : index
    %c0_15 = arith.constant 0 : index
    %c0_16 = arith.constant 0 : index
    %15 = vector.load %arg2[%c2_14, %c0_15, %c0_16] : memref<9x3x3xf32, #tpu.memory_space<vmem>>, vector<1x3x3xf32>
    %16 = vector.shape_cast %15 : vector<1x3x3xf32> to vector<3x3xf32>
    %cst_17 = arith.constant dense<0.000000e+00> : vector<288x3xf32>
    %17 = tpu.matmul %14, %16, %cst_17 {dimension_numbers = #tpu.dot_dimension_numbers<[1], [0], [0], [1], [0, 0, 1, 1], [], []>} : vector<288x3xf32>, vector<3x3xf32>, vector<288x3xf32> -> vector<288x3xf32>
    %18 = arith.addf %12, %17 : vector<288x3xf32>
    %c0_18 = arith.constant 0 : index
    %c18 = arith.constant 18 : index
    %c0_19 = arith.constant 0 : index
    %19 = vector.load %arg1[%c0_18, %c18, %c0_19] : memref<1x342x3xf32, #tpu.memory_space<vmem>>, vector<1x288x3xf32>
    %20 = vector.shape_cast %19 : vector<1x288x3xf32> to vector<288x3xf32>
    %c3 = arith.constant 3 : index
    %c0_20 = arith.constant 0 : index
    %c0_21 = arith.constant 0 : index
    %21 = vector.load %arg2[%c3, %c0_20, %c0_21] : memref<9x3x3xf32, #tpu.memory_space<vmem>>, vector<1x3x3xf32>
    %22 = vector.shape_cast %21 : vector<1x3x3xf32> to vector<3x3xf32>
    %cst_22 = arith.constant dense<0.000000e+00> : vector<288x3xf32>
    %23 = tpu.matmul %20, %22, %cst_22 {dimension_numbers = #tpu.dot_dimension_numbers<[1], [0], [0], [1], [0, 0, 1, 1], [], []>} : vector<288x3xf32>, vector<3x3xf32>, vector<288x3xf32> -> vector<288x3xf32>
    %24 = arith.addf %18, %23 : vector<288x3xf32>
    %c0_23 = arith.constant 0 : index
    %c19 = arith.constant 19 : index
    %c0_24 = arith.constant 0 : index
    %25 = vector.load %arg1[%c0_23, %c19, %c0_24] : memref<1x342x3xf32, #tpu.memory_space<vmem>>, vector<1x288x3xf32>
    %26 = vector.shape_cast %25 : vector<1x288x3xf32> to vector<288x3xf32>
    %c4 = arith.constant 4 : index
    %c0_25 = arith.constant 0 : index
    %c0_26 = arith.constant 0 : index
    %27 = vector.load %arg2[%c4, %c0_25, %c0_26] : memref<9x3x3xf32, #tpu.memory_space<vmem>>, vector<1x3x3xf32>
    %28 = vector.shape_cast %27 : vector<1x3x3xf32> to vector<3x3xf32>
    %cst_27 = arith.constant dense<0.000000e+00> : vector<288x3xf32>
    %29 = tpu.matmul %26, %28, %cst_27 {dimension_numbers = #tpu.dot_dimension_numbers<[1], [0], [0], [1], [0, 0, 1, 1], [], []>} : vector<288x3xf32>, vector<3x3xf32>, vector<288x3xf32> -> vector<288x3xf32>
    %30 = arith.addf %24, %29 : vector<288x3xf32>
    %c0_28 = arith.constant 0 : index
    %c20 = arith.constant 20 : index
    %c0_29 = arith.constant 0 : index
    %31 = vector.load %arg1[%c0_28, %c20, %c0_29] : memref<1x342x3xf32, #tpu.memory_space<vmem>>, vector<1x288x3xf32>
    %32 = vector.shape_cast %31 : vector<1x288x3xf32> to vector<288x3xf32>
    %c5 = arith.constant 5 : index
    %c0_30 = arith.constant 0 : index
    %c0_31 = arith.constant 0 : index
    %33 = vector.load %arg2[%c5, %c0_30, %c0_31] : memref<9x3x3xf32, #tpu.memory_space<vmem>>, vector<1x3x3xf32>
    %34 = vector.shape_cast %33 : vector<1x3x3xf32> to vector<3x3xf32>
    %cst_32 = arith.constant dense<0.000000e+00> : vector<288x3xf32>
    %35 = tpu.matmul %32, %34, %cst_32 {dimension_numbers = #tpu.dot_dimension_numbers<[1], [0], [0], [1], [0, 0, 1, 1], [], []>} : vector<288x3xf32>, vector<3x3xf32>, vector<288x3xf32> -> vector<288x3xf32>
    %36 = arith.addf %30, %35 : vector<288x3xf32>
    %c0_33 = arith.constant 0 : index
    %c36 = arith.constant 36 : index
    %c0_34 = arith.constant 0 : index
    %37 = vector.load %arg1[%c0_33, %c36, %c0_34] : memref<1x342x3xf32, #tpu.memory_space<vmem>>, vector<1x288x3xf32>
    %38 = vector.shape_cast %37 : vector<1x288x3xf32> to vector<288x3xf32>
    %c6 = arith.constant 6 : index
    %c0_35 = arith.constant 0 : index
    %c0_36 = arith.constant 0 : index
    %39 = vector.load %arg2[%c6, %c0_35, %c0_36] : memref<9x3x3xf32, #tpu.memory_space<vmem>>, vector<1x3x3xf32>
    %40 = vector.shape_cast %39 : vector<1x3x3xf32> to vector<3x3xf32>
    %cst_37 = arith.constant dense<0.000000e+00> : vector<288x3xf32>
    %41 = tpu.matmul %38, %40, %cst_37 {dimension_numbers = #tpu.dot_dimension_numbers<[1], [0], [0], [1], [0, 0, 1, 1], [], []>} : vector<288x3xf32>, vector<3x3xf32>, vector<288x3xf32> -> vector<288x3xf32>
    %42 = arith.addf %36, %41 : vector<288x3xf32>
    %c0_38 = arith.constant 0 : index
    %c37 = arith.constant 37 : index
    %c0_39 = arith.constant 0 : index
    %43 = vector.load %arg1[%c0_38, %c37, %c0_39] : memref<1x342x3xf32, #tpu.memory_space<vmem>>, vector<1x288x3xf32>
    %44 = vector.shape_cast %43 : vector<1x288x3xf32> to vector<288x3xf32>
    %c7 = arith.constant 7 : index
    %c0_40 = arith.constant 0 : index
    %c0_41 = arith.constant 0 : index
    %45 = vector.load %arg2[%c7, %c0_40, %c0_41] : memref<9x3x3xf32, #tpu.memory_space<vmem>>, vector<1x3x3xf32>
    %46 = vector.shape_cast %45 : vector<1x3x3xf32> to vector<3x3xf32>
    %cst_42 = arith.constant dense<0.000000e+00> : vector<288x3xf32>
    %47 = tpu.matmul %44, %46, %cst_42 {dimension_numbers = #tpu.dot_dimension_numbers<[1], [0], [0], [1], [0, 0, 1, 1], [], []>} : vector<288x3xf32>, vector<3x3xf32>, vector<288x3xf32> -> vector<288x3xf32>
    %48 = arith.addf %42, %47 : vector<288x3xf32>
    %c0_43 = arith.constant 0 : index
    %c38 = arith.constant 38 : index
    %c0_44 = arith.constant 0 : index
    %49 = vector.load %arg1[%c0_43, %c38, %c0_44] : memref<1x342x3xf32, #tpu.memory_space<vmem>>, vector<1x288x3xf32>
    %50 = vector.shape_cast %49 : vector<1x288x3xf32> to vector<288x3xf32>
    %c8 = arith.constant 8 : index
    %c0_45 = arith.constant 0 : index
    %c0_46 = arith.constant 0 : index
    %51 = vector.load %arg2[%c8, %c0_45, %c0_46] : memref<9x3x3xf32, #tpu.memory_space<vmem>>, vector<1x3x3xf32>
    %52 = vector.shape_cast %51 : vector<1x3x3xf32> to vector<3x3xf32>
    %cst_47 = arith.constant dense<0.000000e+00> : vector<288x3xf32>
    %53 = tpu.matmul %50, %52, %cst_47 {dimension_numbers = #tpu.dot_dimension_numbers<[1], [0], [0], [1], [0, 0, 1, 1], [], []>} : vector<288x3xf32>, vector<3x3xf32>, vector<288x3xf32> -> vector<288x3xf32>
    %54 = arith.addf %48, %53 : vector<288x3xf32>
    %c0_48 = arith.constant 0 : index
    %c0_49 = arith.constant 0 : index
    %55 = vector.load %arg3[%c0_48, %c0_49] : memref<1x3xf32, #tpu.memory_space<vmem>>, vector<1x3xf32>
    %56 = vector.broadcast %55 : vector<1x3xf32> to vector<288x3xf32>
    %57 = arith.addf %54, %56 : vector<288x3xf32>
    %cst_50 = arith.constant 0.000000e+00 : f32
    %58 = vector.broadcast %cst_50 : f32 to vector<288x3xf32>
    %59 = arith.maximumf %57, %58 : vector<288x3xf32>
    %c0_51 = arith.constant 0 : index
    %c0_52 = arith.constant 0 : index
    %60 = vector.load %arg5[%c0_51, %c0_52] : memref<288x3xf32, #tpu.memory_space<vmem>>, vector<288x3xf32>
    tpu.vector_store %arg5[%c0_51, %c0_52], %59 {strides = array<i32>} : memref<288x3xf32, #tpu.memory_space<vmem>>, vector<288x3xf32>,
    %c0_53 = arith.constant 0 : index
    %c0_54 = arith.constant 0 : index
    %61 = vector.load %arg5[%c0_53, %c0_54] : memref<288x3xf32, #tpu.memory_space<vmem>>, vector<16x3xf32>
    %c0_55 = arith.constant 0 : index
    %c0_56 = arith.constant 0 : index
    %c0_57 = arith.constant 0 : index
    %c0_58 = arith.constant 0 : index
    %62 = vector.load %arg4[%c0_55, %c0_56, %c0_57, %c0_58] : memref<1x16x16x3xf32, #tpu.memory_space<vmem>>, vector<1x1x16x3xf32>
    %63 = vector.shape_cast %62 : vector<1x1x16x3xf32> to vector<16x3xf32>
    %64 = vector.shape_cast %61 : vector<16x3xf32> to vector<1x1x16x3xf32>
    tpu.vector_store %arg4[%c0_55, %c0_56, %c0_57, %c0_58], %64 {strides = array<i32>} : memref<1x16x16x3xf32, #tpu.memory_space<vmem>>, vector<1x1x16x3xf32>,
    %c18_59 = arith.constant 18 : index
    %c0_60 = arith.constant 0 : index
    %65 = vector.load %arg5[%c18_59, %c0_60] : memref<288x3xf32, #tpu.memory_space<vmem>>, vector<16x3xf32>
    %c0_61 = arith.constant 0 : index
    %c1_62 = arith.constant 1 : index
    %c0_63 = arith.constant 0 : index
    %c0_64 = arith.constant 0 : index
    %66 = vector.load %arg4[%c0_61, %c1_62, %c0_63, %c0_64] : memref<1x16x16x3xf32, #tpu.memory_space<vmem>>, vector<1x1x16x3xf32>
    %67 = vector.shape_cast %66 : vector<1x1x16x3xf32> to vector<16x3xf32>
    %68 = vector.shape_cast %65 : vector<16x3xf32> to vector<1x1x16x3xf32>
    tpu.vector_store %arg4[%c0_61, %c1_62, %c0_63, %c0_64], %68 {strides = array<i32>} : memref<1x16x16x3xf32, #tpu.memory_space<vmem>>, vector<1x1x16x3xf32>,
    %c36_65 = arith.constant 36 : index
    %c0_66 = arith.constant 0 : index
    %69 = vector.load %arg5[%c36_65, %c0_66] : memref<288x3xf32, #tpu.memory_space<vmem>>, vector<16x3xf32>
    %c0_67 = arith.constant 0 : index
    %c2_68 = arith.constant 2 : index
    %c0_69 = arith.constant 0 : index
    %c0_70 = arith.constant 0 : index
    %70 = vector.load %arg4[%c0_67, %c2_68, %c0_69, %c0_70] : memref<1x16x16x3xf32, #tpu.memory_space<vmem>>, vector<1x1x16x3xf32>
    %71 = vector.shape_cast %70 : vector<1x1x16x3xf32> to vector<16x3xf32>
    %72 = vector.shape_cast %69 : vector<16x3xf32> to vector<1x1x16x3xf32>
    tpu.vector_store %arg4[%c0_67, %c2_68, %c0_69, %c0_70], %72 {strides = array<i32>} : memref<1x16x16x3xf32, #tpu.memory_space<vmem>>, vector<1x1x16x3xf32>,
    %c54 = arith.constant 54 : index
    %c0_71 = arith.constant 0 : index
    %73 = vector.load %arg5[%c54, %c0_71] : memref<288x3xf32, #tpu.memory_space<vmem>>, vector<16x3xf32>
    %c0_72 = arith.constant 0 : index
    %c3_73 = arith.constant 3 : index
    %c0_74 = arith.constant 0 : index
    %c0_75 = arith.constant 0 : index
    %74 = vector.load %arg4[%c0_72, %c3_73, %c0_74, %c0_75] : memref<1x16x16x3xf32, #tpu.memory_space<vmem>>, vector<1x1x16x3xf32>
    %75 = vector.shape_cast %74 : vector<1x1x16x3xf32> to vector<16x3xf32>
    %76 = vector.shape_cast %73 : vector<16x3xf32> to vector<1x1x16x3xf32>
    tpu.vector_store %arg4[%c0_72, %c3_73, %c0_74, %c0_75], %76 {strides = array<i32>} : memref<1x16x16x3xf32, #tpu.memory_space<vmem>>, vector<1x1x16x3xf32>,
    %c72 = arith.constant 72 : index
    %c0_76 = arith.constant 0 : index
    %77 = vector.load %arg5[%c72, %c0_76] : memref<288x3xf32, #tpu.memory_space<vmem>>, vector<16x3xf32>
    %c0_77 = arith.constant 0 : index
    %c4_78 = arith.constant 4 : index
    %c0_79 = arith.constant 0 : index
    %c0_80 = arith.constant 0 : index
    %78 = vector.load %arg4[%c0_77, %c4_78, %c0_79, %c0_80] : memref<1x16x16x3xf32, #tpu.memory_space<vmem>>, vector<1x1x16x3xf32>
    %79 = vector.shape_cast %78 : vector<1x1x16x3xf32> to vector<16x3xf32>
    %80 = vector.shape_cast %77 : vector<16x3xf32> to vector<1x1x16x3xf32>
    tpu.vector_store %arg4[%c0_77, %c4_78, %c0_79, %c0_80], %80 {strides = array<i32>} : memref<1x16x16x3xf32, #tpu.memory_space<vmem>>, vector<1x1x16x3xf32>,
    %c90 = arith.constant 90 : index
    %c0_81 = arith.constant 0 : index
    %81 = vector.load %arg5[%c90, %c0_81] : memref<288x3xf32, #tpu.memory_space<vmem>>, vector<16x3xf32>
    %c0_82 = arith.constant 0 : index
    %c5_83 = arith.constant 5 : index
    %c0_84 = arith.constant 0 : index
    %c0_85 = arith.constant 0 : index
    %82 = vector.load %arg4[%c0_82, %c5_83, %c0_84, %c0_85] : memref<1x16x16x3xf32, #tpu.memory_space<vmem>>, vector<1x1x16x3xf32>
    %83 = vector.shape_cast %82 : vector<1x1x16x3xf32> to vector<16x3xf32>
    %84 = vector.shape_cast %81 : vector<16x3xf32> to vector<1x1x16x3xf32>
    tpu.vector_store %arg4[%c0_82, %c5_83, %c0_84, %c0_85], %84 {strides = array<i32>} : memref<1x16x16x3xf32, #tpu.memory_space<vmem>>, vector<1x1x16x3xf32>,
    %c108 = arith.constant 108 : index
    %c0_86 = arith.constant 0 : index
    %85 = vector.load %arg5[%c108, %c0_86] : memref<288x3xf32, #tpu.memory_space<vmem>>, vector<16x3xf32>
    %c0_87 = arith.constant 0 : index
    %c6_88 = arith.constant 6 : index
    %c0_89 = arith.constant 0 : index
    %c0_90 = arith.constant 0 : index
    %86 = vector.load %arg4[%c0_87, %c6_88, %c0_89, %c0_90] : memref<1x16x16x3xf32, #tpu.memory_space<vmem>>, vector<1x1x16x3xf32>
    %87 = vector.shape_cast %86 : vector<1x1x16x3xf32> to vector<16x3xf32>
    %88 = vector.shape_cast %85 : vector<16x3xf32> to vector<1x1x16x3xf32>
    tpu.vector_store %arg4[%c0_87, %c6_88, %c0_89, %c0_90], %88 {strides = array<i32>} : memref<1x16x16x3xf32, #tpu.memory_space<vmem>>, vector<1x1x16x3xf32>,
    %c126 = arith.constant 126 : index
    %c0_91 = arith.constant 0 : index
    %89 = vector.load %arg5[%c126, %c0_91] : memref<288x3xf32, #tpu.memory_space<vmem>>, vector<16x3xf32>
    %c0_92 = arith.constant 0 : index
    %c7_93 = arith.constant 7 : index
    %c0_94 = arith.constant 0 : index
    %c0_95 = arith.constant 0 : index
    %90 = vector.load %arg4[%c0_92, %c7_93, %c0_94, %c0_95] : memref<1x16x16x3xf32, #tpu.memory_space<vmem>>, vector<1x1x16x3xf32>
    %91 = vector.shape_cast %90 : vector<1x1x16x3xf32> to vector<16x3xf32>
    %92 = vector.shape_cast %89 : vector<16x3xf32> to vector<1x1x16x3xf32>
    tpu.vector_store %arg4[%c0_92, %c7_93, %c0_94, %c0_95], %92 {strides = array<i32>} : memref<1x16x16x3xf32, #tpu.memory_space<vmem>>, vector<1x1x16x3xf32>,
    %c144 = arith.constant 144 : index
    %c0_96 = arith.constant 0 : index
    %93 = vector.load %arg5[%c144, %c0_96] : memref<288x3xf32, #tpu.memory_space<vmem>>, vector<16x3xf32>
    %c0_97 = arith.constant 0 : index
    %c8_98 = arith.constant 8 : index
    %c0_99 = arith.constant 0 : index
    %c0_100 = arith.constant 0 : index
    %94 = vector.load %arg4[%c0_97, %c8_98, %c0_99, %c0_100] : memref<1x16x16x3xf32, #tpu.memory_space<vmem>>, vector<1x1x16x3xf32>
    %95 = vector.shape_cast %94 : vector<1x1x16x3xf32> to vector<16x3xf32>
    %96 = vector.shape_cast %93 : vector<16x3xf32> to vector<1x1x16x3xf32>
    tpu.vector_store %arg4[%c0_97, %c8_98, %c0_99, %c0_100], %96 {strides = array<i32>} : memref<1x16x16x3xf32, #tpu.memory_space<vmem>>, vector<1x1x16x3xf32>,
    %c162 = arith.constant 162 : index
    %c0_101 = arith.constant 0 : index
    %97 = vector.load %arg5[%c162, %c0_101] : memref<288x3xf32, #tpu.memory_space<vmem>>, vector<16x3xf32>
    %c0_102 = arith.constant 0 : index
    %c9 = arith.constant 9 : index
    %c0_103 = arith.constant 0 : index
    %c0_104 = arith.constant 0 : index
    %98 = vector.load %arg4[%c0_102, %c9, %c0_103, %c0_104] : memref<1x16x16x3xf32, #tpu.memory_space<vmem>>, vector<1x1x16x3xf32>
    %99 = vector.shape_cast %98 : vector<1x1x16x3xf32> to vector<16x3xf32>
    %100 = vector.shape_cast %97 : vector<16x3xf32> to vector<1x1x16x3xf32>
    tpu.vector_store %arg4[%c0_102, %c9, %c0_103, %c0_104], %100 {strides = array<i32>} : memref<1x16x16x3xf32, #tpu.memory_space<vmem>>, vector<1x1x16x3xf32>,
    %c180 = arith.constant 180 : index
    %c0_105 = arith.constant 0 : index
    %101 = vector.load %arg5[%c180, %c0_105] : memref<288x3xf32, #tpu.memory_space<vmem>>, vector<16x3xf32>
    %c0_106 = arith.constant 0 : index
    %c10 = arith.constant 10 : index
    %c0_107 = arith.constant 0 : index
    %c0_108 = arith.constant 0 : index
    %102 = vector.load %arg4[%c0_106, %c10, %c0_107, %c0_108] : memref<1x16x16x3xf32, #tpu.memory_space<vmem>>, vector<1x1x16x3xf32>
    %103 = vector.shape_cast %102 : vector<1x1x16x3xf32> to vector<16x3xf32>
    %104 = vector.shape_cast %101 : vector<16x3xf32> to vector<1x1x16x3xf32>
    tpu.vector_store %arg4[%c0_106, %c10, %c0_107, %c0_108], %104 {strides = array<i32>} : memref<1x16x16x3xf32, #tpu.memory_space<vmem>>, vector<1x1x16x3xf32>,
    %c198 = arith.constant 198 : index
    %c0_109 = arith.constant 0 : index
    %105 = vector.load %arg5[%c198, %c0_109] : memref<288x3xf32, #tpu.memory_space<vmem>>, vector<16x3xf32>
    %c0_110 = arith.constant 0 : index
    %c11 = arith.constant 11 : index
    %c0_111 = arith.constant 0 : index
    %c0_112 = arith.constant 0 : index
    %106 = vector.load %arg4[%c0_110, %c11, %c0_111, %c0_112] : memref<1x16x16x3xf32, #tpu.memory_space<vmem>>, vector<1x1x16x3xf32>
    %107 = vector.shape_cast %106 : vector<1x1x16x3xf32> to vector<16x3xf32>
    %108 = vector.shape_cast %105 : vector<16x3xf32> to vector<1x1x16x3xf32>
    tpu.vector_store %arg4[%c0_110, %c11, %c0_111, %c0_112], %108 {strides = array<i32>} : memref<1x16x16x3xf32, #tpu.memory_space<vmem>>, vector<1x1x16x3xf32>,
    %c216 = arith.constant 216 : index
    %c0_113 = arith.constant 0 : index
    %109 = vector.load %arg5[%c216, %c0_113] : memref<288x3xf32, #tpu.memory_space<vmem>>, vector<16x3xf32>
    %c0_114 = arith.constant 0 : index
    %c12 = arith.constant 12 : index
    %c0_115 = arith.constant 0 : index
    %c0_116 = arith.constant 0 : index
    %110 = vector.load %arg4[%c0_114, %c12, %c0_115, %c0_116] : memref<1x16x16x3xf32, #tpu.memory_space<vmem>>, vector<1x1x16x3xf32>
    %111 = vector.shape_cast %110 : vector<1x1x16x3xf32> to vector<16x3xf32>
    %112 = vector.shape_cast %109 : vector<16x3xf32> to vector<1x1x16x3xf32>
    tpu.vector_store %arg4[%c0_114, %c12, %c0_115, %c0_116], %112 {strides = array<i32>} : memref<1x16x16x3xf32, #tpu.memory_space<vmem>>, vector<1x1x16x3xf32>,
    %c234 = arith.constant 234 : index
    %c0_117 = arith.constant 0 : index
    %113 = vector.load %arg5[%c234, %c0_117] : memref<288x3xf32, #tpu.memory_space<vmem>>, vector<16x3xf32>
    %c0_118 = arith.constant 0 : index
    %c13 = arith.constant 13 : index
    %c0_119 = arith.constant 0 : index
    %c0_120 = arith.constant 0 : index
    %114 = vector.load %arg4[%c0_118, %c13, %c0_119, %c0_120] : memref<1x16x16x3xf32, #tpu.memory_space<vmem>>, vector<1x1x16x3xf32>
    %115 = vector.shape_cast %114 : vector<1x1x16x3xf32> to vector<16x3xf32>
    %116 = vector.shape_cast %113 : vector<16x3xf32> to vector<1x1x16x3xf32>
    tpu.vector_store %arg4[%c0_118, %c13, %c0_119, %c0_120], %116 {strides = array<i32>} : memref<1x16x16x3xf32, #tpu.memory_space<vmem>>, vector<1x1x16x3xf32>,
    %c252 = arith.constant 252 : index
    %c0_121 = arith.constant 0 : index
    %117 = vector.load %arg5[%c252, %c0_121] : memref<288x3xf32, #tpu.memory_space<vmem>>, vector<16x3xf32>
    %c0_122 = arith.constant 0 : index
    %c14 = arith.constant 14 : index
    %c0_123 = arith.constant 0 : index
    %c0_124 = arith.constant 0 : index
    %118 = vector.load %arg4[%c0_122, %c14, %c0_123, %c0_124] : memref<1x16x16x3xf32, #tpu.memory_space<vmem>>, vector<1x1x16x3xf32>
    %119 = vector.shape_cast %118 : vector<1x1x16x3xf32> to vector<16x3xf32>
    %120 = vector.shape_cast %117 : vector<16x3xf32> to vector<1x1x16x3xf32>
    tpu.vector_store %arg4[%c0_122, %c14, %c0_123, %c0_124], %120 {strides = array<i32>} : memref<1x16x16x3xf32, #tpu.memory_space<vmem>>, vector<1x1x16x3xf32>,
    %c270 = arith.constant 270 : index
    %c0_125 = arith.constant 0 : index
    %121 = vector.load %arg5[%c270, %c0_125] : memref<288x3xf32, #tpu.memory_space<vmem>>, vector<16x3xf32>
    %c0_126 = arith.constant 0 : index
    %c15 = arith.constant 15 : index
    %c0_127 = arith.constant 0 : index
    %c0_128 = arith.constant 0 : index
    %122 = vector.load %arg4[%c0_126, %c15, %c0_127, %c0_128] : memref<1x16x16x3xf32, #tpu.memory_space<vmem>>, vector<1x1x16x3xf32>
    %123 = vector.shape_cast %122 : vector<1x1x16x3xf32> to vector<16x3xf32>
    %124 = vector.shape_cast %121 : vector<16x3xf32> to vector<1x1x16x3xf32>
    tpu.vector_store %arg4[%c0_126, %c15, %c0_127, %c0_128], %124 {strides = array<i32>} : memref<1x16x16x3xf32, #tpu.memory_space<vmem>>, vector<1x1x16x3xf32>,
    return
  }
  func.func @transform_0(%arg0: i32) -> (i32, i32, i32) {
    %c0_i32 = arith.constant 0 : i32
    %c0_i32_0 = arith.constant 0 : i32
    %c0_i32_1 = arith.constant 0 : i32
    return %arg0, %c0_i32, %c0_i32_0 : i32, i32, i32
  }
  func.func @transform_1(%arg0: i32) -> (i32, i32, i32) {
    %c0_i32 = arith.constant 0 : i32
    %c0_i32_0 = arith.constant 0 : i32
    %c0_i32_1 = arith.constant 0 : i32
    %c0_i32_2 = arith.constant 0 : i32
    return %c0_i32, %c0_i32_0, %c0_i32_1 : i32, i32, i32
  }
  func.func @transform_2(%arg0: i32) -> (i32, i32) {
    %c0_i32 = arith.constant 0 : i32
    %c0_i32_0 = arith.constant 0 : i32
    %c0_i32_1 = arith.constant 0 : i32
    return %c0_i32, %c0_i32_0 : i32, i32
  }
  func.func @transform_3(%arg0: i32) -> (i32, i32, i32, i32) {
    %c0_i32 = arith.constant 0 : i32
    %c0_i32_0 = arith.constant 0 : i32
    %c0_i32_1 = arith.constant 0 : i32
    %c0_i32_2 = arith.constant 0 : i32
    return %arg0, %c0_i32, %c0_i32_0, %c0_i32_1 : i32, i32, i32, i32
  }
}

</mosaic_0001>

<bundles_post_ra>
// kernel: tpu_custom_call.1
= control target key start
LH: loop header
LB: loop body
LE: loop exit
PB: predicated region body
PF: predicated region fallthrough
CT: control target
= control target key end

     0   :  { %7 = vsyncpa [#allocation3], 0  ;;  %s310_s0 = inlined_call_operand.hbm [shape: f32[16,12], index: 0, kind: input, shape index: {}]   ;;  %s311_s1 = inlined_call_operand.hbm [shape: f32[16,12], index: 1, kind: input, shape index: {}]   ;;  %s312_s2 = inlined_call_operand.vmem [shape: f32[16,8], index: 2, kind: output, shape index: {}]  }
   0x1   :  { %s13_s11 = sshll.u32 %s310_s0, 4  ;;  %s14_s11 = int_to_ptr.hbm [resolvable:$true] %s13_s11 }
   0x2   :  { %8 = vsyncpa [#allocation5], 0  ;;  %s248_s12 = smov [#allocation2]   ;;  %s26_s16 = sshll.u32 %s311_s1, 4  ;;  %s27_s16 = int_to_ptr.hbm [resolvable:$true] %s26_s16 }
   0x3   :  { %s15_s13 = sshll.u32 %s248_s12, 4  ;;  %s249_s17 = smov 128   ;;  %s16_s13 = int_to_ptr.vmem [resolvable:$true] %s15_s13 }
   0x4   :  { %s250_s18 = smov 8   ;;  %s251_s19 = smov [#allocation4]  }
   0x5   :  { %21 = dma.hbm_to_vmem [thread:$0]  %s14_s11, 256, %s16_s13, [#allocation3], %s249_s17, %s249_s17, %s250_s18  }
   0x6   :  { %s28_s20 = sshll.u32 %s251_s19, 4  ;;  %s29_s20 = int_to_ptr.vmem [resolvable:$true] %s28_s20 }
   0x7   :  { %34 = dma.hbm_to_vmem [thread:$0]  %s27_s16, 256, %s29_s20, [#allocation5], %s249_s17, %s249_s17, %s250_s18  }
   0x8   :  { %244 = dma.done.wait [#allocation3], 256  }
   0x9   :  { %245 = vsyncadd [#allocation3], 4294967040 }
   0xa   :  { %246 = dma.done.wait [#allocation5], 256  }
   0xb   :  { %247 = vsyncadd [#allocation5], 4294967040  ;;  %v45_v0 = vld [vmem:[#allocation4] sm:$0xff]  ;;  %v282_v1 = vld [vmem:[#allocation2] sm:$0xff]  ;;  %s252_s0 = smov 12   ;;  %s253_s21 = smov 24  }
   0xc   :  { %49 = vrot.lane.b32.xlu0 %v45_v0, %s252_s0  ;;  %57 = vrot.lane.b32.xlu1 %v282_v1, %s253_s21  ;;  %s254_s1 = smov 36   ;;  %v46_v2 = vld [vmem:[#allocation4 + $0x8] sm:$0xff]  ;;  %v285_v3 = vld [vmem:[#allocation2 + $0x8] sm:$0xff]  ;;  %s255_s22 = smov 48   ;;  %vm130_vm0 = vcmask 1043456   ;;  %v260_v4 = vmov 0.5  }
   0xd   :  { %63 = vrot.lane.b32.xlu2 %v45_v0, %s254_s1  ;;  %s256_s23 = smov 60   ;;  %s257_s24 = smov 72   ;;  %166 = vmatpush.msk.msra.mxu0 %vm130_vm0, %v260_v4  ;;  %vm99_vm1 = vcmask 97280   ;;  %vm102_vm2 = vcmask 195584   ;;  %vm105_vm3 = vcmask 293888   ;;  %vm108_vm4 = vcmask 392192  }
   0xe   :  { %s258_s25 = smov 84   ;;  %s259_s26 = smov 96   ;;  %169 = vmatpush.msk.msra.mxu1 %vm130_vm0, %v260_v4  ;;  %vm111_vm5 = vcmask 490496   ;;  %vm114_vm6 = vcmask 588800   ;;  %vm117_vm7 = vcmask 687104   ;;  %vm120_vm8 = vcmask 785408  }
   0xf   :  { %137 = vmatpush.msra.mxu0 %v260_v4  ;;  %vm123_vm9 = vcmask 883712   ;;  %vm157_vm10 = vcmask 64512  }
  0x10   :  { %170 = vmatpush.msra.mxu1 %v260_v4 }
  0x11   :  { %138 = vmatpush.msra.mxu0 %v260_v4 }
  0x12   :  { %171 = vmatpush.msra.mxu1 %v260_v4 }
  0x13   :  { %139 = vmatpush.msra.mxu0 %v260_v4 }
  0x14   :  { %51 = vrot.lane.b32.xlu0 %v46_v2, %s252_s0  ;;  %59 = vrot.lane.b32.xlu1 %v285_v3, %s253_s21 }
  0x15   :  { %65 = vrot.lane.b32.xlu2 %v46_v2, %s254_s1  ;;  %172 = vmatpush.msra.mxu1 %v260_v4 }
  0x16   :  { %140 = vmatpush.msra.mxu0 %v260_v4 }
  0x17   :  { %173 = vmatpush.msra.mxu1 %v260_v4 }
  0x18   :  { %141 = vmatpush.msra.mxu0 %v260_v4 }
  0x19   :  { %174 = vmatpush.msra.mxu1 %v260_v4 }
  0x1a   :  { %142 = vmatpush.msra.mxu0 %v260_v4 }
  0x1b   :  { %175 = vmatpush.msra.mxu1 %v260_v4 }
  0x1c   :  { %69 = vrot.lane.b32.xlu0 %v282_v1, %s255_s22  ;;  %71 = vrot.lane.b32.xlu1 %v285_v3, %s255_s22 }
  0x1d   :  { %75 = vrot.lane.b32.xlu2 %v45_v0, %s256_s23  ;;  %143 = vmatpush.msra.mxu0 %v260_v4 }
  0x1e   :  { %176 = vmatpush.msra.mxu1 %v260_v4 }
  0x1f   :  { %144 = vmatpush.msra.mxu0 %v260_v4 }
  0x20   :  { %177 = vmatpush.msra.mxu1 %v260_v4 }
  0x21   :  { %145 = vmatpush.msra.mxu0 %v260_v4 }
  0x22   :  { %178 = vmatpush.msra.mxu1 %v260_v4 }
  0x23   :  { %146 = vmatpush.msra.mxu0 %v260_v4 }
  0x24   :  { %77 = vrot.lane.b32.xlu0 %v46_v2, %s256_s23  ;;  %81 = vrot.lane.b32.xlu1 %v282_v1, %s257_s24 }
  0x25   :  { %83 = vrot.lane.b32.xlu2 %v285_v3, %s257_s24  ;;  %179 = vmatpush.msra.mxu1 %v260_v4 }
  0x26   :  { %147 = vmatpush.msra.mxu0 %v260_v4 }
  0x27   :  { %180 = vmatpush.msra.mxu1 %v260_v4 }
  0x28   :  { %148 = vmatpush.msra.mxu0 %v260_v4 }
  0x29   :  { %181 = vmatpush.msra.mxu1 %v260_v4 }
  0x2a   :  { %149 = vmatpush.msra.mxu0 %v260_v4 }
  0x2b   :  { %182 = vmatpush.msra.mxu1 %v260_v4 }
  0x2c   :  { %87 = vrot.lane.b32.xlu0 %v45_v0, %s258_s25  ;;  %89 = vrot.lane.b32.xlu1 %v46_v2, %s258_s25 }
  0x2d   :  { %93 = vrot.lane.b32.xlu2 %v282_v1, %s259_s26 }
  0x34   :  { %95 = vrot.lane.b32.xlu0 %v285_v3, %s259_s26 }
  0x67   :  { %v64_v5 = vpop.permute.xlu2 %63 }
  0x6f   :  { %v66_v8 = vpop.permute.xlu2 %65 }
  0x77   :  { %v76_v11 = vpop.permute.xlu2 %75 }
  0x7e   :  { %v50_v6 = vpop.permute.xlu0 %49  ;;  %v58_v7 = vpop.permute.xlu1 %57 }
  0x7f   :  { %v100_v14 = vsel %vm99_vm1, %v282_v1, %v50_v6  ;;  %v84_v15 = vpop.permute.xlu2 %83 }
  0x80   :  { %v103_v16 = vsel %vm102_vm2, %v100_v14, %v58_v7 }
  0x81   :  { %v106_v18 = vsel %vm105_vm3, %v103_v16, %v64_v5 }
  0x86   :  { %v52_v9 = vpop.permute.xlu0 %51  ;;  %v60_v10 = vpop.permute.xlu1 %59 }
  0x87   :  { %v101_v20 = vsel %vm99_vm1, %v285_v3, %v52_v9  ;;  %v94_v24 = vpop.permute.xlu2 %93 }
  0x88   :  { %v104_v22 = vsel %vm102_vm2, %v101_v20, %v60_v10 }
  0x89   :  { %v107_v28 = vsel %vm105_vm3, %v104_v22, %v66_v8 }
  0x8e   :  { %v70_v12 = vpop.permute.xlu0 %69  ;;  %v72_v13 = vpop.permute.xlu1 %71 }
  0x8f   :  { %v109_v21 = vsel %vm108_vm4, %v106_v18, %v70_v12  ;;  %v110_v30 = vsel %vm108_vm4, %v107_v28, %v72_v13 }
  0x90   :  { %v112_v23 = vsel %vm111_vm5, %v109_v21, %v76_v11 }
  0x96   :  { %v78_v17 = vpop.permute.xlu0 %77  ;;  %v82_v19 = vpop.permute.xlu1 %81 }
  0x97   :  { %v115_v25 = vsel %vm114_vm6, %v112_v23, %v82_v19  ;;  %v113_v31 = vsel %vm111_vm5, %v110_v30, %v78_v17 }
  0x98   :  { %v116_v33 = vsel %vm114_vm6, %v113_v31, %v84_v15 }
  0x9e   :  { %v88_v26 = vpop.permute.xlu0 %87  ;;  %v90_v32 = vpop.permute.xlu1 %89 }
  0x9f   :  { %v118_v27 = vsel %vm117_vm7, %v115_v25, %v88_v26  ;;  %v119_v34 = vsel %vm117_vm7, %v116_v33, %v90_v32 }
  0xa0   :  { %v121_v29 = vsel %vm120_vm8, %v118_v27, %v94_v24 }
  0xa1   :  { %167 = vmatmul.msk.f32.vlgmr.msra.gmra.mxu0 %vm123_vm9, %v121_v29 }
  0xa6   :  { %v96_v35 = vpop.permute.xlu0 %95 }
  0xa7   :  { %v122_v36 = vsel %vm120_vm8, %v119_v34, %v96_v35 }
  0xa8   :  { %168 = vmatmul.msk.f32.vlgmr.msra.gmra.mxu1 %vm123_vm9, %v122_v36 }
 0x11e   :  { %v151_v37 = vpop.f32.mrf.mxu0 }
 0x11f   :  { %158 = vst.msk [vmem:[%s312_s2] sm:$0xff] %vm157_vm10, %v151_v37 }
 0x125   :  { %v154_v38 = vpop.f32.mrf.mxu1 }
 0x126   :  { %159 = vst.msk [vmem:[%s312_s2 + $0x8] sm:$0xff] %vm157_vm10, %v154_v38 }
 0x127   :  { %164 = vsyncpa [#allocation3], 1 }
 0x128   :  { %165 = vsyncpa [#allocation5], 1 }

// kernel: tpu_custom_call.1
= control target key start
LH: loop header
LB: loop body
LE: loop exit
PB: predicated region body
PF: predicated region fallthrough
CT: control target
= control target key end

     0   :  { %vm28_vm0 = vcmask 97280   ;;  %s131_s0 = inlined_call_operand.vmem [shape: f32[4,16,12], index: 0, kind: input, shape index: {}]   ;;  %s132_s1 = inlined_call_operand.hbm [shape: f32[4,8,12], index: 1, kind: output, shape index: {}]  }
   0x1   :  { %v9_v0 = vld [vmem:[%s131_s0] ss:$2 sm:$0xff]  ;;  %v54_v1 = vld [vmem:[%s131_s0 + $0x1] ss:$2 sm:$0xff]  ;;  %v51_v3 = vld [vmem:[%s131_s0 + $0x10] ss:$2 sm:$0xff] }
   0x2   :  { %v24_v2 = vmax.f32 %v9_v0, %v54_v1  ;;  %v55_v4 = vld [vmem:[%s131_s0 + $0x11] ss:$2 sm:$0xff]  ;;  %v52_v5 = vld [vmem:[%s131_s0 + $0x20] ss:$2 sm:$0xff]  ;;  %v56_v7 = vld [vmem:[%s131_s0 + $0x21] ss:$2 sm:$0xff] }
   0x3   :  { %v25_v6 = vmax.f32 %v51_v3, %v55_v4  ;;  %v53_v8 = vld [vmem:[%s131_s0 + $0x30] ss:$2 sm:$0xff]  ;;  %v57_v9 = vld [vmem:[%s131_s0 + $0x31] ss:$2 sm:$0xff]  ;;  %v26_v10 = vmax.f32 %v52_v5, %v56_v7 }
   0x4   :  { %29 = vst.msk [vmem:[#allocation2] sm:$0xff] %vm28_vm0, %v24_v2  ;;  %v27_v11 = vmax.f32 %v53_v8, %v57_v9 }
   0x5   :  { %6 = vsyncpa [#allocation3], 0  ;;  %s87_s22 = smov [#allocation2]   ;;  %s39_s26 = sshll.u32 %s132_s1, 4  ;;  %30 = vst.msk [vmem:[#allocation2 + $0x8] sm:$0xff] %vm28_vm0, %v25_v6  ;;  %s40_s26 = int_to_ptr.hbm [resolvable:$true] %s39_s26 }
   0x6   :  { %s37_s23 = sshll.u32 %s87_s22, 4  ;;  %31 = vst.msk [vmem:[#allocation2 + $0x10] sm:$0xff] %vm28_vm0, %v26_v10  ;;  %s88_s0 = smov 128   ;;  %s38_s23 = int_to_ptr.vmem [resolvable:$true] %s37_s23 }
   0x7   :  { %32 = vst.msk [vmem:[#allocation2 + $0x18] sm:$0xff] %vm28_vm0, %v27_v11  ;;  %s89_s27 = smov 8  }
   0x8   :  { %45 = dma.vmem_to_hbm [thread:$0]  %s38_s23, 512, %s40_s26, [#allocation3], %s88_s0, %s88_s0, %s89_s27  }
   0x9   :  { %85 = dma.done.wait [#allocation3], 512  }
   0xa   :  { %86 = vsyncadd [#allocation3], 4294966784 }
   0xb   :  { %50 = vsyncpa [#allocation3], 1 }

// kernel: tpu_custom_call.1
= control target key start
LH: loop header
LB: loop body
LE: loop exit
PB: predicated region body
PF: predicated region fallthrough
CT: control target
= control target key end

     0   :  { %s3560_s12 = smov 0   ;;  %s4558_s0 = inlined_call_operand.vmem [shape: f32[2,342,3], index: 0, kind: input, shape index: {}]   ;;  %s4559_s1 = inlined_call_operand.vmem [shape: f32[9,3,3], index: 1, kind: input, shape index: {}]   ;;  %s4560_s2 = inlined_call_operand.vmem [shape: f32[1,3], index: 2, kind: input, shape index: {}]   ;;  %s4561_s3 = inlined_call_operand.vmem [shape: f32[2,16,16,3], index: 3, kind: output, shape index: {}]  }
   0x1 LB: > { %s3136_s13 = sadd.s32 4294967295, %s3538_s12   ;;  %p3140_p0 = scmp.ge.s32.totalorder %s3538_s12, 1  ;;  %s3538_s12 = sphi %s3560_s12, %s13_s12  }
   0x2   : > { %p137_p1 = scmp.lt.s32.totalorder %s3538_s12, 3 }
   0x4   : > { %p138_p2 = pnand %p3140_p0, %p137_p1 }
   0x5   : > { %p161_p3 = scmp.lt.s32.totalorder (!%p138_p2), %s3136_s13, 1 }
   0x6   : > { %141 = sbr.rel (%p138_p2) target bundleno = 809 (0x329), region = 32 }
   0xb   : > { %v3144_v0 = vld [vmem:[%s4559_s1 + $0x4] sm:$0x7]  ;;  %vm355_vm0 = vcmask 1042432   ;;  %v3219_v1 = vld [vmem:[%s4559_s1 + $0x8] sm:$0x7]  ;;  %s4563_s13 = smov (!%p161_p3, %s3136_s13), 1 }
   0xc   : > { %3518 = vmatpush.msk.msra.mxu1 %vm355_vm0, %v3144_v0  ;;  %3519 = vmatpush.msk.msra.mxu2 %vm355_vm0, %v3144_v0  ;;  %v3257_v2 = vld [vmem:[%s4559_s1 + $0xc] sm:$0x7]  ;;  %v207_v3 = vld [vmem:[%s4559_s1] sm:$0x7]  ;;  %v3295_v4 = vld [vmem:[%s4559_s1 + $0x10] sm:$0x7] }
   0xd   : > { %3520 = vmatpush.msk.msra.mxu3 %vm355_vm0, %v3144_v0  ;;  %s3521_s24 = smul.u32 344, %s4563_s13  ;;  %3145 = vmatpush.msk.msra.mxu0 %vm355_vm0, %v3144_v0  ;;  %vm246_vm1 = vcmask 23552   ;;  %v3371_v29 = vld [vmem:[%s4559_s1 + $0x18] sm:$0x7]  ;;  %v3409_v30 = vld [vmem:[%s4559_s1 + $0x1c] sm:$0x7] }
   0xe   : > { %3220 = vmatpush.msk.msrb.mxu2 %vm355_vm0, %v3219_v1  ;;  %3182 = vmatpush.msk.msrb.mxu1 %vm355_vm0, %v207_v3  ;;  %v3333_v31 = vld [vmem:[%s4559_s1 + $0x14] sm:$0x7]  ;;  %v3447_v36 = vld [vmem:[%s4559_s1 + $0x20] sm:$0x7]  ;;  %s3517_s11 = sshll.u32 %s4563_s13, 8 }
   0xf   : > { %3258 = vmatpush.msk.msrb.mxu3 %vm355_vm0, %v3257_v2  ;;  %3296 = vmatpush.msk.msrb.mxu0 %vm355_vm0, %v3295_v4  ;;  %s3597_s27 = scalar_lea.vmem %s4558_s0, %s3521_s24  ;;  %s4271_s16 = scalar_lea.vmem %s4561_s3, %s3517_s11 }
  0x10   : > { %v217_v5 = vld [vmem:[%s3597_s27 + $0x49] sm:$0xff]  ;;  %v226_v6 = vld [vmem:[%s3597_s27 + $0x91] sm:$0xff]  ;;  %v235_v7 = vld [vmem:[%s3597_s27 + $0xd9] sm:$0xff] }
  0x11   : > { %3155 = vmatmul.msk.f32.vlgmr.msra.gmra.mxu1 %vm246_vm1, %v217_v5  ;;  %3164 = vmatmul.msk.f32.vlgmr.msra.gmra.mxu2 %vm246_vm1, %v226_v6  ;;  %v208_v8 = vld [vmem:[%s3597_s27 + $0x1] sm:$0xff]  ;;  %v218_v9 = vld [vmem:[%s3597_s27 + $0x51] sm:$0xff]  ;;  %v227_v10 = vld [vmem:[%s3597_s27 + $0x99] sm:$0xff] }
  0x12   : > { %3173 = vmatmul.msk.f32.vlgmr.msra.gmra.mxu3 %vm246_vm1, %v235_v7  ;;  %3146 = vmatmul.msk.f32.vlgmr.msra.gmra.mxu0 %vm246_vm1, %v208_v8  ;;  %v236_v11 = vld [vmem:[%s3597_s27 + $0xe1] sm:$0xff]  ;;  %v209_v12 = vld [vmem:[%s3597_s27 + $0x9] sm:$0xff]  ;;  %v219_v13 = vld [vmem:[%s3597_s27 + $0x59] sm:$0xff] }
  0x13   : > { %v228_v14 = vld [vmem:[%s3597_s27 + $0xa1] sm:$0xff]  ;;  %v237_v15 = vld [vmem:[%s3597_s27 + $0xe9] sm:$0xff]  ;;  %v210_v16 = vld [vmem:[%s3597_s27 + $0x11] sm:$0xff]  ;;  %3372 = vmatpush.msk.msra.mxu2 %vm355_vm0, %v3371_v29  ;;  %3410 = vmatpush.msk.msra.mxu3 %vm355_vm0, %v3409_v30 }
  0x14   : > { %v220_v17 = vld [vmem:[%s3597_s27 + $0x61] sm:$0xff]  ;;  %v229_v18 = vld [vmem:[%s3597_s27 + $0xa9] sm:$0xff]  ;;  %v238_v19 = vld [vmem:[%s3597_s27 + $0xf1] sm:$0xff]  ;;  %3334 = vmatpush.msk.msra.mxu1 %vm355_vm0, %v3333_v31  ;;  %3448 = vmatpush.msk.msra.mxu0 %vm355_vm0, %v3447_v36 }
  0x15   : > { %v211_v20 = vld [vmem:[%s3597_s27 + $0x19] sm:$0xff]  ;;  %v221_v21 = vld [vmem:[%s3597_s27 + $0x69] sm:$0xff]  ;;  %v230_v22 = vld [vmem:[%s3597_s27 + $0xb1] sm:$0xff] }
  0x16   : > { %v239_v23 = vld [vmem:[%s3597_s27 + $0xf9] sm:$0xff]  ;;  %v212_v24 = vld [vmem:[%s3597_s27 + $0x21] sm:$0xff]  ;;  %v222_v25 = vld [vmem:[%s3597_s27 + $0x71] sm:$0xff] }
  0x17   : > { %v231_v26 = vld [vmem:[%s3597_s27 + $0xb9] sm:$0xff]  ;;  %v240_v27 = vld [vmem:[%s3597_s27 + $0x101] sm:$0xff]  ;;  %v213_v28 = vld [vmem:[%s3597_s27 + $0x29] sm:$0xff] }
  0x18   : > { %v223_v32 = vld [vmem:[%s3597_s27 + $0x79] sm:$0xff]  ;;  %v232_v33 = vld [vmem:[%s3597_s27 + $0xc1] sm:$0xff]  ;;  %v241_v34 = vld [vmem:[%s3597_s27 + $0x109] sm:$0xff] }
  0x19   : > { %3156 = vmatmul.msk.f32.gmra.mxu1 %vm246_vm1, %v218_v9  ;;  %3165 = vmatmul.msk.f32.gmra.mxu2 %vm246_vm1, %v227_v10  ;;  %v214_v35 = vld [vmem:[%s3597_s27 + $0x31] sm:$0xff]  ;;  %v224_v37 = vld [vmem:[%s3597_s27 + $0x81] sm:$0xff]  ;;  %v233_v38 = vld [vmem:[%s3597_s27 + $0xc9] sm:$0xff] }
  0x1a   : > { %3174 = vmatmul.msk.f32.gmra.mxu3 %vm246_vm1, %v236_v11  ;;  %3147 = vmatmul.msk.f32.gmra.mxu0 %vm246_vm1, %v209_v12  ;;  %v242_v39 = vld [vmem:[%s3597_s27 + $0x111] sm:$0xff]  ;;  %v215_v40 = vld [vmem:[%s3597_s27 + $0x39] sm:$0xff]  ;;  %v225_v41 = vld [vmem:[%s3597_s27 + $0x89] sm:$0xff] }
  0x1b   : > { %v234_v42 = vld [vmem:[%s3597_s27 + $0xd1] sm:$0xff]  ;;  %v243_v43 = vld [vmem:[%s3597_s27 + $0x119] sm:$0xff]  ;;  %v216_v44 = vld [vmem:[%s3597_s27 + $0x41] sm:$0xff] }
  0x1c   : > { %v171_v45 = vld [vmem:[%s3597_s27] sm:$0xff]  ;;  %v1030_v47 = vld [vmem:[%s3597_s27 + $0x12] sm:$0xff]  ;;  %v172_v49 = vld [vmem:[%s3597_s27 + $0x8] sm:$0xff] }
  0x1d   : > { %v720_v46 = vld [vmem:[%s3597_s27 + $0x2] sm:$0xff]  ;;  %v1340_v48 = vld [vmem:[%s3597_s27 + $0x13] sm:$0xff]  ;;  %v721_v50 = vld [vmem:[%s3597_s27 + $0xa] sm:$0xff] }
  0x1e   : > { %v1031_v51 = vld [vmem:[%s3597_s27 + $0x1a] sm:$0xff]  ;;  %v173_v53 = vld [vmem:[%s3597_s27 + $0x10] sm:$0xff]  ;;  %v1032_v54 = vld [vmem:[%s3597_s27 + $0x22] sm:$0xff] }
  0x1f   : > { %v1341_v52 = vld [vmem:[%s3597_s27 + $0x1b] sm:$0xff]  ;;  %v1342_v55 = vld [vmem:[%s3597_s27 + $0x23] sm:$0xff]  ;;  %v1343_v58 = vld [vmem:[%s3597_s27 + $0x2b] sm:$0xff] }
  0x20   : > { %v174_v56 = vld [vmem:[%s3597_s27 + $0x18] sm:$0xff]  ;;  %v1033_v57 = vld [vmem:[%s3597_s27 + $0x2a] sm:$0xff]  ;;  %v175_v59 = vld [vmem:[%s3597_s27 + $0x20] sm:$0xff] }
  0x21   : > { %3157 = vmatmul.msk.f32.gmra.mxu1 %vm246_vm1, %v219_v13  ;;  %3166 = vmatmul.msk.f32.gmra.mxu2 %vm246_vm1, %v228_v14  ;;  %v1034_v60 = vld [vmem:[%s3597_s27 + $0x32] sm:$0xff]  ;;  %v176_v62 = vld [vmem:[%s3597_s27 + $0x28] sm:$0xff]  ;;  %v1035_v63 = vld [vmem:[%s3597_s27 + $0x3a] sm:$0xff] }
  0x22   : > { %3175 = vmatmul.msk.f32.gmra.mxu3 %vm246_vm1, %v237_v15  ;;  %3148 = vmatmul.msk.f32.gmra.mxu0 %vm246_vm1, %v210_v16  ;;  %v1344_v61 = vld [vmem:[%s3597_s27 + $0x33] sm:$0xff]  ;;  %v1345_v0 = vld [vmem:[%s3597_s27 + $0x3b] sm:$0xff]  ;;  %v1346_v3 = vld [vmem:[%s3597_s27 + $0x43] sm:$0xff] }
  0x23   : > { %v177_v1 = vld [vmem:[%s3597_s27 + $0x30] sm:$0xff]  ;;  %v1036_v2 = vld [vmem:[%s3597_s27 + $0x42] sm:$0xff]  ;;  %v178_v5 = vld [vmem:[%s3597_s27 + $0x38] sm:$0xff] }
  0x24   : > { %v1037_v6 = vld [vmem:[%s3597_s27 + $0x4a] sm:$0xff]  ;;  %v179_v12 = vld [vmem:[%s3597_s27 + $0x40] sm:$0xff]  ;;  %v1038_v13 = vld [vmem:[%s3597_s27 + $0x52] sm:$0xff] }
  0x25   : > { %v1347_v8 = vld [vmem:[%s3597_s27 + $0x4b] sm:$0xff]  ;;  %v1348_v15 = vld [vmem:[%s3597_s27 + $0x53] sm:$0xff]  ;;  %v1350_v29 = vld [vmem:[%s3597_s27 + $0x63] sm:$0xff] }
  0x26   : > { %v1351_v36 = vld [vmem:[%s3597_s27 + $0x6b] sm:$0xff] }
  0x29   : > { %3158 = vmatmul.msk.f32.gmra.mxu1 %vm246_vm1, %v220_v17  ;;  %3167 = vmatmul.msk.f32.gmra.mxu2 %vm246_vm1, %v229_v18 }
  0x2a   : > { %3176 = vmatmul.msk.f32.gmra.mxu3 %vm246_vm1, %v238_v19  ;;  %3149 = vmatmul.msk.f32.gmra.mxu0 %vm246_vm1, %v211_v20  ;;  %v180_v19 = vld [vmem:[%s3597_s27 + $0x48] sm:$0xff]  ;;  %v1039_v20 = vld [vmem:[%s3597_s27 + $0x5a] sm:$0xff] }
  0x31   : > { %3159 = vmatmul.msk.f32.gmra.mxu1 %vm246_vm1, %v221_v21  ;;  %3168 = vmatmul.msk.f32.gmra.mxu2 %vm246_vm1, %v230_v22  ;;  %v1349_v22 = vld [vmem:[%s3597_s27 + $0x5b] sm:$0xff] }
  0x32   : > { %3177 = vmatmul.msk.f32.gmra.mxu3 %vm246_vm1, %v239_v23  ;;  %3150 = vmatmul.msk.f32.gmra.mxu0 %vm246_vm1, %v212_v24 }
  0x39   : > { %3160 = vmatmul.msk.f32.gmra.mxu1 %vm246_vm1, %v222_v25  ;;  %3169 = vmatmul.msk.f32.gmra.mxu2 %vm246_vm1, %v231_v26  ;;  %v181_v26 = vld [vmem:[%s3597_s27 + $0x50] sm:$0xff] }
  0x3a   : > { %3178 = vmatmul.msk.f32.gmra.mxu3 %vm246_vm1, %v240_v27  ;;  %3151 = vmatmul.msk.f32.gmra.mxu0 %vm246_vm1, %v213_v28  ;;  %v1040_v27 = vld [vmem:[%s3597_s27 + $0x62] sm:$0xff] }
  0x41   : > { %3161 = vmatmul.msk.f32.gmra.mxu1 %vm246_vm1, %v223_v32  ;;  %3170 = vmatmul.msk.f32.gmra.mxu2 %vm246_vm1, %v232_v33  ;;  %v182_v33 = vld [vmem:[%s3597_s27 + $0x58] sm:$0xff] }
  0x42   : > { %3179 = vmatmul.msk.f32.gmra.mxu3 %vm246_vm1, %v241_v34  ;;  %3152 = vmatmul.msk.f32.gmra.mxu0 %vm246_vm1, %v214_v35  ;;  %v1041_v34 = vld [vmem:[%s3597_s27 + $0x6a] sm:$0xff] }
  0x49   : > { %3162 = vmatmul.msk.f32.gmra.mxu1 %vm246_vm1, %v224_v37  ;;  %3171 = vmatmul.msk.f32.gmra.mxu2 %vm246_vm1, %v233_v38 }
  0x4a   : > { %3180 = vmatmul.msk.f32.gmra.mxu3 %vm246_vm1, %v242_v39  ;;  %3153 = vmatmul.msk.f32.gmra.mxu0 %vm246_vm1, %v215_v40  ;;  %v183_v40 = vld [vmem:[%s3597_s27 + $0x60] sm:$0xff] }
  0x51   : > { %3163 = vmatmul.msk.f32.gmra.mxu1 %vm246_vm1, %v225_v41  ;;  %3172 = vmatmul.msk.f32.gmra.mxu2 %vm246_vm1, %v234_v42  ;;  %v1042_v41 = vld [vmem:[%s3597_s27 + $0x72] sm:$0xff] }
  0x52   : > { %3181 = vmatmul.msk.f32.gmra.mxu3 %vm246_vm1, %v243_v43  ;;  %3154 = vmatmul.msk.f32.gmra.mxu0 %vm246_vm1, %v216_v44  ;;  %v1352_v43 = vld [vmem:[%s3597_s27 + $0x73] sm:$0xff] }
  0x59   : > { %3183 = vmatmul.msk.f32.vlgmr.msrb.gmra.mxu1 %vm246_vm1, %v171_v45  ;;  %3221 = vmatmul.msk.f32.vlgmr.msrb.gmra.mxu2 %vm246_vm1, %v720_v46 }
  0x5a   : > { %3259 = vmatmul.msk.f32.vlgmr.msrb.gmra.mxu3 %vm246_vm1, %v1030_v47  ;;  %3297 = vmatmul.msk.f32.vlgmr.msrb.gmra.mxu0 %vm246_vm1, %v1340_v48  ;;  %v1043_v48 = vld [vmem:[%s3597_s27 + $0x7a] sm:$0xff] }
  0x61   : > { %3184 = vmatmul.msk.f32.gmra.mxu1 %vm246_vm1, %v172_v49  ;;  %3222 = vmatmul.msk.f32.gmra.mxu2 %vm246_vm1, %v721_v50  ;;  %v1353_v50 = vld [vmem:[%s3597_s27 + $0x7b] sm:$0xff] }
  0x62   : > { %3260 = vmatmul.msk.f32.gmra.mxu3 %vm246_vm1, %v1031_v51  ;;  %3298 = vmatmul.msk.f32.gmra.mxu0 %vm246_vm1, %v1341_v52 }
  0x69   : > { %3185 = vmatmul.msk.f32.gmra.mxu1 %vm246_vm1, %v173_v53  ;;  %3223 = vmatmul.msk.f32.gmra.mxu2 %vm246_vm1, %v1030_v47  ;;  %v184_v47 = vld [vmem:[%s3597_s27 + $0x68] sm:$0xff] }
  0x6a   : > { %3261 = vmatmul.msk.f32.gmra.mxu3 %vm246_vm1, %v1032_v54  ;;  %3299 = vmatmul.msk.f32.gmra.mxu0 %vm246_vm1, %v1342_v55  ;;  %v1044_v55 = vld [vmem:[%s3597_s27 + $0x82] sm:$0xff] }
  0x71   : > { %3186 = vmatmul.msk.f32.gmra.mxu1 %vm246_vm1, %v174_v56  ;;  %3224 = vmatmul.msk.f32.gmra.mxu2 %vm246_vm1, %v1031_v51 }
  0x72   : > { %3262 = vmatmul.msk.f32.gmra.mxu3 %vm246_vm1, %v1033_v57  ;;  %3300 = vmatmul.msk.f32.gmra.mxu0 %vm246_vm1, %v1343_v58 }
  0x79   : > { %3187 = vmatmul.msk.f32.gmra.mxu1 %vm246_vm1, %v175_v59  ;;  %3225 = vmatmul.msk.f32.gmra.mxu2 %vm246_vm1, %v1032_v54  ;;  %v185_v54 = vld [vmem:[%s3597_s27 + $0x70] sm:$0xff] }
  0x7a   : > { %3263 = vmatmul.msk.f32.gmra.mxu3 %vm246_vm1, %v1034_v60  ;;  %3301 = vmatmul.msk.f32.gmra.mxu0 %vm246_vm1, %v1344_v61  ;;  %v186_v61 = vld [vmem:[%s3597_s27 + $0x78] sm:$0xff] }
  0x81   : > { %3188 = vmatmul.msk.f32.gmra.mxu1 %vm246_vm1, %v176_v62  ;;  %3226 = vmatmul.msk.f32.gmra.mxu2 %vm246_vm1, %v1033_v57  ;;  %v1354_v57 = vld [vmem:[%s3597_s27 + $0x83] sm:$0xff] }
  0x82   : > { %3264 = vmatmul.msk.f32.gmra.mxu3 %vm246_vm1, %v1035_v63  ;;  %3302 = vmatmul.msk.f32.gmra.mxu0 %vm246_vm1, %v1345_v0  ;;  %v1045_v62 = vld [vmem:[%s3597_s27 + $0x8a] sm:$0xff] }
  0x83   : > { %v1355_v0 = vld [vmem:[%s3597_s27 + $0x8b] sm:$0xff] }
  0x89   : > { %3189 = vmatmul.msk.f32.gmra.mxu1 %vm246_vm1, %v177_v1  ;;  %3227 = vmatmul.msk.f32.gmra.mxu2 %vm246_vm1, %v1034_v60 }
  0x8a   : > { %3265 = vmatmul.msk.f32.gmra.mxu3 %vm246_vm1, %v1036_v2  ;;  %3303 = vmatmul.msk.f32.gmra.mxu0 %vm246_vm1, %v1346_v3 }
  0x8e   : > { %v3738_v4 = vpop.f32.mrf.mxu1 }
  0x8f   : > { %v3742_v7 = vpop.f32.mrf.mxu0 }
  0x91   : > { %3190 = vmatmul.msk.f32.gmra.mxu1 %vm246_vm1, %v178_v5  ;;  %3228 = vmatmul.msk.f32.gmra.mxu2 %vm246_vm1, %v1035_v63  ;;  %v187_v5 = vld [vmem:[%s3597_s27 + $0x80] sm:$0xff] }
  0x92   : > { %3266 = vmatmul.msk.f32.gmra.mxu3 %vm246_vm1, %v1037_v6  ;;  %3304 = vmatmul.msk.f32.gmra.mxu0 %vm246_vm1, %v1347_v8 }
  0x94   : > { %v3749_v9 = vpop.f32.mrf.mxu2 }
  0x95   : > { %v3751_v10 = vpop.f32.mrf.mxu3 }
  0x96   : > { %v3753_v11 = vpop.f32.mrf.mxu1 }
  0x97   : > { %v3757_v14 = vpop.f32.mrf.mxu0 }
  0x99   : > { %3191 = vmatmul.msk.f32.gmra.mxu1 %vm246_vm1, %v179_v12  ;;  %3229 = vmatmul.msk.f32.gmra.mxu2 %vm246_vm1, %v1036_v2  ;;  %v1356_v12 = vld [vmem:[%s3597_s27 + $0x93] sm:$0xff] }
  0x9a   : > { %3267 = vmatmul.msk.f32.gmra.mxu3 %vm246_vm1, %v1038_v13  ;;  %3305 = vmatmul.msk.f32.gmra.mxu0 %vm246_vm1, %v1348_v15 }
  0x9c   : > { %v3764_v16 = vpop.f32.mrf.mxu2 }
  0x9d   : > { %v3766_v17 = vpop.f32.mrf.mxu3 }
  0x9e   : > { %v3768_v18 = vpop.f32.mrf.mxu1 }
  0x9f   : > { %v3772_v21 = vpop.f32.mrf.mxu0 }
  0xa1   : > { %3192 = vmatmul.msk.f32.gmra.mxu1 %vm246_vm1, %v180_v19  ;;  %3230 = vmatmul.msk.f32.gmra.mxu2 %vm246_vm1, %v1037_v6  ;;  %v1046_v6 = vld [vmem:[%s3597_s27 + $0x92] sm:$0xff] }
  0xa2   : > { %3268 = vmatmul.msk.f32.gmra.mxu3 %vm246_vm1, %v1039_v20  ;;  %3306 = vmatmul.msk.f32.gmra.mxu0 %vm246_vm1, %v1349_v22 }
  0xa4   : > { %v3779_v23 = vpop.f32.mrf.mxu2 }
  0xa5   : > { %v3781_v24 = vpop.f32.mrf.mxu3 }
  0xa6   : > { %v3783_v25 = vpop.f32.mrf.mxu1 }
  0xa7   : > { %v3787_v28 = vpop.f32.mrf.mxu0 }
  0xa9   : > { %3193 = vmatmul.msk.f32.gmra.mxu1 %vm246_vm1, %v181_v26  ;;  %3231 = vmatmul.msk.f32.gmra.mxu2 %vm246_vm1, %v1038_v13  ;;  %v188_v26 = vld [vmem:[%s3597_s27 + $0x88] sm:$0xff] }
  0xaa   : > { %3269 = vmatmul.msk.f32.gmra.mxu3 %vm246_vm1, %v1040_v27  ;;  %3307 = vmatmul.msk.f32.gmra.mxu0 %vm246_vm1, %v1350_v29  ;;  %v1047_v29 = vld [vmem:[%s3597_s27 + $0x9a] sm:$0xff] }
  0xac   : > { %v3794_v30 = vpop.f32.mrf.mxu2 }
  0xad   : > { %v3796_v31 = vpop.f32.mrf.mxu3 }
  0xae   : > { %v3798_v32 = vpop.f32.mrf.mxu1 }
  0xaf   : > { %v3802_v35 = vpop.f32.mrf.mxu0 }
  0xb1   : > { %3194 = vmatmul.msk.f32.gmra.mxu1 %vm246_vm1, %v182_v33  ;;  %3232 = vmatmul.msk.f32.gmra.mxu2 %vm246_vm1, %v1039_v20 }
  0xb2   : > { %3270 = vmatmul.msk.f32.gmra.mxu3 %vm246_vm1, %v1041_v34  ;;  %3308 = vmatmul.msk.f32.gmra.mxu0 %vm246_vm1, %v1351_v36 }
  0xb4   : > { %v3809_v37 = vpop.f32.mrf.mxu2 }
  0xb5   : > { %v3811_v38 = vpop.f32.mrf.mxu3 }
  0xb6   : > { %v3813_v39 = vpop.f32.mrf.mxu1 }
  0xb7   : > { %v3817_v42 = vpop.f32.mrf.mxu0 }
  0xb9   : > { %3195 = vmatmul.msk.f32.gmra.mxu1 %vm246_vm1, %v183_v40  ;;  %3233 = vmatmul.msk.f32.gmra.mxu2 %vm246_vm1, %v1040_v27 }
  0xba   : > { %3271 = vmatmul.msk.f32.gmra.mxu3 %vm246_vm1, %v1042_v41  ;;  %3309 = vmatmul.msk.f32.gmra.mxu0 %vm246_vm1, %v1352_v43 }
  0xbc   : > { %v3824_v44 = vpop.f32.mrf.mxu2 }
  0xbd   : > { %v3826_v45 = vpop.f32.mrf.mxu3 }
  0xbe   : > { %v3828_v46 = vpop.f32.mrf.mxu1 }
  0xbf   : > { %v3832_v49 = vpop.f32.mrf.mxu0 }
  0xc1   : > { %3196 = vmatmul.msk.f32.gmra.mxu1 %vm246_vm1, %v184_v47  ;;  %3234 = vmatmul.msk.f32.gmra.mxu2 %vm246_vm1, %v1041_v34  ;;  %v1357_v34 = vld [vmem:[%s3597_s27 + $0x9b] sm:$0xff] }
  0xc2   : > { %3272 = vmatmul.msk.f32.gmra.mxu3 %vm246_vm1, %v1043_v48  ;;  %3310 = vmatmul.msk.f32.gmra.mxu0 %vm246_vm1, %v1353_v50 }
  0xc4   : > { %v3839_v51 = vpop.f32.mrf.mxu2 }
  0xc5   : > { %v3841_v52 = vpop.f32.mrf.mxu3 }
  0xc6   : > { %v3843_v53 = vpop.f32.mrf.mxu1 }
  0xc7   : > { %v3847_v56 = vpop.f32.mrf.mxu0 }
  0xc9   : > { %3197 = vmatmul.msk.f32.gmra.mxu1 %vm246_vm1, %v185_v54  ;;  %3235 = vmatmul.msk.f32.gmra.mxu2 %vm246_vm1, %v1042_v41  ;;  %v1048_v54 = vld [vmem:[%s3597_s27 + $0xa2] sm:$0xff] }
  0xca   : > { %3273 = vmatmul.msk.f32.gmra.mxu3 %vm246_vm1, %v1044_v55  ;;  %3311 = vmatmul.msk.f32.gmra.mxu0 %vm246_vm1, %v1354_v57  ;;  %v1358_v57 = vld [vmem:[%s3597_s27 + $0xa3] sm:$0xff] }
  0xcc   : > { %v3854_v58 = vpop.f32.mrf.mxu2 }
  0xcd   : > { %v3856_v59 = vpop.f32.mrf.mxu3 }
  0xce   : > { %v3858_v60 = vpop.f32.mrf.mxu1 }
  0xcf   : > { %v3862_v63 = vpop.f32.mrf.mxu0 }
  0xd1   : > { %3198 = vmatmul.msk.f32.gmra.mxu1 %vm246_vm1, %v186_v61  ;;  %3236 = vmatmul.msk.f32.gmra.mxu2 %vm246_vm1, %v1043_v48  ;;  %v189_v48 = vld [vmem:[%s3597_s27 + $0x90] sm:$0xff] }
  0xd2   : > { %3274 = vmatmul.msk.f32.gmra.mxu3 %vm246_vm1, %v1045_v62  ;;  %3312 = vmatmul.msk.f32.gmra.mxu0 %vm246_vm1, %v1355_v0 }
  0xd4   : > { %v3869_v1 = vpop.f32.mrf.mxu2 }
  0xd5   : > { %v3871_v2 = vpop.f32.mrf.mxu3 }
  0xd6   : > { %v612_v3 = vpop.f32.mrf.mxu1 }
  0xd7   : > { %v1506_v8 = vpop.f32.mrf.mxu0  ;;  %v613_v13 = vadd.f32 %v612_v3, %v3742_v7 }
  0xd9   : > { %3199 = vmatmul.msk.f32.gmra.mxu1 %vm246_vm1, %v187_v5  ;;  %3237 = vmatmul.msk.f32.gmra.mxu2 %vm246_vm1, %v1044_v55 }
  0xda   : > { %3275 = vmatmul.msk.f32.gmra.mxu3 %vm246_vm1, %v1046_v6  ;;  %3313 = vmatmul.msk.f32.gmra.mxu0 %vm246_vm1, %v1356_v12 }
  0xdc   : > { %v886_v15 = vpop.f32.mrf.mxu2 }
  0xdd   : > { %v994_v19 = vadd.f32 %v886_v15, %v613_v13  ;;  %v1196_v20 = vpop.f32.mrf.mxu3  ;;  %v1049_v13 = vld [vmem:[%s3597_s27 + $0xaa] sm:$0xff] }
  0xde   : > { %v615_v22 = vpop.f32.mrf.mxu1 }
  0xdf   : > { %v1304_v27 = vadd.f32 %v1196_v20, %v994_v19  ;;  %v1509_v33 = vpop.f32.mrf.mxu0  ;;  %v616_v7 = vadd.f32 %v615_v22, %v3757_v14  ;;  %v1359_v19 = vld [vmem:[%s3597_s27 + $0xab] sm:$0xff] }
  0xe1   : > { %v3884_v36 = vadd.f32 %v1506_v8, %v1304_v27  ;;  %3200 = vmatmul.msk.f32.gmra.mxu1 %vm246_vm1, %v188_v26  ;;  %3238 = vmatmul.msk.f32.gmra.mxu2 %vm246_vm1, %v1045_v62  ;;  %v190_v8 = vld [vmem:[%s3597_s27 + $0x98] sm:$0xff] }
  0xe2   : > { %3276 = vmatmul.msk.f32.gmra.mxu3 %vm246_vm1, %v1047_v29  ;;  %3314 = vmatmul.msk.f32.gmra.mxu0 %vm246_vm1, %v1357_v34 }
  0xe4   : > { %v889_v40 = vpop.f32.mrf.mxu2 }
  0xe5   : > { %v995_v41 = vadd.f32 %v889_v40, %v616_v7  ;;  %v1199_v43 = vpop.f32.mrf.mxu3  ;;  %v1050_v7 = vld [vmem:[%s3597_s27 + $0xb2] sm:$0xff] }
  0xe6   : > { %v618_v47 = vpop.f32.mrf.mxu1 }
  0xe7   : > { %v1305_v50 = vadd.f32 %v1199_v43, %v995_v41  ;;  %v1512_v55 = vpop.f32.mrf.mxu0  ;;  %v619_v14 = vadd.f32 %v618_v47, %v3772_v21  ;;  %v1360_v41 = vld [vmem:[%s3597_s27 + $0xb3] sm:$0xff] }
  0xe9   : > { %v3894_v61 = vadd.f32 %v1509_v33, %v1305_v50  ;;  %3201 = vmatmul.msk.f32.gmra.mxu1 %vm246_vm1, %v189_v48  ;;  %3239 = vmatmul.msk.f32.gmra.mxu2 %vm246_vm1, %v1046_v6  ;;  %v191_v33 = vld [vmem:[%s3597_s27 + $0xa0] sm:$0xff] }
  0xea   : > { %3277 = vmatmul.msk.f32.gmra.mxu3 %vm246_vm1, %v1048_v54  ;;  %3315 = vmatmul.msk.f32.gmra.mxu0 %vm246_vm1, %v1358_v57 }
  0xec   : > { %v892_v62 = vpop.f32.mrf.mxu2 }
  0xed   : > { %v996_v0 = vadd.f32 %v892_v62, %v619_v14  ;;  %v1202_v3 = vpop.f32.mrf.mxu3  ;;  %v1051_v14 = vld [vmem:[%s3597_s27 + $0xba] sm:$0xff] }
  0xee   : > { %v621_v5 = vpop.f32.mrf.mxu1 }
  0xef   : > { %v1306_v12 = vadd.f32 %v1202_v3, %v996_v0  ;;  %v1515_v15 = vpop.f32.mrf.mxu0  ;;  %v622_v21 = vadd.f32 %v621_v5, %v3787_v28  ;;  %v1361_v0 = vld [vmem:[%s3597_s27 + $0xbb] sm:$0xff] }
  0xf1   : > { %v3904_v20 = vadd.f32 %v1512_v55, %v1306_v12  ;;  %3202 = vmatmul.msk.f32.gmra.mxu1 %vm246_vm1, %v190_v8  ;;  %3240 = vmatmul.msk.f32.gmra.mxu2 %vm246_vm1, %v1047_v29  ;;  %v192_v55 = vld [vmem:[%s3597_s27 + $0xa8] sm:$0xff] }
  0xf2   : > { %3278 = vmatmul.msk.f32.gmra.mxu3 %vm246_vm1, %v1049_v13  ;;  %3316 = vmatmul.msk.f32.gmra.mxu0 %vm246_vm1, %v1359_v19 }
  0xf4   : > { %v895_v6 = vpop.f32.mrf.mxu2 }
  0xf5   : > { %v997_v22 = vadd.f32 %v895_v6, %v622_v21  ;;  %v1205_v26 = vpop.f32.mrf.mxu3  ;;  %v1052_v21 = vld [vmem:[%s3597_s27 + $0xc2] sm:$0xff] }
  0xf6   : > { %v624_v27 = vpop.f32.mrf.mxu1 }
  0xf7   : > { %v1307_v34 = vadd.f32 %v1205_v26, %v997_v22  ;;  %v1518_v40 = vpop.f32.mrf.mxu0  ;;  %v625_v28 = vadd.f32 %v624_v27, %v3802_v35  ;;  %v1362_v22 = vld [vmem:[%s3597_s27 + $0xc3] sm:$0xff] }
  0xf9   : > { %v3914_v43 = vadd.f32 %v1515_v15, %v1307_v34  ;;  %3203 = vmatmul.msk.f32.gmra.mxu1 %vm246_vm1, %v191_v33  ;;  %3241 = vmatmul.msk.f32.gmra.mxu2 %vm246_vm1, %v1048_v54  ;;  %v193_v15 = vld [vmem:[%s3597_s27 + $0xb0] sm:$0xff] }
  0xfa   : > { %3279 = vmatmul.msk.f32.gmra.mxu3 %vm246_vm1, %v1050_v7  ;;  %3317 = vmatmul.msk.f32.gmra.mxu0 %vm246_vm1, %v1360_v41 }
  0xfc   : > { %v898_v29 = vpop.f32.mrf.mxu2 }
  0xfd   : > { %v998_v47 = vadd.f32 %v898_v29, %v625_v28  ;;  %v1208_v48 = vpop.f32.mrf.mxu3  ;;  %v1053_v28 = vld [vmem:[%s3597_s27 + $0xca] sm:$0xff] }
  0xfe   : > { %v627_v50 = vpop.f32.mrf.mxu1 }
  0xff   : > { %v1308_v57 = vadd.f32 %v1208_v48, %v998_v47  ;;  %v1521_v62 = vpop.f32.mrf.mxu0  ;;  %v628_v35 = vadd.f32 %v627_v50, %v3817_v42  ;;  %v1363_v47 = vld [vmem:[%s3597_s27 + $0xcb] sm:$0xff] }
 0x101   : > { %v3924_v3 = vadd.f32 %v1518_v40, %v1308_v57  ;;  %3204 = vmatmul.msk.f32.gmra.mxu1 %vm246_vm1, %v192_v55  ;;  %3242 = vmatmul.msk.f32.gmra.mxu2 %vm246_vm1, %v1049_v13  ;;  %v194_v40 = vld [vmem:[%s3597_s27 + $0xb8] sm:$0xff] }
 0x102   : > { %3280 = vmatmul.msk.f32.gmra.mxu3 %vm246_vm1, %v1051_v14  ;;  %3318 = vmatmul.msk.f32.gmra.mxu0 %vm246_vm1, %v1361_v0 }
 0x104   : > { %v901_v54 = vpop.f32.mrf.mxu2 }
 0x105   : > { %v999_v5 = vadd.f32 %v901_v54, %v628_v35  ;;  %v1211_v8 = vpop.f32.mrf.mxu3  ;;  %v1054_v35 = vld [vmem:[%s3597_s27 + $0xd2] sm:$0xff] }
 0x106   : > { %v630_v12 = vpop.f32.mrf.mxu1 }
 0x107   : > { %v1309_v19 = vadd.f32 %v1211_v8, %v999_v5  ;;  %v1524_v6 = vpop.f32.mrf.mxu0  ;;  %v631_v42 = vadd.f32 %v630_v12, %v3832_v49  ;;  %v1364_v5 = vld [vmem:[%s3597_s27 + $0xd3] sm:$0xff] }
 0x109   : > { %v3934_v26 = vadd.f32 %v1521_v62, %v1309_v19  ;;  %3205 = vmatmul.msk.f32.gmra.mxu1 %vm246_vm1, %v193_v15  ;;  %3243 = vmatmul.msk.f32.gmra.mxu2 %vm246_vm1, %v1050_v7  ;;  %v195_v62 = vld [vmem:[%s3597_s27 + $0xc0] sm:$0xff] }
 0x10a   : > { %3281 = vmatmul.msk.f32.gmra.mxu3 %vm246_vm1, %v1052_v21  ;;  %3319 = vmatmul.msk.f32.gmra.mxu0 %vm246_vm1, %v1362_v22 }
 0x10c   : > { %v904_v13 = vpop.f32.mrf.mxu2 }
 0x10d   : > { %v1000_v27 = vadd.f32 %v904_v13, %v631_v42  ;;  %v1214_v33 = vpop.f32.mrf.mxu3  ;;  %v1055_v42 = vld [vmem:[%s3597_s27 + $0xda] sm:$0xff] }
 0x10e   : > { %v633_v34 = vpop.f32.mrf.mxu1 }
 0x10f   : > { %v1310_v41 = vadd.f32 %v1214_v33, %v1000_v27  ;;  %v1527_v29 = vpop.f32.mrf.mxu0  ;;  %v634_v49 = vadd.f32 %v633_v34, %v3847_v56  ;;  %v1365_v27 = vld [vmem:[%s3597_s27 + $0xdb] sm:$0xff] }
 0x111   : > { %v3944_v48 = vadd.f32 %v1524_v6, %v1310_v41  ;;  %3206 = vmatmul.msk.f32.gmra.mxu1 %vm246_vm1, %v194_v40  ;;  %3244 = vmatmul.msk.f32.gmra.mxu2 %vm246_vm1, %v1051_v14  ;;  %v196_v6 = vld [vmem:[%s3597_s27 + $0xc8] sm:$0xff] }
 0x112   : > { %3282 = vmatmul.msk.f32.gmra.mxu3 %vm246_vm1, %v1053_v28  ;;  %3320 = vmatmul.msk.f32.gmra.mxu0 %vm246_vm1, %v1363_v47 }
 0x114   : > { %v907_v7 = vpop.f32.mrf.mxu2 }
 0x115   : > { %v1001_v50 = vadd.f32 %v907_v7, %v634_v49  ;;  %v1217_v55 = vpop.f32.mrf.mxu3  ;;  %v1056_v49 = vld [vmem:[%s3597_s27 + $0xe2] sm:$0xff] }
 0x116   : > { %v636_v57 = vpop.f32.mrf.mxu1 }
 0x117   : > { %v1311_v0 = vadd.f32 %v1217_v55, %v1001_v50  ;;  %v1530_v54 = vpop.f32.mrf.mxu0  ;;  %v637_v56 = vadd.f32 %v636_v57, %v3862_v63  ;;  %v1366_v50 = vld [vmem:[%s3597_s27 + $0xe3] sm:$0xff] }
 0x119   : > { %v3954_v8 = vadd.f32 %v1527_v29, %v1311_v0  ;;  %3207 = vmatmul.msk.f32.gmra.mxu1 %vm246_vm1, %v195_v62  ;;  %3245 = vmatmul.msk.f32.gmra.mxu2 %vm246_vm1, %v1052_v21  ;;  %v197_v29 = vld [vmem:[%s3597_s27 + $0xd0] sm:$0xff] }
 0x11a   : > { %3283 = vmatmul.msk.f32.gmra.mxu3 %vm246_vm1, %v1054_v35  ;;  %3321 = vmatmul.msk.f32.gmra.mxu0 %vm246_vm1, %v1364_v5 }
 0x11c   : > { %v910_v14 = vpop.f32.mrf.mxu2 }
 0x11d   : > { %v1002_v12 = vadd.f32 %v910_v14, %v637_v56  ;;  %v1220_v15 = vpop.f32.mrf.mxu3  ;;  %v1057_v56 = vld [vmem:[%s3597_s27 + $0xea] sm:$0xff] }
 0x11e   : > { %v639_v19 = vpop.f32.mrf.mxu1 }
 0x11f   : > { %v1312_v22 = vadd.f32 %v1220_v15, %v1002_v12  ;;  %v1533_v13 = vpop.f32.mrf.mxu0  ;;  %v640_v63 = vadd.f32 %v639_v19, %v3738_v4  ;;  %v1367_v12 = vld [vmem:[%s3597_s27 + $0xeb] sm:$0xff] }
 0x121   : > { %v3964_v33 = vadd.f32 %v1530_v54, %v1312_v22  ;;  %3208 = vmatmul.msk.f32.gmra.mxu1 %vm246_vm1, %v196_v6  ;;  %3246 = vmatmul.msk.f32.gmra.mxu2 %vm246_vm1, %v1053_v28  ;;  %v198_v54 = vld [vmem:[%s3597_s27 + $0xd8] sm:$0xff] }
 0x122   : > { %3284 = vmatmul.msk.f32.gmra.mxu3 %vm246_vm1, %v1055_v42  ;;  %3322 = vmatmul.msk.f32.gmra.mxu0 %vm246_vm1, %v1365_v27 }
 0x124   : > { %v913_v21 = vpop.f32.mrf.mxu2 }
 0x125   : > { %v1003_v34 = vadd.f32 %v913_v21, %v640_v63  ;;  %v1223_v40 = vpop.f32.mrf.mxu3  ;;  %v1058_v63 = vld [vmem:[%s3597_s27 + $0xf2] sm:$0xff] }
 0x126   : > { %v642_v41 = vpop.f32.mrf.mxu1 }
 0x127   : > { %v1313_v47 = vadd.f32 %v1223_v40, %v1003_v34  ;;  %v1536_v7 = vpop.f32.mrf.mxu0  ;;  %v643_v4 = vadd.f32 %v642_v41, %v3753_v11  ;;  %v1368_v34 = vld [vmem:[%s3597_s27 + $0xf3] sm:$0xff] }
 0x129   : > { %v3974_v55 = vadd.f32 %v1533_v13, %v1313_v47  ;;  %3209 = vmatmul.msk.f32.gmra.mxu1 %vm246_vm1, %v197_v29  ;;  %3247 = vmatmul.msk.f32.gmra.mxu2 %vm246_vm1, %v1054_v35  ;;  %v199_v13 = vld [vmem:[%s3597_s27 + $0xe0] sm:$0xff] }
 0x12a   : > { %3285 = vmatmul.msk.f32.gmra.mxu3 %vm246_vm1, %v1056_v49  ;;  %3323 = vmatmul.msk.f32.gmra.mxu0 %vm246_vm1, %v1366_v50 }
 0x12c   : > { %v916_v28 = vpop.f32.mrf.mxu2 }
 0x12d   : > { %v1004_v57 = vadd.f32 %v916_v28, %v643_v4  ;;  %v1226_v62 = vpop.f32.mrf.mxu3  ;;  %v1059_v4 = vld [vmem:[%s3597_s27 + $0xfa] sm:$0xff] }
 0x12e   : > { %v645_v0 = vpop.f32.mrf.mxu1 }
 0x12f   : > { %v1314_v5 = vadd.f32 %v1226_v62, %v1004_v57  ;;  %v1539_v14 = vpop.f32.mrf.mxu0  ;;  %v646_v11 = vadd.f32 %v645_v0, %v3768_v18  ;;  %v1369_v57 = vld [vmem:[%s3597_s27 + $0xfb] sm:$0xff] }
 0x131   : > { %v3984_v15 = vadd.f32 %v1536_v7, %v1314_v5  ;;  %3210 = vmatmul.msk.f32.gmra.mxu1 %vm246_vm1, %v198_v54  ;;  %3248 = vmatmul.msk.f32.gmra.mxu2 %vm246_vm1, %v1055_v42  ;;  %v200_v7 = vld [vmem:[%s3597_s27 + $0xe8] sm:$0xff] }
 0x132   : > { %3286 = vmatmul.msk.f32.gmra.mxu3 %vm246_vm1, %v1057_v56  ;;  %3324 = vmatmul.msk.f32.gmra.mxu0 %vm246_vm1, %v1367_v12 }
 0x134   : > { %v919_v35 = vpop.f32.mrf.mxu2 }
 0x135   : > { %v1005_v19 = vadd.f32 %v919_v35, %v646_v11  ;;  %v1229_v6 = vpop.f32.mrf.mxu3  ;;  %v1060_v11 = vld [vmem:[%s3597_s27 + $0x102] sm:$0xff] }
 0x136   : > { %v648_v22 = vpop.f32.mrf.mxu1 }
 0x137   : > { %v1315_v27 = vadd.f32 %v1229_v6, %v1005_v19  ;;  %v1542_v21 = vpop.f32.mrf.mxu0  ;;  %v649_v18 = vadd.f32 %v648_v22, %v3783_v25  ;;  %v1370_v19 = vld [vmem:[%s3597_s27 + $0x103] sm:$0xff] }
 0x139   : > { %v3994_v40 = vadd.f32 %v1539_v14, %v1315_v27  ;;  %3211 = vmatmul.msk.f32.gmra.mxu1 %vm246_vm1, %v199_v13  ;;  %3249 = vmatmul.msk.f32.gmra.mxu2 %vm246_vm1, %v1056_v49  ;;  %v201_v14 = vld [vmem:[%s3597_s27 + $0xf0] sm:$0xff] }
 0x13a   : > { %3287 = vmatmul.msk.f32.gmra.mxu3 %vm246_vm1, %v1058_v63  ;;  %3325 = vmatmul.msk.f32.gmra.mxu0 %vm246_vm1, %v1368_v34 }
 0x13c   : > { %v922_v42 = vpop.f32.mrf.mxu2 }
 0x13d   : > { %v1006_v41 = vadd.f32 %v922_v42, %v649_v18  ;;  %v1232_v29 = vpop.f32.mrf.mxu3  ;;  %v1061_v18 = vld [vmem:[%s3597_s27 + $0x10a] sm:$0xff] }
 0x13e   : > { %v651_v47 = vpop.f32.mrf.mxu1 }
 0x13f   : > { %v1316_v50 = vadd.f32 %v1232_v29, %v1006_v41  ;;  %v1545_v28 = vpop.f32.mrf.mxu0  ;;  %v652_v25 = vadd.f32 %v651_v47, %v3798_v32  ;;  %v1371_v41 = vld [vmem:[%s3597_s27 + $0x10b] sm:$0xff] }
 0x141   : > { %v4004_v62 = vadd.f32 %v1542_v21, %v1316_v50  ;;  %3212 = vmatmul.msk.f32.gmra.mxu1 %vm246_vm1, %v200_v7  ;;  %3250 = vmatmul.msk.f32.gmra.mxu2 %vm246_vm1, %v1057_v56  ;;  %v202_v21 = vld [vmem:[%s3597_s27 + $0xf8] sm:$0xff] }
 0x142   : > { %3288 = vmatmul.msk.f32.gmra.mxu3 %vm246_vm1, %v1059_v4  ;;  %3326 = vmatmul.msk.f32.gmra.mxu0 %vm246_vm1, %v1369_v57 }
 0x144   : > { %v925_v49 = vpop.f32.mrf.mxu2 }
 0x145   : > { %v1007_v0 = vadd.f32 %v925_v49, %v652_v25  ;;  %v1235_v54 = vpop.f32.mrf.mxu3  ;;  %v1062_v25 = vld [vmem:[%s3597_s27 + $0x112] sm:$0xff] }
 0x146   : > { %v654_v5 = vpop.f32.mrf.mxu1 }
 0x147   : > { %v1317_v12 = vadd.f32 %v1235_v54, %v1007_v0  ;;  %v1548_v35 = vpop.f32.mrf.mxu0  ;;  %v655_v32 = vadd.f32 %v654_v5, %v3813_v39  ;;  %v1372_v0 = vld [vmem:[%s3597_s27 + $0x113] sm:$0xff] }
 0x149   : > { %v4014_v6 = vadd.f32 %v1545_v28, %v1317_v12  ;;  %3213 = vmatmul.msk.f32.gmra.mxu1 %vm246_vm1, %v201_v14  ;;  %3251 = vmatmul.msk.f32.gmra.mxu2 %vm246_vm1, %v1058_v63  ;;  %v203_v28 = vld [vmem:[%s3597_s27 + $0x100] sm:$0xff] }
 0x14a   : > { %3289 = vmatmul.msk.f32.gmra.mxu3 %vm246_vm1, %v1060_v11  ;;  %3327 = vmatmul.msk.f32.gmra.mxu0 %vm246_vm1, %v1370_v19 }
 0x14c   : > { %v928_v56 = vpop.f32.mrf.mxu2 }
 0x14d   : > { %v1008_v22 = vadd.f32 %v928_v56, %v655_v32  ;;  %v1238_v13 = vpop.f32.mrf.mxu3  ;;  %v1063_v32 = vld [vmem:[%s3597_s27 + $0x11a] sm:$0xff] }
 0x14e   : > { %v657_v27 = vpop.f32.mrf.mxu1 }
 0x14f   : > { %v1318_v34 = vadd.f32 %v1238_v13, %v1008_v22  ;;  %v1551_v42 = vpop.f32.mrf.mxu0  ;;  %v658_v39 = vadd.f32 %v657_v27, %v3828_v46  ;;  %v1373_v22 = vld [vmem:[%s3597_s27 + $0x11b] sm:$0xff] }
 0x151   : > { %v4024_v29 = vadd.f32 %v1548_v35, %v1318_v34  ;;  %3214 = vmatmul.msk.f32.gmra.mxu1 %vm246_vm1, %v202_v21  ;;  %3252 = vmatmul.msk.f32.gmra.mxu2 %vm246_vm1, %v1059_v4  ;;  %v204_v35 = vld [vmem:[%s3597_s27 + $0x108] sm:$0xff] }
 0x152   : > { %3290 = vmatmul.msk.f32.gmra.mxu3 %vm246_vm1, %v1061_v18  ;;  %3328 = vmatmul.msk.f32.gmra.mxu0 %vm246_vm1, %v1371_v41 }
 0x154   : > { %v931_v63 = vpop.f32.mrf.mxu2 }
 0x155   : > { %v1009_v47 = vadd.f32 %v931_v63, %v658_v39  ;;  %v1241_v7 = vpop.f32.mrf.mxu3  ;;  %v1064_v39 = vld [vmem:[%s3597_s27 + $0x122] sm:$0xff] }
 0x156   : > { %v660_v50 = vpop.f32.mrf.mxu1 }
 0x157   : > { %v1319_v57 = vadd.f32 %v1241_v7, %v1009_v47  ;;  %v1554_v49 = vpop.f32.mrf.mxu0  ;;  %v661_v46 = vadd.f32 %v660_v50, %v3843_v53  ;;  %v1374_v47 = vld [vmem:[%s3597_s27 + $0x123] sm:$0xff] }
 0x159   : > { %v4034_v54 = vadd.f32 %v1551_v42, %v1319_v57  ;;  %3215 = vmatmul.msk.f32.gmra.mxu1 %vm246_vm1, %v203_v28  ;;  %3253 = vmatmul.msk.f32.gmra.mxu2 %vm246_vm1, %v1060_v11  ;;  %v205_v42 = vld [vmem:[%s3597_s27 + $0x110] sm:$0xff] }
 0x15a   : > { %3291 = vmatmul.msk.f32.gmra.mxu3 %vm246_vm1, %v1062_v25  ;;  %3329 = vmatmul.msk.f32.gmra.mxu0 %vm246_vm1, %v1372_v0 }
 0x15c   : > { %v934_v4 = vpop.f32.mrf.mxu2 }
 0x15d   : > { %v1010_v5 = vadd.f32 %v934_v4, %v661_v46  ;;  %v1244_v14 = vpop.f32.mrf.mxu3  ;;  %v1065_v46 = vld [vmem:[%s3597_s27 + $0x12a] sm:$0xff] }
 0x15e   : > { %v663_v12 = vpop.f32.mrf.mxu1 }
 0x15f   : > { %v1320_v19 = vadd.f32 %v1244_v14, %v1010_v5  ;;  %v1557_v56 = vpop.f32.mrf.mxu0  ;;  %v664_v53 = vadd.f32 %v663_v12, %v3858_v60  ;;  %v1375_v5 = vld [vmem:[%s3597_s27 + $0x12b] sm:$0xff] }
 0x161   : > { %v4044_v13 = vadd.f32 %v1554_v49, %v1320_v19  ;;  %3216 = vmatmul.msk.f32.gmra.mxu1 %vm246_vm1, %v204_v35  ;;  %3254 = vmatmul.msk.f32.gmra.mxu2 %vm246_vm1, %v1061_v18  ;;  %v206_v49 = vld [vmem:[%s3597_s27 + $0x118] sm:$0xff] }
 0x162   : > { %3292 = vmatmul.msk.f32.gmra.mxu3 %vm246_vm1, %v1063_v32  ;;  %3330 = vmatmul.msk.f32.gmra.mxu0 %vm246_vm1, %v1373_v22  ;;  %v1960_v22 = vld [vmem:[%s3597_s27 + $0x24] sm:$0xff] }
 0x164   : > { %v937_v11 = vpop.f32.mrf.mxu2 }
 0x165   : > { %v1011_v27 = vadd.f32 %v937_v11, %v664_v53  ;;  %v1247_v21 = vpop.f32.mrf.mxu3  ;;  %v2270_v11 = vld [vmem:[%s3597_s27 + $0x25] sm:$0xff] }
 0x166   : > { %v666_v34 = vpop.f32.mrf.mxu1 }
 0x167   : > { %v1321_v41 = vadd.f32 %v1247_v21, %v1011_v27  ;;  %v1560_v63 = vpop.f32.mrf.mxu0  ;;  %v667_v60 = vadd.f32 %v666_v34, %v3749_v9  ;;  %v2580_v21 = vld [vmem:[%s3597_s27 + $0x26] sm:$0xff] }
 0x169   : > { %v4054_v7 = vadd.f32 %v1557_v56, %v1321_v41  ;;  %3217 = vmatmul.msk.f32.gmra.mxu1 %vm246_vm1, %v205_v42  ;;  %3255 = vmatmul.msk.f32.gmra.mxu2 %vm246_vm1, %v1062_v25  ;;  %v1650_v56 = vld [vmem:[%s3597_s27 + $0x14] sm:$0xff] }
 0x16a   : > { %3293 = vmatmul.msk.f32.gmra.mxu3 %vm246_vm1, %v1064_v39  ;;  %3331 = vmatmul.msk.f32.gmra.mxu0 %vm246_vm1, %v1374_v47  ;;  %v1961_v47 = vld [vmem:[%s3597_s27 + $0x2c] sm:$0xff] }
 0x16c   : > { %v940_v18 = vpop.f32.mrf.mxu2 }
 0x16d   : > { %v1012_v50 = vadd.f32 %v940_v18, %v667_v60  ;;  %v1250_v28 = vpop.f32.mrf.mxu3  ;;  %v2271_v18 = vld [vmem:[%s3597_s27 + $0x2d] sm:$0xff] }
 0x16e   : > { %v669_v57 = vpop.f32.mrf.mxu1 }
 0x16f   : > { %v1322_v0 = vadd.f32 %v1250_v28, %v1012_v50  ;;  %v1563_v4 = vpop.f32.mrf.mxu0  ;;  %v670_v9 = vadd.f32 %v669_v57, %v3764_v16  ;;  %v2581_v28 = vld [vmem:[%s3597_s27 + $0x2e] sm:$0xff] }
 0x171   : > { %v4064_v25 = vadd.f32 %v1560_v63, %v1322_v0  ;;  %3218 = vmatmul.msk.f32.gmra.mxu1 %vm246_vm1, %v206_v49  ;;  %3256 = vmatmul.msk.f32.gmra.mxu2 %vm246_vm1, %v1063_v32  ;;  %v1651_v63 = vld [vmem:[%s3597_s27 + $0x1c] sm:$0xff] }
 0x172   : > { %3294 = vmatmul.msk.f32.gmra.mxu3 %vm246_vm1, %v1065_v46  ;;  %3332 = vmatmul.msk.f32.gmra.mxu0 %vm246_vm1, %v1375_v5  ;;  %v1962_v5 = vld [vmem:[%s3597_s27 + $0x34] sm:$0xff] }
 0x174   : > { %v943_v14 = vpop.f32.mrf.mxu2 }
 0x175   : > { %v1013_v12 = vadd.f32 %v943_v14, %v670_v9  ;;  %v1253_v35 = vpop.f32.mrf.mxu3  ;;  %v2272_v14 = vld [vmem:[%s3597_s27 + $0x35] sm:$0xff] }
 0x176   : > { %v672_v19 = vpop.f32.mrf.mxu1 }
 0x177   : > { %v1323_v53 = vadd.f32 %v1253_v35, %v1013_v12  ;;  %v1566_v27 = vpop.f32.mrf.mxu0  ;;  %v673_v16 = vadd.f32 %v672_v19, %v3779_v23  ;;  %v2582_v35 = vld [vmem:[%s3597_s27 + $0x36] sm:$0xff] }
 0x179   : > { %v4075_v32 = vadd.f32 %v1563_v4, %v1323_v53  ;;  %3335 = vmatmul.msk.f32.vlgmr.msra.gmra.mxu1 %vm246_vm1, %v1650_v56  ;;  %3373 = vmatmul.msk.f32.vlgmr.msra.gmra.mxu2 %vm246_vm1, %v1960_v22 }
 0x17a   : > { %3411 = vmatmul.msk.f32.vlgmr.msra.gmra.mxu3 %vm246_vm1, %v2270_v11  ;;  %3449 = vmatmul.msk.f32.vlgmr.msra.gmra.mxu0 %vm246_vm1, %v2580_v21  ;;  %v1963_v21 = vld [vmem:[%s3597_s27 + $0x3c] sm:$0xff] }
 0x17c   : > { %v946_v34 = vpop.f32.mrf.mxu2 }
 0x17d   : > { %v1014_v42 = vadd.f32 %v946_v34, %v673_v16  ;;  %v1256_v41 = vpop.f32.mrf.mxu3  ;;  %v2273_v34 = vld [vmem:[%s3597_s27 + $0x3d] sm:$0xff] }
 0x17e   : > { %v675_v39 = vpop.f32.mrf.mxu1 }
 0x17f   : > { %v1324_v60 = vadd.f32 %v1256_v41, %v1014_v42  ;;  %v1569_v50 = vpop.f32.mrf.mxu0  ;;  %v676_v23 = vadd.f32 %v675_v39, %v3794_v30 }
 0x181   : > { %v4086_v57 = vadd.f32 %v1566_v27, %v1324_v60  ;;  %3336 = vmatmul.msk.f32.gmra.mxu1 %vm246_vm1, %v1651_v63  ;;  %3374 = vmatmul.msk.f32.gmra.mxu2 %vm246_vm1, %v1961_v47 }
 0x182   : > { %3412 = vmatmul.msk.f32.gmra.mxu3 %vm246_vm1, %v2271_v18  ;;  %3450 = vmatmul.msk.f32.gmra.mxu0 %vm246_vm1, %v2581_v28 }
 0x184   : > { %v949_v49 = vpop.f32.mrf.mxu2 }
 0x185   : > { %v1015_v0 = vadd.f32 %v949_v49, %v676_v23  ;;  %v1259_v46 = vpop.f32.mrf.mxu3  ;;  %v2274_v23 = vld [vmem:[%s3597_s27 + $0x45] sm:$0xff] }
 0x186   : > { %v678_v4 = vpop.f32.mrf.mxu1 }
 0x187   : > { %v1325_v9 = vadd.f32 %v1259_v46, %v1015_v0  ;;  %v1572_v12 = vpop.f32.mrf.mxu0  ;;  %v679_v30 = vadd.f32 %v678_v4, %v3809_v37 }
 0x189   : > { %v4096_v19 = vadd.f32 %v1569_v50, %v1325_v9  ;;  %3337 = vmatmul.msk.f32.gmra.mxu1 %vm246_vm1, %v1960_v22  ;;  %3375 = vmatmul.msk.f32.gmra.mxu2 %vm246_vm1, %v1962_v5  ;;  %v2583_v22 = vld [vmem:[%s3597_s27 + $0x3e] sm:$0xff] }
 0x18a   : > { %3413 = vmatmul.msk.f32.gmra.mxu3 %vm246_vm1, %v2272_v14  ;;  %3451 = vmatmul.msk.f32.gmra.mxu0 %vm246_vm1, %v2582_v35  ;;  %v1964_v50 = vld [vmem:[%s3597_s27 + $0x44] sm:$0xff] }
 0x18c   : > { %v952_v56 = vpop.f32.mrf.mxu2 }
 0x18d   : > { %v1016_v53 = vadd.f32 %v952_v56, %v679_v30  ;;  %v1262_v11 = vpop.f32.mrf.mxu3  ;;  %v2275_v30 = vld [vmem:[%s3597_s27 + $0x4d] sm:$0xff] }
 0x18e   : > { %v681_v27 = vpop.f32.mrf.mxu1 }
 0x18f   : > { %v1326_v16 = vadd.f32 %v1262_v11, %v1016_v53  ;;  %v1575_v42 = vpop.f32.mrf.mxu0  ;;  %v682_v37 = vadd.f32 %v681_v27, %v3824_v44 }
 0x191   : > { %v4106_v41 = vadd.f32 %v1572_v12, %v1326_v16  ;;  %3338 = vmatmul.msk.f32.gmra.mxu1 %vm246_vm1, %v1961_v47  ;;  %3376 = vmatmul.msk.f32.gmra.mxu2 %vm246_vm1, %v1963_v21  ;;  %v2584_v47 = vld [vmem:[%s3597_s27 + $0x46] sm:$0xff] }
 0x192   : > { %3414 = vmatmul.msk.f32.gmra.mxu3 %vm246_vm1, %v2273_v34  ;;  %3452 = vmatmul.msk.f32.gmra.mxu0 %vm246_vm1, %v2583_v22  ;;  %v1965_v12 = vld [vmem:[%s3597_s27 + $0x4c] sm:$0xff] }
 0x194   : > { %v955_v39 = vpop.f32.mrf.mxu2 }
 0x195   : > { %v1017_v63 = vadd.f32 %v955_v39, %v682_v37  ;;  %v1265_v60 = vpop.f32.mrf.mxu3  ;;  %v2276_v37 = vld [vmem:[%s3597_s27 + $0x55] sm:$0xff] }
 0x196   : > { %v684_v18 = vpop.f32.mrf.mxu1 }
 0x197   : > { %v1327_v28 = vadd.f32 %v1265_v60, %v1017_v63  ;;  %v1578_v49 = vpop.f32.mrf.mxu0  ;;  %v685_v44 = vadd.f32 %v684_v18, %v3839_v51 }
 0x199   : > { %v4116_v0 = vadd.f32 %v1575_v42, %v1327_v28  ;;  %3339 = vmatmul.msk.f32.gmra.mxu1 %vm246_vm1, %v1962_v5  ;;  %3377 = vmatmul.msk.f32.gmra.mxu2 %vm246_vm1, %v1964_v50  ;;  %v2585_v5 = vld [vmem:[%s3597_s27 + $0x4e] sm:$0xff] }
 0x19a   : > { %3415 = vmatmul.msk.f32.gmra.mxu3 %vm246_vm1, %v2274_v23  ;;  %3453 = vmatmul.msk.f32.gmra.mxu0 %vm246_vm1, %v2584_v47  ;;  %v1966_v42 = vld [vmem:[%s3597_s27 + $0x54] sm:$0xff] }
 0x19c   : > { %v958_v46 = vpop.f32.mrf.mxu2 }
 0x19d   : > { %v1018_v4 = vadd.f32 %v958_v46, %v685_v44  ;;  %v1268_v9 = vpop.f32.mrf.mxu3  ;;  %v2277_v44 = vld [vmem:[%s3597_s27 + $0x5d] sm:$0xff] }
 0x19e   : > { %v687_v14 = vpop.f32.mrf.mxu1 }
 0x19f   : > { %v1328_v35 = vadd.f32 %v1268_v9, %v1018_v4  ;;  %v1581_v56 = vpop.f32.mrf.mxu0  ;;  %v688_v51 = vadd.f32 %v687_v14, %v3854_v58 }
 0x1a1   : > { %v4126_v53 = vadd.f32 %v1578_v49, %v1328_v35  ;;  %3340 = vmatmul.msk.f32.gmra.mxu1 %vm246_vm1, %v1963_v21  ;;  %3378 = vmatmul.msk.f32.gmra.mxu2 %vm246_vm1, %v1965_v12  ;;  %v2586_v21 = vld [vmem:[%s3597_s27 + $0x56] sm:$0xff] }
 0x1a2   : > { %3416 = vmatmul.msk.f32.gmra.mxu3 %vm246_vm1, %v2275_v30  ;;  %3454 = vmatmul.msk.f32.gmra.mxu0 %vm246_vm1, %v2585_v5  ;;  %v1967_v49 = vld [vmem:[%s3597_s27 + $0x5c] sm:$0xff] }
 0x1a4   : > { %v961_v11 = vpop.f32.mrf.mxu2 }
 0x1a5   : > { %v1019_v27 = vadd.f32 %v961_v11, %v688_v51  ;;  %v1271_v16 = vpop.f32.mrf.mxu3  ;;  %v2278_v51 = vld [vmem:[%s3597_s27 + $0x65] sm:$0xff] }
 0x1a6   : > { %v690_v34 = vpop.f32.mrf.mxu1 }
 0x1a7   : > { %v1329_v22 = vadd.f32 %v1271_v16, %v1019_v27  ;;  %v1584_v39 = vpop.f32.mrf.mxu0  ;;  %v691_v58 = vadd.f32 %v690_v34, %v3869_v1 }
 0x1a9   : > { %v4136_v63 = vadd.f32 %v1581_v56, %v1329_v22  ;;  %3341 = vmatmul.msk.f32.gmra.mxu1 %vm246_vm1, %v1964_v50  ;;  %3379 = vmatmul.msk.f32.gmra.mxu2 %vm246_vm1, %v1966_v42  ;;  %v2587_v50 = vld [vmem:[%s3597_s27 + $0x5e] sm:$0xff] }
 0x1aa   : > { %3417 = vmatmul.msk.f32.gmra.mxu3 %vm246_vm1, %v2276_v37  ;;  %3455 = vmatmul.msk.f32.gmra.mxu0 %vm246_vm1, %v2586_v21  ;;  %v1968_v56 = vld [vmem:[%s3597_s27 + $0x64] sm:$0xff] }
 0x1ac   : > { %v964_v60 = vpop.f32.mrf.mxu2 }
 0x1ad   : > { %v1020_v18 = vadd.f32 %v964_v60, %v691_v58  ;;  %v1274_v28 = vpop.f32.mrf.mxu3  ;;  %v2279_v58 = vld [vmem:[%s3597_s27 + $0x6d] sm:$0xff] }
 0x1ae   : > { %v693_v23 = vpop.f32.mrf.mxu1 }
 0x1af   : > { %v1330_v47 = vadd.f32 %v1274_v28, %v1020_v18  ;;  %v1587_v46 = vpop.f32.mrf.mxu0  ;;  %v694_v1 = vadd.f32 %v693_v23, %v3751_v10 }
 0x1b1   : > { %v4146_v4 = vadd.f32 %v1584_v39, %v1330_v47  ;;  %3342 = vmatmul.msk.f32.gmra.mxu1 %vm246_vm1, %v1965_v12  ;;  %3380 = vmatmul.msk.f32.gmra.mxu2 %vm246_vm1, %v1967_v49  ;;  %v2588_v12 = vld [vmem:[%s3597_s27 + $0x66] sm:$0xff] }
 0x1b2   : > { %3418 = vmatmul.msk.f32.gmra.mxu3 %vm246_vm1, %v2277_v44  ;;  %3456 = vmatmul.msk.f32.gmra.mxu0 %vm246_vm1, %v2587_v50  ;;  %v1969_v39 = vld [vmem:[%s3597_s27 + $0x6c] sm:$0xff] }
 0x1b4   : > { %v967_v9 = vpop.f32.mrf.mxu2 }
 0x1b5   : > { %v1021_v14 = vadd.f32 %v967_v9, %v694_v1  ;;  %v1277_v35 = vpop.f32.mrf.mxu3  ;;  %v2280_v1 = vld [vmem:[%s3597_s27 + $0x75] sm:$0xff] }
 0x1b6   : > { %v696_v30 = vpop.f32.mrf.mxu1 }
 0x1b7   : > { %v1331_v5 = vadd.f32 %v1277_v35, %v1021_v14  ;;  %v1590_v11 = vpop.f32.mrf.mxu0  ;;  %v697_v10 = vadd.f32 %v696_v30, %v3766_v17 }
 0x1b9   : > { %v4156_v27 = vadd.f32 %v1587_v46, %v1331_v5  ;;  %3343 = vmatmul.msk.f32.gmra.mxu1 %vm246_vm1, %v1966_v42  ;;  %3381 = vmatmul.msk.f32.gmra.mxu2 %vm246_vm1, %v1968_v56  ;;  %v2589_v42 = vld [vmem:[%s3597_s27 + $0x6e] sm:$0xff] }
 0x1ba   : > { %3419 = vmatmul.msk.f32.gmra.mxu3 %vm246_vm1, %v2278_v51  ;;  %3457 = vmatmul.msk.f32.gmra.mxu0 %vm246_vm1, %v2588_v12  ;;  %v1970_v46 = vld [vmem:[%s3597_s27 + $0x74] sm:$0xff] }
 0x1bc   : > { %v970_v16 = vpop.f32.mrf.mxu2 }
 0x1bd   : > { %v1022_v34 = vadd.f32 %v970_v16, %v697_v10  ;;  %v1280_v22 = vpop.f32.mrf.mxu3  ;;  %v2281_v10 = vld [vmem:[%s3597_s27 + $0x7d] sm:$0xff] }
 0x1be   : > { %v699_v37 = vpop.f32.mrf.mxu1 }
 0x1bf   : > { %v1332_v21 = vadd.f32 %v1280_v22, %v1022_v34  ;;  %v1593_v60 = vpop.f32.mrf.mxu0  ;;  %v700_v17 = vadd.f32 %v699_v37, %v3781_v24 }
 0x1c1   : > { %v4166_v18 = vadd.f32 %v1590_v11, %v1332_v21  ;;  %3344 = vmatmul.msk.f32.gmra.mxu1 %vm246_vm1, %v1967_v49  ;;  %3382 = vmatmul.msk.f32.gmra.mxu2 %vm246_vm1, %v1969_v39  ;;  %v2590_v49 = vld [vmem:[%s3597_s27 + $0x76] sm:$0xff] }
 0x1c2   : > { %3420 = vmatmul.msk.f32.gmra.mxu3 %vm246_vm1, %v2279_v58  ;;  %3458 = vmatmul.msk.f32.gmra.mxu0 %vm246_vm1, %v2589_v42  ;;  %v1971_v11 = vld [vmem:[%s3597_s27 + $0x7c] sm:$0xff] }
 0x1c4   : > { %v973_v28 = vpop.f32.mrf.mxu2 }
 0x1c5   : > { %v1023_v23 = vadd.f32 %v973_v28, %v700_v17  ;;  %v1283_v47 = vpop.f32.mrf.mxu3  ;;  %v2282_v17 = vld [vmem:[%s3597_s27 + $0x85] sm:$0xff] }
 0x1c6   : > { %v702_v44 = vpop.f32.mrf.mxu1 }
 0x1c7   : > { %v1333_v50 = vadd.f32 %v1283_v47, %v1023_v23  ;;  %v1596_v9 = vpop.f32.mrf.mxu0  ;;  %v703_v24 = vadd.f32 %v702_v44, %v3796_v31 }
 0x1c9   : > { %v4176_v14 = vadd.f32 %v1593_v60, %v1333_v50  ;;  %3345 = vmatmul.msk.f32.gmra.mxu1 %vm246_vm1, %v1968_v56  ;;  %3383 = vmatmul.msk.f32.gmra.mxu2 %vm246_vm1, %v1970_v46  ;;  %v2591_v56 = vld [vmem:[%s3597_s27 + $0x7e] sm:$0xff] }
 0x1ca   : > { %3421 = vmatmul.msk.f32.gmra.mxu3 %vm246_vm1, %v2280_v1  ;;  %3459 = vmatmul.msk.f32.gmra.mxu0 %vm246_vm1, %v2590_v49  ;;  %v1972_v60 = vld [vmem:[%s3597_s27 + $0x84] sm:$0xff] }
 0x1cc   : > { %v976_v35 = vpop.f32.mrf.mxu2 }
 0x1cd   : > { %v1024_v30 = vadd.f32 %v976_v35, %v703_v24  ;;  %v1286_v5 = vpop.f32.mrf.mxu3  ;;  %v2283_v24 = vld [vmem:[%s3597_s27 + $0x8d] sm:$0xff] }
 0x1ce   : > { %v705_v51 = vpop.f32.mrf.mxu1 }
 0x1cf   : > { %v1334_v12 = vadd.f32 %v1286_v5, %v1024_v30  ;;  %v1599_v16 = vpop.f32.mrf.mxu0  ;;  %v706_v31 = vadd.f32 %v705_v51, %v3811_v38 }
 0x1d1   : > { %v4186_v34 = vadd.f32 %v1596_v9, %v1334_v12  ;;  %3346 = vmatmul.msk.f32.gmra.mxu1 %vm246_vm1, %v1969_v39  ;;  %3384 = vmatmul.msk.f32.gmra.mxu2 %vm246_vm1, %v1971_v11  ;;  %v2592_v39 = vld [vmem:[%s3597_s27 + $0x86] sm:$0xff] }
 0x1d2   : > { %3422 = vmatmul.msk.f32.gmra.mxu3 %vm246_vm1, %v2281_v10  ;;  %3460 = vmatmul.msk.f32.gmra.mxu0 %vm246_vm1, %v2591_v56  ;;  %v1973_v9 = vld [vmem:[%s3597_s27 + $0x8c] sm:$0xff] }
 0x1d4   : > { %v979_v22 = vpop.f32.mrf.mxu2 }
 0x1d5   : > { %v1025_v37 = vadd.f32 %v979_v22, %v706_v31  ;;  %v1289_v21 = vpop.f32.mrf.mxu3  ;;  %v2284_v31 = vld [vmem:[%s3597_s27 + $0x95] sm:$0xff] }
 0x1d6   : > { %v708_v58 = vpop.f32.mrf.mxu1 }
 0x1d7   : > { %v1335_v42 = vadd.f32 %v1289_v21, %v1025_v37  ;;  %v1602_v28 = vpop.f32.mrf.mxu0  ;;  %v709_v38 = vadd.f32 %v708_v58, %v3826_v45 }
 0x1d9   : > { %v4196_v23 = vadd.f32 %v1599_v16, %v1335_v42  ;;  %3347 = vmatmul.msk.f32.gmra.mxu1 %vm246_vm1, %v1970_v46  ;;  %3385 = vmatmul.msk.f32.gmra.mxu2 %vm246_vm1, %v1972_v60  ;;  %v2593_v46 = vld [vmem:[%s3597_s27 + $0x8e] sm:$0xff] }
 0x1da   : > { %3423 = vmatmul.msk.f32.gmra.mxu3 %vm246_vm1, %v2282_v17  ;;  %3461 = vmatmul.msk.f32.gmra.mxu0 %vm246_vm1, %v2592_v39  ;;  %v1974_v16 = vld [vmem:[%s3597_s27 + $0x94] sm:$0xff] }
 0x1dc   : > { %v982_v47 = vpop.f32.mrf.mxu2 }
 0x1dd   : > { %v1026_v44 = vadd.f32 %v982_v47, %v709_v38  ;;  %v1292_v50 = vpop.f32.mrf.mxu3  ;;  %v2285_v38 = vld [vmem:[%s3597_s27 + $0x9d] sm:$0xff] }
 0x1de   : > { %v711_v1 = vpop.f32.mrf.mxu1 }
 0x1df   : > { %v1336_v49 = vadd.f32 %v1292_v50, %v1026_v44  ;;  %v1605_v35 = vpop.f32.mrf.mxu0  ;;  %v712_v45 = vadd.f32 %v711_v1, %v3841_v52 }
 0x1e1   : > { %v4206_v30 = vadd.f32 %v1602_v28, %v1336_v49  ;;  %3348 = vmatmul.msk.f32.gmra.mxu1 %vm246_vm1, %v1971_v11  ;;  %3386 = vmatmul.msk.f32.gmra.mxu2 %vm246_vm1, %v1973_v9  ;;  %v2594_v11 = vld [vmem:[%s3597_s27 + $0x96] sm:$0xff] }
 0x1e2   : > { %3424 = vmatmul.msk.f32.gmra.mxu3 %vm246_vm1, %v2283_v24  ;;  %3462 = vmatmul.msk.f32.gmra.mxu0 %vm246_vm1, %v2593_v46  ;;  %v1975_v28 = vld [vmem:[%s3597_s27 + $0x9c] sm:$0xff] }
 0x1e4   : > { %v985_v5 = vpop.f32.mrf.mxu2 }
 0x1e5   : > { %v1027_v51 = vadd.f32 %v985_v5, %v712_v45  ;;  %v1295_v12 = vpop.f32.mrf.mxu3  ;;  %v2286_v45 = vld [vmem:[%s3597_s27 + $0xa5] sm:$0xff] }
 0x1e6   : > { %v714_v10 = vpop.f32.mrf.mxu1 }
 0x1e7   : > { %v1337_v56 = vadd.f32 %v1295_v12, %v1027_v51  ;;  %v1608_v22 = vpop.f32.mrf.mxu0  ;;  %v715_v52 = vadd.f32 %v714_v10, %v3856_v59  ;;  %v2596_v51 = vld [vmem:[%s3597_s27 + $0xa6] sm:$0xff] }
 0x1e9   : > { %v4216_v37 = vadd.f32 %v1605_v35, %v1337_v56  ;;  %3349 = vmatmul.msk.f32.gmra.mxu1 %vm246_vm1, %v1972_v60  ;;  %3387 = vmatmul.msk.f32.gmra.mxu2 %vm246_vm1, %v1974_v16  ;;  %v2595_v60 = vld [vmem:[%s3597_s27 + $0x9e] sm:$0xff] }
 0x1ea   : > { %3425 = vmatmul.msk.f32.gmra.mxu3 %vm246_vm1, %v2284_v31  ;;  %3463 = vmatmul.msk.f32.gmra.mxu0 %vm246_vm1, %v2594_v11  ;;  %v1976_v35 = vld [vmem:[%s3597_s27 + $0xa4] sm:$0xff] }
 0x1ec   : > { %v988_v21 = vpop.f32.mrf.mxu2 }
 0x1ed   : > { %v1028_v58 = vadd.f32 %v988_v21, %v715_v52  ;;  %v1298_v42 = vpop.f32.mrf.mxu3  ;;  %v4247_v52 = vld [vmem:[%s4560_s2] ss:$0 sm:$0xff] }
 0x1ee   : > { %v717_v17 = vpop.f32.mrf.mxu1 }
 0x1ef   : > { %v1338_v39 = vadd.f32 %v1298_v42, %v1028_v58  ;;  %v1611_v47 = vpop.f32.mrf.mxu0  ;;  %v718_v59 = vadd.f32 %v717_v17, %v3871_v2  ;;  %v2597_v58 = vld [vmem:[%s3597_s27 + $0xae] sm:$0xff] }
 0x1f1   : > { %v4226_v44 = vadd.f32 %v1608_v22, %v1338_v39  ;;  %3350 = vmatmul.msk.f32.gmra.mxu1 %vm246_vm1, %v1973_v9  ;;  %3388 = vmatmul.msk.f32.gmra.mxu2 %vm246_vm1, %v1975_v28  ;;  %v1977_v22 = vld [vmem:[%s3597_s27 + $0xac] sm:$0xff] }
 0x1f2   : > { %3426 = vmatmul.msk.f32.gmra.mxu3 %vm246_vm1, %v2285_v38  ;;  %3464 = vmatmul.msk.f32.gmra.mxu0 %vm246_vm1, %v2595_v60 }
 0x1f4   : > { %v991_v50 = vpop.f32.mrf.mxu2 }
 0x1f5   : > { %v1029_v1 = vadd.f32 %v991_v50, %v718_v59  ;;  %v1301_v49 = vpop.f32.mrf.mxu3  ;;  %v1978_v50 = vld [vmem:[%s3597_s27 + $0xb4] sm:$0xff] }
 0x1f6   : > { %v1816_v24 = vpop.f32.mrf.mxu1 }
 0x1f7   : > { %v1339_v46 = vadd.f32 %v1301_v49, %v1029_v1  ;;  %v2746_v5 = vpop.f32.mrf.mxu0  ;;  %v1924_v2 = vadd.f32 %v1816_v24, %v3884_v36  ;;  %v2288_v1 = vld [vmem:[%s3597_s27 + $0xb5] sm:$0xff] }
 0x1f8   : > { %v2598_v24 = vld [vmem:[%s3597_s27 + $0xb6] sm:$0xff] }
 0x1f9   : > { %v4236_v9 = vadd.f32 %v1611_v47, %v1339_v46  ;;  %3351 = vmatmul.msk.f32.gmra.mxu1 %vm246_vm1, %v1974_v16  ;;  %3389 = vmatmul.msk.f32.gmra.mxu2 %vm246_vm1, %v1976_v35  ;;  %v2287_v16 = vld [vmem:[%s3597_s27 + $0xad] sm:$0xff] }
 0x1fa   : > { %3427 = vmatmul.msk.f32.gmra.mxu3 %vm246_vm1, %v2286_v45  ;;  %3465 = vmatmul.msk.f32.gmra.mxu0 %vm246_vm1, %v2596_v51 }
 0x1fc   : > { %v2126_v12 = vpop.f32.mrf.mxu2 }
 0x1fd   : > { %v2234_v10 = vadd.f32 %v2126_v12, %v1924_v2  ;;  %v2436_v56 = vpop.f32.mrf.mxu3 }
 0x1fe   : > { %v1819_v31 = vpop.f32.mrf.mxu1 }
 0x1ff   : > { %v2544_v11 = vadd.f32 %v2436_v56, %v2234_v10  ;;  %v2749_v21 = vpop.f32.mrf.mxu0  ;;  %v1925_v36 = vadd.f32 %v1819_v31, %v3894_v61  ;;  %v1979_v56 = vld [vmem:[%s3597_s27 + $0xbc] sm:$0xff] }
 0x201   : > { %v2854_v42 = vadd.f32 %v2746_v5, %v2544_v11  ;;  %3352 = vmatmul.msk.f32.gmra.mxu1 %vm246_vm1, %v1975_v28  ;;  %3390 = vmatmul.msk.f32.gmra.mxu2 %vm246_vm1, %v1977_v22  ;;  %v2289_v11 = vld [vmem:[%s3597_s27 + $0xbd] sm:$0xff] }
 0x202   : > { %3428 = vmatmul.msk.f32.gmra.mxu3 %vm246_vm1, %v2287_v16  ;;  %3466 = vmatmul.msk.f32.gmra.mxu0 %vm246_vm1, %v2597_v58  ;;  %v2599_v16 = vld [vmem:[%s3597_s27 + $0xbe] sm:$0xff] }
 0x203   : > { %v2894_v17 = vadd.f32 %v4247_v52, %v2854_v42 }
 0x204   : > { %v2129_v39 = vpop.f32.mrf.mxu2 }
 0x205   : > { %v2930_v38 = vmax.f32 %v2894_v17, 0.0  ;;  %v2235_v47 = vadd.f32 %v2129_v39, %v1925_v36  ;;  %v2439_v60 = vpop.f32.mrf.mxu3 }
 0x206   : > { %v1822_v59 = vpop.f32.mrf.mxu1 }
 0x207   : > { %2966 = vst.msk [vmem:[#allocation2] sm:$0xff] %vm246_vm1, %v2930_v38  ;;  %v2545_v28 = vadd.f32 %v2439_v60, %v2235_v47  ;;  %v2752_v49 = vpop.f32.mrf.mxu0  ;;  %v1926_v61 = vadd.f32 %v1822_v59, %v3904_v20  ;;  %v1980_v60 = vld [vmem:[%s3597_s27 + $0xc4] sm:$0xff] }
 0x209   : > { %v2855_v46 = vadd.f32 %v2749_v21, %v2545_v28  ;;  %3353 = vmatmul.msk.f32.gmra.mxu1 %vm246_vm1, %v1976_v35  ;;  %3391 = vmatmul.msk.f32.gmra.mxu2 %vm246_vm1, %v1978_v50  ;;  %v2290_v28 = vld [vmem:[%s3597_s27 + $0xc5] sm:$0xff] }
 0x20a   : > { %3429 = vmatmul.msk.f32.gmra.mxu3 %vm246_vm1, %v2288_v1  ;;  %3467 = vmatmul.msk.f32.gmra.mxu0 %vm246_vm1, %v2598_v24 }
 0x20b   : > { %v2895_v45 = vadd.f32 %v4247_v52, %v2855_v46 }
 0x20c   : > { %v2132_v5 = vpop.f32.mrf.mxu2 }
 0x20d   : > { %v2931_v35 = vmax.f32 %v2895_v45, 0.0  ;;  %v2236_v51 = vadd.f32 %v2132_v5, %v1926_v61  ;;  %v2442_v2 = vpop.f32.mrf.mxu3 }
 0x20e   : > { %v3002_v12 = vld [vmem:[#allocation2] sm:$0xff]  ;;  %v1825_v10 = vpop.f32.mrf.mxu1 }
 0x20f   : > { %3004 = vst.msk [vmem:[%s4271_s16] sm:$0xff] %vm246_vm1, %v3002_v12  ;;  %v2546_v31 = vadd.f32 %v2442_v2, %v2236_v51  ;;  %v2755_v20 = vpop.f32.mrf.mxu0  ;;  %v1927_v58 = vadd.f32 %v1825_v10, %v3914_v43  ;;  %v1981_v2 = vld [vmem:[%s3597_s27 + $0xcc] sm:$0xff] }
 0x210   : > { %2967 = vst.msk [vmem:[#allocation2 + $0x8] sm:$0xff] %vm246_vm1, %v2931_v35  ;;  %v2291_v12 = vld [vmem:[%s3597_s27 + $0xcd] sm:$0xff] }
 0x211   : > { %v2856_v21 = vadd.f32 %v2752_v49, %v2546_v31  ;;  %3354 = vmatmul.msk.f32.gmra.mxu1 %vm246_vm1, %v1977_v22  ;;  %3392 = vmatmul.msk.f32.gmra.mxu2 %vm246_vm1, %v1979_v56  ;;  %v2600_v49 = vld [vmem:[%s3597_s27 + $0xc6] sm:$0xff]  ;;  %v2601_v31 = vld [vmem:[%s3597_s27 + $0xce] sm:$0xff] }
 0x212   : > { %3430 = vmatmul.msk.f32.gmra.mxu3 %vm246_vm1, %v2289_v11  ;;  %3468 = vmatmul.msk.f32.gmra.mxu0 %vm246_vm1, %v2599_v16 }
 0x213   : > { %v2896_v42 = vadd.f32 %v4247_v52, %v2856_v21 }
 0x214   : > { %v2135_v36 = vpop.f32.mrf.mxu2 }
 0x215   : > { %v2932_v17 = vmax.f32 %v2896_v42, 0.0  ;;  %v2237_v39 = vadd.f32 %v2135_v36, %v1927_v58  ;;  %v2445_v38 = vpop.f32.mrf.mxu3 }
 0x216   : > { %v1828_v47 = vpop.f32.mrf.mxu1 }
 0x217   : > { %v3003_v59 = vld [vmem:[#allocation2 + $0x8] sm:$0xff]  ;;  %2968 = vst.msk [vmem:[#allocation2 + $0x10] sm:$0xff] %vm246_vm1, %v2932_v17  ;;  %v2547_v22 = vadd.f32 %v2445_v38, %v2237_v39  ;;  %v2758_v1 = vpop.f32.mrf.mxu0  ;;  %v1928_v24 = vadd.f32 %v1828_v47, %v3924_v3  ;;  %v1982_v39 = vld [vmem:[%s3597_s27 + $0xd4] sm:$0xff] }
 0x218   : > { %3005 = vst.msk [vmem:[%s4271_s16 + $0x8] sm:$0xff] %vm246_vm1, %v3003_v59  ;;  %v2292_v38 = vld [vmem:[%s3597_s27 + $0xd5] sm:$0xff] }
 0x219   : > { %v2857_v43 = vadd.f32 %v2755_v20, %v2547_v22  ;;  %3355 = vmatmul.msk.f32.gmra.mxu1 %vm246_vm1, %v1978_v50  ;;  %3393 = vmatmul.msk.f32.gmra.mxu2 %vm246_vm1, %v1980_v60  ;;  %v2602_v59 = vld [vmem:[%s3597_s27 + $0xd6] sm:$0xff] }
 0x21a   : > { %3431 = vmatmul.msk.f32.gmra.mxu3 %vm246_vm1, %v2290_v28  ;;  %3469 = vmatmul.msk.f32.gmra.mxu0 %vm246_vm1, %v2600_v49 }
 0x21b   : > { %v2897_v46 = vadd.f32 %v4247_v52, %v2857_v43 }
 0x21c   : > { %v2138_v61 = vpop.f32.mrf.mxu2 }
 0x21d   : > { %v2933_v45 = vmax.f32 %v2897_v46, 0.0  ;;  %v2238_v5 = vadd.f32 %v2138_v61, %v1928_v24  ;;  %v2448_v35 = vpop.f32.mrf.mxu3  ;;  %v1983_v61 = vld [vmem:[%s3597_s27 + $0xdc] sm:$0xff] }
 0x21e   : > { %v1831_v51 = vpop.f32.mrf.mxu1 }
 0x21f   : > { %2969 = vst.msk [vmem:[#allocation2 + $0x18] sm:$0xff] %vm246_vm1, %v2933_v45  ;;  %v2548_v50 = vadd.f32 %v2448_v35, %v2238_v5  ;;  %v2761_v10 = vpop.f32.mrf.mxu0  ;;  %v1929_v3 = vadd.f32 %v1831_v51, %v3934_v26  ;;  %v2293_v5 = vld [vmem:[%s3597_s27 + $0xdd] sm:$0xff] }
 0x220   : > { %v2603_v51 = vld [vmem:[%s3597_s27 + $0xde] sm:$0xff] }
 0x221   : > { %v2858_v11 = vadd.f32 %v2758_v1, %v2548_v50  ;;  %3356 = vmatmul.msk.f32.gmra.mxu1 %vm246_vm1, %v1979_v56  ;;  %3394 = vmatmul.msk.f32.gmra.mxu2 %vm246_vm1, %v1981_v2 }
 0x222   : > { %3432 = vmatmul.msk.f32.gmra.mxu3 %vm246_vm1, %v2291_v12  ;;  %3470 = vmatmul.msk.f32.gmra.mxu0 %vm246_vm1, %v2601_v31 }
 0x223   : > { %v2898_v20 = vadd.f32 %v4247_v52, %v2858_v11 }
 0x224   : > { %v2141_v16 = vpop.f32.mrf.mxu2 }
 0x225   : > { %v2934_v21 = vmax.f32 %v2898_v20, 0.0  ;;  %v2239_v58 = vadd.f32 %v2141_v16, %v1929_v3  ;;  %v2451_v42 = vpop.f32.mrf.mxu3 }
 0x226   : > { %v3006_v36 = vld [vmem:[#allocation2 + $0x12] sm:$0xff]  ;;  %v1834_v17 = vpop.f32.mrf.mxu1 }
 0x227   : > { %3485 = vst.msk [vmem:[%s4271_s16 + $0x10] sm:$0xff] %vm246_vm1, %v3006_v36  ;;  %v2549_v56 = vadd.f32 %v2451_v42, %v2239_v58  ;;  %v2764_v47 = vpop.f32.mrf.mxu0  ;;  %v1930_v26 = vadd.f32 %v1834_v17, %v3944_v48  ;;  %v2294_v58 = vld [vmem:[%s3597_s27 + $0xe5] sm:$0xff] }
 0x228   : > { %2970 = vst.msk [vmem:[#allocation2 + $0x20] sm:$0xff] %vm246_vm1, %v2934_v21  ;;  %v1984_v21 = vld [vmem:[%s3597_s27 + $0xe4] sm:$0xff] }
 0x229   : > { %v2859_v22 = vadd.f32 %v2761_v10, %v2549_v56  ;;  %3357 = vmatmul.msk.f32.gmra.mxu1 %vm246_vm1, %v1980_v60  ;;  %3395 = vmatmul.msk.f32.gmra.mxu2 %vm246_vm1, %v1982_v39  ;;  %v2604_v36 = vld [vmem:[%s3597_s27 + $0xe6] sm:$0xff] }
 0x22a   : > { %3433 = vmatmul.msk.f32.gmra.mxu3 %vm246_vm1, %v2292_v38  ;;  %3471 = vmatmul.msk.f32.gmra.mxu0 %vm246_vm1, %v2602_v59 }
 0x22b   : > { %v2899_v28 = vadd.f32 %v4247_v52, %v2859_v22 }
 0x22c   : > { %v2144_v1 = vpop.f32.mrf.mxu2 }
 0x22d   : > { %v2935_v49 = vmax.f32 %v2899_v28, 0.0  ;;  %v2240_v43 = vadd.f32 %v2144_v1, %v1930_v26  ;;  %v2454_v24 = vpop.f32.mrf.mxu3  ;;  %v1985_v28 = vld [vmem:[%s3597_s27 + $0xec] sm:$0xff] }
 0x22e   : > { %v1837_v46 = vpop.f32.mrf.mxu1 }
 0x22f   : > { %v3007_v45 = vld [vmem:[#allocation2 + $0x1a] sm:$0xff]  ;;  %2971 = vst.msk [vmem:[#allocation2 + $0x28] sm:$0xff] %vm246_vm1, %v2935_v49  ;;  %v2550_v60 = vadd.f32 %v2454_v24, %v2240_v43  ;;  %v2767_v35 = vpop.f32.mrf.mxu0  ;;  %v1931_v50 = vadd.f32 %v1837_v46, %v3954_v8  ;;  %v2295_v49 = vld [vmem:[%s3597_s27 + $0xed] sm:$0xff] }
 0x230   : > { %3486 = vst.msk [vmem:[%s4271_s16 + $0x18] sm:$0xff] %vm246_vm1, %v3007_v45  ;;  %v2605_v24 = vld [vmem:[%s3597_s27 + $0xee] sm:$0xff] }
 0x231   : > { %v2860_v48 = vadd.f32 %v2764_v47, %v2550_v60  ;;  %3358 = vmatmul.msk.f32.gmra.mxu1 %vm246_vm1, %v1981_v2  ;;  %3396 = vmatmul.msk.f32.gmra.mxu2 %vm246_vm1, %v1983_v61 }
 0x232   : > { %3434 = vmatmul.msk.f32.gmra.mxu3 %vm246_vm1, %v2293_v5  ;;  %3472 = vmatmul.msk.f32.gmra.mxu0 %vm246_vm1, %v2603_v51 }
 0x233   : > { %v2900_v12 = vadd.f32 %v4247_v52, %v2860_v48 }
 0x234   : > { %v2147_v10 = vpop.f32.mrf.mxu2 }
 0x235   : > { %v2936_v31 = vmax.f32 %v2900_v12, 0.0  ;;  %v2241_v11 = vadd.f32 %v2147_v10, %v1931_v50  ;;  %v2457_v3 = vpop.f32.mrf.mxu3  ;;  %v1986_v12 = vld [vmem:[%s3597_s27 + $0xf4] sm:$0xff] }
 0x236   : > { %v3011_v20 = vld [vmem:[#allocation2 + $0x24] sm:$0xff]  ;;  %v1840_v16 = vpop.f32.mrf.mxu1  ;;  %v2296_v10 = vld [vmem:[%s3597_s27 + $0xf5] sm:$0xff] }
 0x237   : > { %3487 = vst.msk [vmem:[%s4271_s16 + $0x20] sm:$0xff] %vm246_vm1, %v3011_v20  ;;  %v2551_v2 = vadd.f32 %v2457_v3, %v2241_v11  ;;  %v2770_v42 = vpop.f32.mrf.mxu0  ;;  %v1932_v8 = vadd.f32 %v1840_v16, %v3964_v33  ;;  %v2606_v11 = vld [vmem:[%s3597_s27 + $0xf6] sm:$0xff] }
 0x238   : > { %2972 = vst.msk [vmem:[#allocation2 + $0x30] sm:$0xff] %vm246_vm1, %v2936_v31 }
 0x239   : > { %v2861_v17 = vadd.f32 %v2767_v35, %v2551_v2  ;;  %3359 = vmatmul.msk.f32.gmra.mxu1 %vm246_vm1, %v1982_v39  ;;  %3397 = vmatmul.msk.f32.gmra.mxu2 %vm246_vm1, %v1984_v21 }
 0x23a   : > { %3435 = vmatmul.msk.f32.gmra.mxu3 %vm246_vm1, %v2294_v58  ;;  %3473 = vmatmul.msk.f32.gmra.mxu0 %vm246_vm1, %v2604_v36 }
 0x23b   : > { %v2901_v56 = vadd.f32 %v4247_v52, %v2861_v17  ;;  %v1987_v17 = vld [vmem:[%s3597_s27 + $0xfc] sm:$0xff] }
 0x23c   : > { %v2150_v38 = vpop.f32.mrf.mxu2 }
 0x23d   : > { %v2937_v47 = vmax.f32 %v2901_v56, 0.0  ;;  %v2242_v59 = vadd.f32 %v2150_v38, %v1932_v8  ;;  %v2460_v22 = vpop.f32.mrf.mxu3  ;;  %v2297_v56 = vld [vmem:[%s3597_s27 + $0xfd] sm:$0xff] }
 0x23e   : > { %v1843_v26 = vpop.f32.mrf.mxu1 }
 0x23f   : > { %v3012_v1 = vld [vmem:[#allocation2 + $0x2c] sm:$0xff]  ;;  %2973 = vst.msk [vmem:[#allocation2 + $0x38] sm:$0xff] %vm246_vm1, %v2937_v47  ;;  %v2552_v39 = vadd.f32 %v2460_v22, %v2242_v59  ;;  %v2773_v43 = vpop.f32.mrf.mxu0  ;;  %v1933_v46 = vadd.f32 %v1843_v26, %v3974_v55  ;;  %v2607_v47 = vld [vmem:[%s3597_s27 + $0xfe] sm:$0xff] }
 0x240   : > { %3488 = vst.msk [vmem:[%s4271_s16 + $0x28] sm:$0xff] %vm246_vm1, %v3012_v1 }
 0x241   : > { %v2862_v33 = vadd.f32 %v2770_v42, %v2552_v39  ;;  %3360 = vmatmul.msk.f32.gmra.mxu1 %vm246_vm1, %v1983_v61  ;;  %3398 = vmatmul.msk.f32.gmra.mxu2 %vm246_vm1, %v1985_v28 }
 0x242   : > { %3436 = vmatmul.msk.f32.gmra.mxu3 %vm246_vm1, %v2295_v49  ;;  %3474 = vmatmul.msk.f32.gmra.mxu0 %vm246_vm1, %v2605_v24 }
 0x243   : > { %v2902_v45 = vadd.f32 %v4247_v52, %v2862_v33  ;;  %v1988_v33 = vld [vmem:[%s3597_s27 + $0x104] sm:$0xff] }
 0x244   : > { %v2153_v60 = vpop.f32.mrf.mxu2 }
 0x245   : > { %v2938_v5 = vmax.f32 %v2902_v45, 0.0  ;;  %v2243_v35 = vadd.f32 %v2153_v60, %v1933_v46  ;;  %v2463_v51 = vpop.f32.mrf.mxu3  ;;  %v2298_v46 = vld [vmem:[%s3597_s27 + $0x105] sm:$0xff] }
 0x246   : > { %v3016_v48 = vld [vmem:[#allocation2 + $0x36] sm:$0xff]  ;;  %v1846_v50 = vpop.f32.mrf.mxu1  ;;  %v2608_v60 = vld [vmem:[%s3597_s27 + $0x106] sm:$0xff] }
 0x247   : > { %3489 = vst.msk [vmem:[%s4271_s16 + $0x30] sm:$0xff] %vm246_vm1, %v3016_v48  ;;  %v2553_v61 = vadd.f32 %v2463_v51, %v2243_v35  ;;  %v2776_v31 = vpop.f32.mrf.mxu0  ;;  %v1934_v55 = vadd.f32 %v1846_v50, %v3984_v15 }
 0x248   : > { %2974 = vst.msk [vmem:[#allocation2 + $0x40] sm:$0xff] %vm246_vm1, %v2938_v5 }
 0x249   : > { %v2863_v3 = vadd.f32 %v2773_v43, %v2553_v61  ;;  %3361 = vmatmul.msk.f32.gmra.mxu1 %vm246_vm1, %v1984_v21  ;;  %3399 = vmatmul.msk.f32.gmra.mxu2 %vm246_vm1, %v1986_v12 }
 0x24a   : > { %3437 = vmatmul.msk.f32.gmra.mxu3 %vm246_vm1, %v2296_v10  ;;  %3475 = vmatmul.msk.f32.gmra.mxu0 %vm246_vm1, %v2606_v11 }
 0x24b   : > { %v2903_v20 = vadd.f32 %v4247_v52, %v2863_v3  ;;  %v2299_v3 = vld [vmem:[%s3597_s27 + $0x10d] sm:$0xff] }
 0x24c   : > { %v2156_v16 = vpop.f32.mrf.mxu2 }
 0x24d   : > { %v2939_v2 = vmax.f32 %v2903_v20, 0.0  ;;  %v2244_v58 = vadd.f32 %v2156_v16, %v1934_v55  ;;  %v2466_v42 = vpop.f32.mrf.mxu3  ;;  %v2609_v20 = vld [vmem:[%s3597_s27 + $0x10e] sm:$0xff] }
 0x24e   : > { %v1849_v36 = vpop.f32.mrf.mxu1 }
 0x24f   : > { %v3017_v8 = vld [vmem:[#allocation2 + $0x3e] sm:$0xff]  ;;  %2975 = vst.msk [vmem:[#allocation2 + $0x48] sm:$0xff] %vm246_vm1, %v2939_v2  ;;  %v2554_v21 = vadd.f32 %v2466_v42, %v2244_v58  ;;  %v2779_v38 = vpop.f32.mrf.mxu0  ;;  %v1935_v59 = vadd.f32 %v1849_v36, %v3994_v40 }
 0x250   : > { %3490 = vst.msk [vmem:[%s4271_s16 + $0x38] sm:$0xff] %vm246_vm1, %v3017_v8 }
 0x251   : > { %v2864_v15 = vadd.f32 %v2776_v31, %v2554_v21  ;;  %3362 = vmatmul.msk.f32.gmra.mxu1 %vm246_vm1, %v1985_v28  ;;  %3400 = vmatmul.msk.f32.gmra.mxu2 %vm246_vm1, %v1987_v17  ;;  %v1989_v31 = vld [vmem:[%s3597_s27 + $0x10c] sm:$0xff] }
 0x252   : > { %3438 = vmatmul.msk.f32.gmra.mxu3 %vm246_vm1, %v2297_v56  ;;  %3476 = vmatmul.msk.f32.gmra.mxu0 %vm246_vm1, %v2607_v47  ;;  %v1990_v56 = vld [vmem:[%s3597_s27 + $0x114] sm:$0xff] }
 0x253   : > { %v2904_v22 = vadd.f32 %v4247_v52, %v2864_v15  ;;  %v2610_v15 = vld [vmem:[%s3597_s27 + $0x116] sm:$0xff] }
 0x254   : > { %v2159_v26 = vpop.f32.mrf.mxu2 }
 0x255   : > { %v2940_v1 = vmax.f32 %v2904_v22, 0.0  ;;  %v2245_v39 = vadd.f32 %v2159_v26, %v1935_v59  ;;  %v2469_v49 = vpop.f32.mrf.mxu3 }
 0x256   : > { %v3021_v43 = vld [vmem:[#allocation2 + $0x48] sm:$0xff]  ;;  %v1852_v24 = vpop.f32.mrf.mxu1 }
 0x257   : > { %3491 = vst.msk [vmem:[%s4271_s16 + $0x40] sm:$0xff] %vm246_vm1, %v3021_v43  ;;  %v2555_v28 = vadd.f32 %v2469_v49, %v2245_v39  ;;  %v2782_v45 = vpop.f32.mrf.mxu0  ;;  %v1936_v40 = vadd.f32 %v1852_v24, %v4004_v62 }
 0x258   : > { %2976 = vst.msk [vmem:[#allocation2 + $0x50] sm:$0xff] %vm246_vm1, %v2940_v1 }
 0x259   : > { %v2865_v5 = vadd.f32 %v2779_v38, %v2555_v28  ;;  %3363 = vmatmul.msk.f32.gmra.mxu1 %vm246_vm1, %v1986_v12  ;;  %3401 = vmatmul.msk.f32.gmra.mxu2 %vm246_vm1, %v1988_v33  ;;  %v2300_v38 = vld [vmem:[%s3597_s27 + $0x115] sm:$0xff] }
 0x25a   : > { %3439 = vmatmul.msk.f32.gmra.mxu3 %vm246_vm1, %v2298_v46  ;;  %3477 = vmatmul.msk.f32.gmra.mxu0 %vm246_vm1, %v2608_v60  ;;  %v1991_v28 = vld [vmem:[%s3597_s27 + $0x11c] sm:$0xff] }
 0x25b   : > { %v2905_v35 = vadd.f32 %v4247_v52, %v2865_v5  ;;  %v2301_v46 = vld [vmem:[%s3597_s27 + $0x11d] sm:$0xff] }
 0x25c   : > { %v2162_v51 = vpop.f32.mrf.mxu2  ;;  %v2611_v60 = vld [vmem:[%s3597_s27 + $0x11e] sm:$0xff] }
 0x25d   : > { %v2941_v48 = vmax.f32 %v2905_v35, 0.0  ;;  %v2246_v50 = vadd.f32 %v2162_v51, %v1936_v40  ;;  %v2472_v61 = vpop.f32.mrf.mxu3 }
 0x25e   : > { %v1855_v10 = vpop.f32.mrf.mxu1 }
 0x25f   : > { %v3022_v11 = vld [vmem:[#allocation2 + $0x50] sm:$0xff]  ;;  %2977 = vst.msk [vmem:[#allocation2 + $0x58] sm:$0xff] %vm246_vm1, %v2941_v48  ;;  %v2556_v12 = vadd.f32 %v2472_v61, %v2246_v50  ;;  %v2785_v55 = vpop.f32.mrf.mxu0  ;;  %v1937_v16 = vadd.f32 %v1855_v10, %v4014_v6  ;;  %v1992_v10 = vld [vmem:[%s3597_s27 + $0x124] sm:$0xff] }
 0x260   : > { %3492 = vst.msk [vmem:[%s4271_s16 + $0x48] sm:$0xff] %vm246_vm1, %v3022_v11 }
 0x261   : > { %v2866_v62 = vadd.f32 %v2782_v45, %v2556_v12  ;;  %3364 = vmatmul.msk.f32.gmra.mxu1 %vm246_vm1, %v1987_v17  ;;  %3402 = vmatmul.msk.f32.gmra.mxu2 %vm246_vm1, %v1989_v31  ;;  %v2302_v12 = vld [vmem:[%s3597_s27 + $0x125] sm:$0xff] }
 0x262   : > { %3440 = vmatmul.msk.f32.gmra.mxu3 %vm246_vm1, %v2299_v3  ;;  %3478 = vmatmul.msk.f32.gmra.mxu0 %vm246_vm1, %v2609_v20 }
 0x263   : > { %v2906_v2 = vadd.f32 %v4247_v52, %v2866_v62 }
 0x264   : > { %v2165_v58 = vpop.f32.mrf.mxu2 }
 0x265   : > { %v2942_v42 = vmax.f32 %v2906_v2, 0.0  ;;  %v2247_v36 = vadd.f32 %v2165_v58, %v1937_v16  ;;  %v2475_v8 = vpop.f32.mrf.mxu3 }
 0x266   : > { %v1858_v21 = vpop.f32.mrf.mxu1 }
 0x267   : > { %2978 = vst.msk [vmem:[#allocation2 + $0x60] sm:$0xff] %vm246_vm1, %v2942_v42  ;;  %v2557_v17 = vadd.f32 %v2475_v8, %v2247_v36  ;;  %v2788_v47 = vpop.f32.mrf.mxu0  ;;  %v1938_v6 = vadd.f32 %v1858_v21, %v4024_v29  ;;  %v1993_v21 = vld [vmem:[%s3597_s27 + $0x12c] sm:$0xff] }
 0x269   : > { %v2867_v59 = vadd.f32 %v2785_v55, %v2557_v17  ;;  %3365 = vmatmul.msk.f32.gmra.mxu1 %vm246_vm1, %v1988_v33  ;;  %3403 = vmatmul.msk.f32.gmra.mxu2 %vm246_vm1, %v1990_v56  ;;  %v2612_v55 = vld [vmem:[%s3597_s27 + $0x126] sm:$0xff] }
 0x26a   : > { %3441 = vmatmul.msk.f32.gmra.mxu3 %vm246_vm1, %v2300_v38  ;;  %3479 = vmatmul.msk.f32.gmra.mxu0 %vm246_vm1, %v2610_v15  ;;  %v2303_v17 = vld [vmem:[%s3597_s27 + $0x12d] sm:$0xff] }
 0x26b   : > { %v2907_v22 = vadd.f32 %v4247_v52, %v2867_v59 }
 0x26c   : > { %v2168_v26 = vpop.f32.mrf.mxu2 }
 0x26d   : > { %v2943_v1 = vmax.f32 %v2907_v22, 0.0  ;;  %v2248_v39 = vadd.f32 %v2168_v26, %v1938_v6  ;;  %v2478_v49 = vpop.f32.mrf.mxu3 }
 0x26e   : > { %v3026_v43 = vld [vmem:[#allocation2 + $0x5a] sm:$0xff]  ;;  %v1861_v24 = vpop.f32.mrf.mxu1 }
 0x26f   : > { %3493 = vst.msk [vmem:[%s4271_s16 + $0x50] sm:$0xff] %vm246_vm1, %v3026_v43  ;;  %v2558_v33 = vadd.f32 %v2478_v49, %v2248_v39  ;;  %v2791_v45 = vpop.f32.mrf.mxu0  ;;  %v1939_v29 = vadd.f32 %v1861_v24, %v4034_v54  ;;  %v1994_v49 = vld [vmem:[%s3597_s27 + $0x134] sm:$0xff] }
 0x270   : > { %2979 = vst.msk [vmem:[#allocation2 + $0x68] sm:$0xff] %vm246_vm1, %v2943_v1 }
 0x271   : > { %v2868_v5 = vadd.f32 %v2788_v47, %v2558_v33  ;;  %3366 = vmatmul.msk.f32.gmra.mxu1 %vm246_vm1, %v1989_v31  ;;  %3404 = vmatmul.msk.f32.gmra.mxu2 %vm246_vm1, %v1991_v28  ;;  %v2613_v47 = vld [vmem:[%s3597_s27 + $0x12e] sm:$0xff] }
 0x272   : > { %3442 = vmatmul.msk.f32.gmra.mxu3 %vm246_vm1, %v2301_v46  ;;  %3480 = vmatmul.msk.f32.gmra.mxu0 %vm246_vm1, %v2611_v60  ;;  %v2614_v46 = vld [vmem:[%s3597_s27 + $0x136] sm:$0xff] }
 0x273   : > { %v2908_v40 = vadd.f32 %v4247_v52, %v2868_v5 }
 0x274   : > { %v2171_v35 = vpop.f32.mrf.mxu2 }
 0x275   : > { %v2944_v51 = vmax.f32 %v2908_v40, 0.0  ;;  %v2249_v48 = vadd.f32 %v2171_v35, %v1939_v29  ;;  %v2481_v50 = vpop.f32.mrf.mxu3 }
 0x276   : > { %v1864_v61 = vpop.f32.mrf.mxu1 }
 0x277   : > { %v3027_v11 = vld [vmem:[#allocation2 + $0x62] sm:$0xff]  ;;  %2980 = vst.msk [vmem:[#allocation2 + $0x70] sm:$0xff] %vm246_vm1, %v2944_v51  ;;  %v2559_v31 = vadd.f32 %v2481_v50, %v2249_v48  ;;  %v2794_v3 = vpop.f32.mrf.mxu0  ;;  %v1940_v20 = vadd.f32 %v1864_v61, %v4044_v13 }
 0x278   : > { %3494 = vst.msk [vmem:[%s4271_s16 + $0x58] sm:$0xff] %vm246_vm1, %v3027_v11  ;;  %v1995_v50 = vld [vmem:[%s3597_s27 + $0x13c] sm:$0xff] }
 0x279   : > { %v2869_v54 = vadd.f32 %v2791_v45, %v2559_v31  ;;  %3367 = vmatmul.msk.f32.gmra.mxu1 %vm246_vm1, %v1990_v56  ;;  %3405 = vmatmul.msk.f32.gmra.mxu2 %vm246_vm1, %v1992_v10  ;;  %v2615_v31 = vld [vmem:[%s3597_s27 + $0x13e] sm:$0xff] }
 0x27a   : > { %3443 = vmatmul.msk.f32.gmra.mxu3 %vm246_vm1, %v2302_v12  ;;  %3481 = vmatmul.msk.f32.gmra.mxu0 %vm246_vm1, %v2612_v55 }
 0x27b   : > { %v2909_v62 = vadd.f32 %v4247_v52, %v2869_v54 }
 0x27c   : > { %v2174_v16 = vpop.f32.mrf.mxu2 }
 0x27d   : > { %v2945_v2 = vmax.f32 %v2909_v62, 0.0  ;;  %v2250_v58 = vadd.f32 %v2174_v16, %v1940_v20  ;;  %v2484_v42 = vpop.f32.mrf.mxu3 }
 0x27e   : > { %v3031_v36 = vld [vmem:[#allocation2 + $0x6c] sm:$0xff]  ;;  %v1867_v8 = vpop.f32.mrf.mxu1 }
 0x27f   : > { %3495 = vst.msk [vmem:[%s4271_s16 + $0x60] sm:$0xff] %vm246_vm1, %v3031_v36  ;;  %v2560_v56 = vadd.f32 %v2484_v42, %v2250_v58  ;;  %v2797_v38 = vpop.f32.mrf.mxu0  ;;  %v1941_v13 = vadd.f32 %v1867_v8, %v4054_v7 }
 0x280   : > { %2981 = vst.msk [vmem:[#allocation2 + $0x78] sm:$0xff] %vm246_vm1, %v2945_v2 }
 0x281   : > { %v2870_v15 = vadd.f32 %v2794_v3, %v2560_v56  ;;  %3368 = vmatmul.msk.f32.gmra.mxu1 %vm246_vm1, %v1991_v28  ;;  %3406 = vmatmul.msk.f32.gmra.mxu2 %vm246_vm1, %v1993_v21  ;;  %v2304_v28 = vld [vmem:[%s3597_s27 + $0x135] sm:$0xff] }
 0x282   : > { %3444 = vmatmul.msk.f32.gmra.mxu3 %vm246_vm1, %v2303_v17  ;;  %3482 = vmatmul.msk.f32.gmra.mxu0 %vm246_vm1, %v2613_v47 }
 0x283   : > { %v2910_v59 = vadd.f32 %v4247_v52, %v2870_v15 }
 0x284   : > { %v2177_v6 = vpop.f32.mrf.mxu2 }
 0x285   : > { %v2946_v22 = vmax.f32 %v2910_v59, 0.0  ;;  %v2251_v26 = vadd.f32 %v2177_v6, %v1941_v13  ;;  %v2487_v1 = vpop.f32.mrf.mxu3 }
 0x286   : > { %v1870_v39 = vpop.f32.mrf.mxu1 }
 0x287   : > { %v3032_v43 = vld [vmem:[#allocation2 + $0x74] sm:$0xff]  ;;  %2982 = vst.msk [vmem:[#allocation2 + $0x80] sm:$0xff] %vm246_vm1, %v2946_v22  ;;  %v2561_v24 = vadd.f32 %v2487_v1, %v2251_v26  ;;  %v2800_v33 = vpop.f32.mrf.mxu0  ;;  %v1942_v45 = vadd.f32 %v1870_v39, %v4064_v25 }
 0x288   : > { %3496 = vst.msk [vmem:[%s4271_s16 + $0x68] sm:$0xff] %vm246_vm1, %v3032_v43 }
 0x289   : > { %v2871_v7 = vadd.f32 %v2797_v38, %v2561_v24  ;;  %3369 = vmatmul.msk.f32.gmra.mxu1 %vm246_vm1, %v1992_v10  ;;  %3407 = vmatmul.msk.f32.gmra.mxu2 %vm246_vm1, %v1994_v49  ;;  %v2305_v10 = vld [vmem:[%s3597_s27 + $0x13d] sm:$0xff] }
 0x28a   : > { %3445 = vmatmul.msk.f32.gmra.mxu3 %vm246_vm1, %v2304_v28  ;;  %3483 = vmatmul.msk.f32.gmra.mxu0 %vm246_vm1, %v2614_v46 }
 0x28b   : > { %v2911_v60 = vadd.f32 %v4247_v52, %v2871_v7 }
 0x28c   : > { %v2180_v5 = vpop.f32.mrf.mxu2 }
 0x28d   : > { %v2947_v29 = vmax.f32 %v2911_v60, 0.0  ;;  %v2252_v40 = vadd.f32 %v2180_v5, %v1942_v45  ;;  %v2490_v35 = vpop.f32.mrf.mxu3 }
 0x28e   : > { %v3036_v51 = vld [vmem:[#allocation2 + $0x7e] sm:$0xff]  ;;  %v1873_v48 = vpop.f32.mrf.mxu1 }
 0x28f   : > { %3497 = vst.msk [vmem:[%s4271_s16 + $0x70] sm:$0xff] %vm246_vm1, %v3036_v51  ;;  %v2562_v61 = vadd.f32 %v2490_v35, %v2252_v40  ;;  %v2803_v11 = vpop.f32.mrf.mxu0  ;;  %v1943_v25 = vadd.f32 %v1873_v48, %v4075_v32 }
 0x290   : > { %2983 = vst.msk [vmem:[#allocation2 + $0x88] sm:$0xff] %vm246_vm1, %v2947_v29 }
 0x291   : > { %v2872_v12 = vadd.f32 %v2800_v33, %v2562_v61  ;;  %3370 = vmatmul.msk.f32.gmra.mxu1 %vm246_vm1, %v1993_v21  ;;  %3408 = vmatmul.msk.f32.gmra.mxu2 %vm246_vm1, %v1995_v50 }
 0x292   : > { %3446 = vmatmul.msk.f32.gmra.mxu3 %vm246_vm1, %v2305_v10  ;;  %3484 = vmatmul.msk.f32.gmra.mxu0 %vm246_vm1, %v2615_v31 }
 0x293   : > { %v2912_v3 = vadd.f32 %v4247_v52, %v2872_v12 }
 0x294   : > { %v2183_v55 = vpop.f32.mrf.mxu2 }
 0x295   : > { %v2948_v54 = vmax.f32 %v2912_v3, 0.0  ;;  %v2253_v20 = vadd.f32 %v2183_v55, %v1943_v25  ;;  %v2493_v62 = vpop.f32.mrf.mxu3 }
 0x296   : > { %v1876_v16 = vpop.f32.mrf.mxu1 }
 0x297   : > { %v3037_v2 = vld [vmem:[#allocation2 + $0x86] sm:$0xff]  ;;  %2984 = vst.msk [vmem:[#allocation2 + $0x90] sm:$0xff] %vm246_vm1, %v2948_v54  ;;  %v2563_v58 = vadd.f32 %v2493_v62, %v2253_v20  ;;  %v2806_v42 = vpop.f32.mrf.mxu0  ;;  %v1944_v8 = vadd.f32 %v1876_v16, %v4086_v57 }
 0x298   : > { %3498 = vst.msk [vmem:[%s4271_s16 + $0x78] sm:$0xff] %vm246_vm1, %v3037_v2 }
 0x299   : > { %v2873_v36 = vadd.f32 %v2803_v11, %v2563_v58 }
 0x29b   : > { %v2913_v32 = vadd.f32 %v4247_v52, %v2873_v36 }
 0x29c   : > { %v2186_v21 = vpop.f32.mrf.mxu2 }
 0x29d   : > { %v2949_v56 = vmax.f32 %v2913_v32, 0.0  ;;  %v2254_v17 = vadd.f32 %v2186_v21, %v1944_v8  ;;  %v2496_v38 = vpop.f32.mrf.mxu3 }
 0x29e   : > { %v3041_v47 = vld [vmem:[#allocation2 + $0x90] sm:$0xff]  ;;  %v1879_v15 = vpop.f32.mrf.mxu1 }
 0x29f   : > { %3499 = vst.msk [vmem:[%s4271_s16 + $0x80] sm:$0xff] %vm246_vm1, %v3041_v47  ;;  %v2564_v13 = vadd.f32 %v2496_v38, %v2254_v17  ;;  %v2809_v59 = vpop.f32.mrf.mxu0  ;;  %v1945_v22 = vadd.f32 %v1879_v15, %v4096_v19 }
 0x2a0   : > { %2985 = vst.msk [vmem:[#allocation2 + $0x98] sm:$0xff] %vm246_vm1, %v2949_v56 }
 0x2a1   : > { %v2874_v6 = vadd.f32 %v2806_v42, %v2564_v13 }
 0x2a3   : > { %v2914_v57 = vadd.f32 %v4247_v52, %v2874_v6 }
 0x2a4   : > { %v2189_v26 = vpop.f32.mrf.mxu2 }
 0x2a5   : > { %v2950_v1 = vmax.f32 %v2914_v57, 0.0  ;;  %v2255_v39 = vadd.f32 %v2189_v26, %v1945_v22  ;;  %v2499_v49 = vpop.f32.mrf.mxu3 }
 0x2a6   : > { %v1882_v43 = vpop.f32.mrf.mxu1 }
 0x2a7   : > { %v3042_v24 = vld [vmem:[#allocation2 + $0x98] sm:$0xff]  ;;  %2986 = vst.msk [vmem:[#allocation2 + $0xa0] sm:$0xff] %vm246_vm1, %v2950_v1  ;;  %v2565_v28 = vadd.f32 %v2499_v49, %v2255_v39  ;;  %v2812_v33 = vpop.f32.mrf.mxu0  ;;  %v1946_v7 = vadd.f32 %v1882_v43, %v4106_v41 }
 0x2a8   : > { %3500 = vst.msk [vmem:[%s4271_s16 + $0x88] sm:$0xff] %vm246_vm1, %v3042_v24 }
 0x2a9   : > { %v2875_v46 = vadd.f32 %v2809_v59, %v2565_v28 }
 0x2ab   : > { %v2915_v45 = vadd.f32 %v4247_v52, %v2875_v46 }
 0x2ac   : > { %v2192_v19 = vpop.f32.mrf.mxu2 }
 0x2ad   : > { %v2951_v60 = vmax.f32 %v2915_v45, 0.0  ;;  %v2256_v5 = vadd.f32 %v2192_v19, %v1946_v7  ;;  %v2502_v29 = vpop.f32.mrf.mxu3 }
 0x2ae   : > { %v1885_v40 = vpop.f32.mrf.mxu1 }
 0x2af   : > { %2987 = vst.msk [vmem:[#allocation2 + $0xa8] sm:$0xff] %vm246_vm1, %v2951_v60  ;;  %v2566_v35 = vadd.f32 %v2502_v29, %v2256_v5  ;;  %v2815_v51 = vpop.f32.mrf.mxu0  ;;  %v1947_v50 = vadd.f32 %v1885_v40, %v4116_v0 }
 0x2b1   : > { %v2876_v48 = vadd.f32 %v2812_v33, %v2566_v35 }
 0x2b3   : > { %v2916_v61 = vadd.f32 %v4247_v52, %v2876_v48 }
 0x2b4   : > { %v2195_v10 = vpop.f32.mrf.mxu2 }
 0x2b5   : > { %v2952_v11 = vmax.f32 %v2916_v61, 0.0  ;;  %v2257_v41 = vadd.f32 %v2195_v10, %v1947_v50  ;;  %v2505_v31 = vpop.f32.mrf.mxu3 }
 0x2b6   : > { %v3046_v12 = vld [vmem:[#allocation2 + $0xa2] sm:$0xff]  ;;  %v1888_v25 = vpop.f32.mrf.mxu1 }
 0x2b7   : > { %3501 = vst.msk [vmem:[%s4271_s16 + $0x90] sm:$0xff] %vm246_vm1, %v3046_v12  ;;  %v2567_v3 = vadd.f32 %v2505_v31, %v2257_v41  ;;  %v2818_v55 = vpop.f32.mrf.mxu0  ;;  %v1948_v20 = vadd.f32 %v1888_v25, %v4126_v53 }
 0x2b8   : > { %2988 = vst.msk [vmem:[#allocation2 + $0xb0] sm:$0xff] %vm246_vm1, %v2952_v11 }
 0x2b9   : > { %v2877_v54 = vadd.f32 %v2815_v51, %v2567_v3 }
 0x2bb   : > { %v2917_v0 = vadd.f32 %v4247_v52, %v2877_v54 }
 0x2bc   : > { %v2198_v62 = vpop.f32.mrf.mxu2 }
 0x2bd   : > { %v2953_v16 = vmax.f32 %v2917_v0, 0.0  ;;  %v2258_v2 = vadd.f32 %v2198_v62, %v1948_v20  ;;  %v2508_v58 = vpop.f32.mrf.mxu3 }
 0x2be   : > { %v1891_v42 = vpop.f32.mrf.mxu1 }
 0x2bf   : > { %v3047_v36 = vld [vmem:[#allocation2 + $0xaa] sm:$0xff]  ;;  %2989 = vst.msk [vmem:[#allocation2 + $0xb8] sm:$0xff] %vm246_vm1, %v2953_v16  ;;  %v2568_v8 = vadd.f32 %v2508_v58, %v2258_v2  ;;  %v2821_v32 = vpop.f32.mrf.mxu0  ;;  %v1949_v56 = vadd.f32 %v1891_v42, %v4136_v63 }
 0x2c0   : > { %3502 = vst.msk [vmem:[%s4271_s16 + $0x98] sm:$0xff] %vm246_vm1, %v3047_v36 }
 0x2c1   : > { %v2878_v21 = vadd.f32 %v2818_v55, %v2568_v8 }
 0x2c3   : > { %v2918_v53 = vadd.f32 %v4247_v52, %v2878_v21 }
 0x2c4   : > { %v2201_v17 = vpop.f32.mrf.mxu2 }
 0x2c5   : > { %v2954_v38 = vmax.f32 %v2918_v53, 0.0  ;;  %v2259_v47 = vadd.f32 %v2201_v17, %v1949_v56  ;;  %v2511_v15 = vpop.f32.mrf.mxu3 }
 0x2c6   : > { %v3051_v13 = vld [vmem:[#allocation2 + $0xb4] sm:$0xff]  ;;  %v1894_v59 = vpop.f32.mrf.mxu1 }
 0x2c7   : > { %3503 = vst.msk [vmem:[%s4271_s16 + $0xa0] sm:$0xff] %vm246_vm1, %v3051_v13  ;;  %v2569_v6 = vadd.f32 %v2511_v15, %v2259_v47  ;;  %v2824_v22 = vpop.f32.mrf.mxu0  ;;  %v1950_v26 = vadd.f32 %v1894_v59, %v4146_v4 }
 0x2c8   : > { %2990 = vst.msk [vmem:[#allocation2 + $0xc0] sm:$0xff] %vm246_vm1, %v2954_v38 }
 0x2c9   : > { %v2879_v57 = vadd.f32 %v2821_v32, %v2569_v6 }
 0x2cb   : > { %v2919_v63 = vadd.f32 %v4247_v52, %v2879_v57 }
 0x2cc   : > { %v2204_v1 = vpop.f32.mrf.mxu2 }
 0x2cd   : > { %v2955_v39 = vmax.f32 %v2919_v63, 0.0  ;;  %v2260_v49 = vadd.f32 %v2204_v1, %v1950_v26  ;;  %v2514_v43 = vpop.f32.mrf.mxu3 }
 0x2ce   : > { %v1897_v24 = vpop.f32.mrf.mxu1 }
 0x2cf   : > { %v3052_v28 = vld [vmem:[#allocation2 + $0xbc] sm:$0xff]  ;;  %2991 = vst.msk [vmem:[#allocation2 + $0xc8] sm:$0xff] %vm246_vm1, %v2955_v39  ;;  %v2570_v33 = vadd.f32 %v2514_v43, %v2260_v49  ;;  %v2827_v46 = vpop.f32.mrf.mxu0  ;;  %v1951_v45 = vadd.f32 %v1897_v24, %v4156_v27 }
 0x2d0   : > { %3504 = vst.msk [vmem:[%s4271_s16 + $0xa8] sm:$0xff] %vm246_vm1, %v3052_v28 }
 0x2d1   : > { %v2880_v7 = vadd.f32 %v2824_v22, %v2570_v33 }
 0x2d3   : > { %v2920_v4 = vadd.f32 %v4247_v52, %v2880_v7 }
 0x2d4   : > { %v2207_v19 = vpop.f32.mrf.mxu2 }
 0x2d5   : > { %v2956_v60 = vmax.f32 %v2920_v4, 0.0  ;;  %v2261_v5 = vadd.f32 %v2207_v19, %v1951_v45  ;;  %v2517_v29 = vpop.f32.mrf.mxu3 }
 0x2d6   : > { %v3056_v40 = vld [vmem:[#allocation2 + $0xc6] sm:$0xff]  ;;  %v1900_v35 = vpop.f32.mrf.mxu1 }
 0x2d7   : > { %3505 = vst.msk [vmem:[%s4271_s16 + $0xb0] sm:$0xff] %vm246_vm1, %v3056_v40  ;;  %v2571_v51 = vadd.f32 %v2517_v29, %v2261_v5  ;;  %v2830_v48 = vpop.f32.mrf.mxu0  ;;  %v1952_v61 = vadd.f32 %v1900_v35, %v4166_v18 }
 0x2d8   : > { %2992 = vst.msk [vmem:[#allocation2 + $0xd0] sm:$0xff] %vm246_vm1, %v2956_v60 }
 0x2d9   : > { %v2881_v50 = vadd.f32 %v2827_v46, %v2571_v51 }
 0x2db   : > { %v2921_v27 = vadd.f32 %v4247_v52, %v2881_v50 }
 0x2dc   : > { %v2210_v10 = vpop.f32.mrf.mxu2 }
 0x2dd   : > { %v2957_v11 = vmax.f32 %v2921_v27, 0.0  ;;  %v2262_v41 = vadd.f32 %v2210_v10, %v1952_v61  ;;  %v2520_v31 = vpop.f32.mrf.mxu3 }
 0x2de   : > { %v1903_v12 = vpop.f32.mrf.mxu1 }
 0x2df   : > { %v3057_v25 = vld [vmem:[#allocation2 + $0xce] sm:$0xff]  ;;  %2993 = vst.msk [vmem:[#allocation2 + $0xd8] sm:$0xff] %vm246_vm1, %v2957_v11  ;;  %v2572_v3 = vadd.f32 %v2520_v31, %v2262_v41  ;;  %v2833_v55 = vpop.f32.mrf.mxu0  ;;  %v1953_v20 = vadd.f32 %v1903_v12, %v4176_v14 }
 0x2e0   : > { %3506 = vst.msk [vmem:[%s4271_s16 + $0xb8] sm:$0xff] %vm246_vm1, %v3057_v25 }
 0x2e1   : > { %v2882_v54 = vadd.f32 %v2830_v48, %v2572_v3 }
 0x2e3   : > { %v2922_v18 = vadd.f32 %v4247_v52, %v2882_v54 }
 0x2e4   : > { %v2213_v0 = vpop.f32.mrf.mxu2 }
 0x2e5   : > { %v2958_v62 = vmax.f32 %v2922_v18, 0.0  ;;  %v2263_v16 = vadd.f32 %v2213_v0, %v1953_v20  ;;  %v2523_v2 = vpop.f32.mrf.mxu3 }
 0x2e6   : > { %v3061_v58 = vld [vmem:[#allocation2 + $0xd8] sm:$0xff]  ;;  %v1906_v42 = vpop.f32.mrf.mxu1 }
 0x2e7   : > { %3507 = vst.msk [vmem:[%s4271_s16 + $0xc0] sm:$0xff] %vm246_vm1, %v3061_v58  ;;  %v2573_v36 = vadd.f32 %v2523_v2, %v2263_v16  ;;  %v2836_v8 = vpop.f32.mrf.mxu0  ;;  %v1954_v21 = vadd.f32 %v1906_v42, %v4186_v34  ;;  %v3531_v34 = vld [vmem:[%s4560_s2] ss:$0 sm:$0xff] }
 0x2e8   : > { %2994 = vst.msk [vmem:[#allocation2 + $0xe0] sm:$0xff] %vm246_vm1, %v2958_v62 }
 0x2e9   : > { %v2883_v32 = vadd.f32 %v2833_v55, %v2573_v36 }
 0x2eb   : > { %v2923_v14 = vadd.f32 %v4247_v52, %v2883_v32 }
 0x2ec   : > { %v2216_v56 = vpop.f32.mrf.mxu2 }
 0x2ed   : > { %v2959_v53 = vmax.f32 %v2923_v14, 0.0  ;;  %v2264_v17 = vadd.f32 %v2216_v56, %v1954_v21  ;;  %v2526_v38 = vpop.f32.mrf.mxu3 }
 0x2ee   : > { %v1909_v47 = vpop.f32.mrf.mxu1 }
 0x2ef   : > { %v3062_v15 = vld [vmem:[#allocation2 + $0xe0] sm:$0xff]  ;;  %2995 = vst.msk [vmem:[#allocation2 + $0xe8] sm:$0xff] %vm246_vm1, %v2959_v53  ;;  %v2574_v13 = vadd.f32 %v2526_v38, %v2264_v17  ;;  %v2839_v59 = vpop.f32.mrf.mxu0  ;;  %v1955_v22 = vadd.f32 %v1909_v47, %v4196_v23 }
 0x2f0   : > { %3508 = vst.msk [vmem:[%s4271_s16 + $0xc8] sm:$0xff] %vm246_vm1, %v3062_v15 }
 0x2f1   : > { %v2884_v6 = vadd.f32 %v2836_v8, %v2574_v13 }
 0x2f3   : > { %v2924_v52 = vadd.f32 %v3531_v34, %v2884_v6 }
 0x2f4   : > { %v2219_v57 = vpop.f32.mrf.mxu2 }
 0x2f5   : > { %v2960_v26 = vmax.f32 %v2924_v52, 0.0  ;;  %v2265_v63 = vadd.f32 %v2219_v57, %v1955_v22  ;;  %v2529_v1 = vpop.f32.mrf.mxu3 }
 0x2f6   : > { %v1912_v39 = vpop.f32.mrf.mxu1 }
 0x2f7   : > { %2996 = vst.msk [vmem:[#allocation2 + $0xf0] sm:$0xff] %vm246_vm1, %v2960_v26  ;;  %v2575_v49 = vadd.f32 %v2529_v1, %v2265_v63  ;;  %v2842_v43 = vpop.f32.mrf.mxu0  ;;  %v1956_v28 = vadd.f32 %v1912_v39, %v4206_v30 }
 0x2f9   : > { %v2885_v24 = vadd.f32 %v2839_v59, %v2575_v49 }
 0x2fb   : > { %v2925_v33 = vadd.f32 %v3531_v34, %v2885_v24 }
 0x2fc   : > { %v2222_v23 = vpop.f32.mrf.mxu2 }
 0x2fd   : > { %v2961_v46 = vmax.f32 %v2925_v33, 0.0  ;;  %v2266_v7 = vadd.f32 %v2222_v23, %v1956_v28  ;;  %v2532_v45 = vpop.f32.mrf.mxu3 }
 0x2fe   : > { %v3066_v4 = vld [vmem:[#allocation2 + $0xea] sm:$0xff]  ;;  %v1915_v19 = vpop.f32.mrf.mxu1 }
 0x2ff   : > { %3509 = vst.msk [vmem:[%s4271_s16 + $0xd0] sm:$0xff] %vm246_vm1, %v3066_v4  ;;  %v2576_v60 = vadd.f32 %v2532_v45, %v2266_v7  ;;  %v2845_v29 = vpop.f32.mrf.mxu0  ;;  %v1957_v40 = vadd.f32 %v1915_v19, %v4216_v37 }
 0x300   : > { %2997 = vst.msk [vmem:[#allocation2 + $0xf8] sm:$0xff] %vm246_vm1, %v2961_v46 }
 0x301   : > { %v2886_v5 = vadd.f32 %v2842_v43, %v2576_v60 }
 0x303   : > { %v2926_v35 = vadd.f32 %v3531_v34, %v2886_v5 }
 0x304   : > { %v2225_v51 = vpop.f32.mrf.mxu2 }
 0x305   : > { %v2962_v30 = vmax.f32 %v2926_v35, 0.0  ;;  %v2267_v48 = vadd.f32 %v2225_v51, %v1957_v40  ;;  %v2535_v50 = vpop.f32.mrf.mxu3 }
 0x306   : > { %v1918_v61 = vpop.f32.mrf.mxu1 }
 0x307   : > { %v3067_v27 = vld [vmem:[#allocation2 + $0xf2] sm:$0xff]  ;;  %2998 = vst.msk [vmem:[#allocation2 + $0x100] sm:$0xff] %vm246_vm1, %v2962_v30  ;;  %v2577_v10 = vadd.f32 %v2535_v50, %v2267_v48  ;;  %v1958_v41 = vadd.f32 %v1918_v61, %v4226_v44  ;;  %v2848_v25 = vpop.f32.mrf.mxu0 }
 0x308   : > { %3510 = vst.msk [vmem:[%s4271_s16 + $0xd8] sm:$0xff] %vm246_vm1, %v3067_v27 }
 0x309   : > { %v2887_v11 = vadd.f32 %v2845_v29, %v2577_v10 }
 0x30b   : > { %v2927_v31 = vadd.f32 %v3531_v34, %v2887_v11 }
 0x30c   : > { %v2228_v12 = vpop.f32.mrf.mxu2 }
 0x30d   : > { %v2963_v37 = vmax.f32 %v2927_v31, 0.0  ;;  %v2268_v3 = vadd.f32 %v2228_v12, %v1958_v41  ;;  %v2538_v55 = vpop.f32.mrf.mxu3 }
 0x30e   : > { %v3071_v54 = vld [vmem:[#allocation2 + $0xfc] sm:$0xff]  ;;  %v1921_v18 = vpop.f32.mrf.mxu1 }
 0x30f   : > { %3511 = vst.msk [vmem:[%s4271_s16 + $0xe0] sm:$0xff] %vm246_vm1, %v3071_v54  ;;  %v2578_v20 = vadd.f32 %v2538_v55, %v2268_v3  ;;  %v1959_v62 = vadd.f32 %v1921_v18, %v4236_v9  ;;  %v2851_v36 = vpop.f32.mrf.mxu0 }
 0x310   : > { %2999 = vst.msk [vmem:[#allocation2 + $0x108] sm:$0xff] %vm246_vm1, %v2963_v37 }
 0x311   : > { %v2888_v0 = vadd.f32 %v2848_v25, %v2578_v20 }
 0x313   : > { %v2928_v16 = vadd.f32 %v3531_v34, %v2888_v0 }
 0x314   : > { %v2231_v44 = vpop.f32.mrf.mxu2 }
 0x315   : > { %v2964_v2 = vmax.f32 %v2928_v16, 0.0  ;;  %v2269_v58 = vadd.f32 %v2231_v44, %v1959_v62  ;;  %v2541_v42 = vpop.f32.mrf.mxu3 }
 0x317   : > { %v3072_v8 = vld [vmem:[#allocation2 + $0x104] sm:$0xff]  ;;  %3000 = vst.msk [vmem:[#allocation2 + $0x110] sm:$0xff] %vm246_vm1, %v2964_v2  ;;  %v2579_v32 = vadd.f32 %v2541_v42, %v2269_v58 }
 0x318   : > { %3512 = vst.msk [vmem:[%s4271_s16 + $0xe8] sm:$0xff] %vm246_vm1, %v3072_v8 }
 0x319   : > { %v2889_v21 = vadd.f32 %v2851_v36, %v2579_v32 }
 0x31b   : > { %v2929_v14 = vadd.f32 %v3531_v34, %v2889_v21 }
 0x31d   : > { %v2965_v56 = vmax.f32 %v2929_v14, 0.0 }
 0x31e   : > { %v3076_v53 = vld [vmem:[#allocation2 + $0x10e] sm:$0xff] }
 0x31f   : > { %3513 = vst.msk [vmem:[%s4271_s16 + $0xf0] sm:$0xff] %vm246_vm1, %v3076_v53 }
 0x320   : > { %3001 = vst.msk [vmem:[#allocation2 + $0x118] sm:$0xff] %vm246_vm1, %v2965_v56 }
 0x327   : > { %v3077_v9 = vld [vmem:[#allocation2 + $0x116] sm:$0xff] }
 0x328   : > { %3514 = vst.msk [vmem:[%s4271_s16 + $0xf8] sm:$0xff] %vm246_vm1, %v3077_v9 }
 0x329 PF: > { %s13_s12 = sadd.s32 1, %s3538_s12  }
 0x32a   : > { %p10_p4 = scmp.ge.s32.totalorder %s13_s12, 4  }
 0x32c   :  { %12 = sbr.rel (!%p10_p4) target bundleno = 1 (0x1), region = 85 }

</bundles_post_ra>
